<compile_context>
chip_gen: v6e
topology: v6e:2x2x1
jax: 0.10.0
libtpu: 0.0.40
codegen_flags: <defaults>
</compile_context>

<pallas_src>
import functools

import jax
import jax.numpy as jnp
import numpy as np
from jax.experimental import pallas as pl
from jax.experimental.pallas import tpu as pltpu


# ============================================================================
# Host-side construction of the structural operators
# ============================================================================

def _conv_gathers(H, W, k, s, p):
    """Per-tap 0/1 gather operators G[t, out_pix, in_pix] for a k x k conv."""
    OH = (H + 2 * p - k) // s + 1
    OW = (W + 2 * p - k) // s + 1
    g = np.zeros((k * k, OH * OW, H * W), np.float32)
    for dy in range(k):
        for dx in range(k):
            t = dy * k + dx
            for oy in range(OH):
                iy = oy * s + dy - p
                if iy < 0 or iy >= H:
                    continue
                for ox in range(OW):
                    ix = ox * s + dx - p
                    if 0 <= ix < W:
                        g[t, oy * OW + ox, iy * W + ix] = 1.0
    return g, OH, OW


def _boundary_masks(H, W):
    """(9, 1, H*W) {0,1} masks: 3x3 tap t=(dy*3+dx) valid at output pixel m."""
    m = np.zeros((9, 1, H * W), np.float32)
    for dy in range(3):
        for dx in range(3):
            t = dy * 3 + dx
            for oy in range(H):
                iy = oy + dy - 1
                if not (0 <= iy < H):
                    continue
                for ox in range(W):
                    ix = ox + dx - 1
                    if 0 <= ix < W:
                        m[t, 0, oy * W + ox] = 1.0
    return m


def _upsample1d_mat(n):
    """PyTorch bilinear x2 upsample (align_corners=False) as a (2n, n) matrix."""
    u = np.zeros((2 * n, n), np.float32)
    for o in range(2 * n):
        src = max((o + 0.5) * 0.5 - 0.5, 0.0)
        i0 = min(int(np.floor(src)), n - 1)
        frac = src - i0
        i1 = min(i0 + 1, n - 1)
        u[o, i0] += 1.0 - frac
        u[o, i1] += frac
    return u


def _upsample2d_mat(h, w):
    # out[(oy,ox), (iy,ix)] = Uh[oy,iy] * Uw[ox,ix]  (row-major flattening)
    return np.kron(_upsample1d_mat(h), _upsample1d_mat(w))      # (4hw, hw)


# ============================================================================
# Parameters
# ============================================================================

_CONV_DEFS = [  # (cout, cin, k, stride, pad) — the 6 convs of AE, in order
    (16, 1, 3, 1, 1),
    (16, 16, 2, 2, 0),
    (16, 16, 3, 1, 1),
    (16, 16, 2, 2, 0),
    (16, 16, 3, 1, 1),
    (1, 16, 3, 1, 1),
]


def init_raw_weights(key):
    """PyTorch-default initialised conv weights/biases (numpy, OIHW)."""
    raw = []
    keys = jax.random.split(key, len(_CONV_DEFS))
    for k, (co, ci, ks, _, _) in zip(keys, _CONV_DEFS):
        bound = 1.0 / np.sqrt(ci * ks * ks)
        kw_, kb_ = jax.random.split(k)
        w = jax.random.uniform(kw_, (co, ci, ks, ks), jnp.float32, -bound, bound)
        b = jax.random.uniform(kb_, (co,), jnp.float32, -bound, bound)
        raw.append((np.asarray(w), np.asarray(b)))
    return raw


def _block_weight(w_oihw, nb):
    """Stacked, batch-block-diagonal weight: (nb*cout, taps*nb*cin).

    Column index t*(nb*cin) + n*cin + ci matches the kernel's sublane stacking
    order of the per-tap activation tensors; row index is n*cout + co.
    """
    co, ci, kh, kw = w_oihw.shape
    out = np.zeros((nb * co, kh * kw * nb * ci), np.float32)
    for t in range(kh * kw):
        dy, dx = divmod(t, kw)
        wt = w_oihw[:, :, dy, dx]                      # (co, ci)
        for n in range(nb):
            out[n * co:(n + 1) * co,
                t * nb * ci + n * ci: t * nb * ci + (n + 1) * ci] = wt
    return out


def _block_bias(b, nb):
    return np.tile(np.asarray(b, np.float32), nb).reshape(-1, 1)


def pack_params(raw, H, W, nb):
    """Pack conv weights + structural operators for the fused kernel."""
    assert H % 4 == 0 and W % 4 == 0
    H2, W2, H4, W4 = H // 2, W // 2, H // 4, W // 4

    masks = _boundary_masks(H, W)                         # (9, 1, H*W)
    g2, _, _ = _conv_gathers(H, W, 2, 2, 0)               # (4, H2W2, HW)
    g3, _, _ = _conv_gathers(H2, W2, 3, 1, 1)             # (9, H2W2, H2W2)
    g4, _, _ = _conv_gathers(H2, W2, 2, 2, 0)             # (4, H4W4, H2W2)
    g2t = np.transpose(g2, (0, 2, 1))                     # (4, HW,   H2W2)
    g3t = np.transpose(g3, (0, 2, 1))                     # (9, H2W2, H2W2)  (shared by conv3 & conv5)
    g4t = np.transpose(g4, (0, 2, 1))                     # (4, H2W2, H4W4)
    u1t = _upsample2d_mat(H4, W4).T                       # (H4W4, H2W2)
    u2t = _upsample2d_mat(H2, W2).T                       # (H2W2, HW)

    (w1, b1), (w2, b2), (w3, b3), (w4, b4), (w5, b5), (w6, b6) = raw
    params = (
        masks,
        _block_weight(w1, nb), _block_bias(b1, nb),
        g2t, _block_weight(w2, nb), _block_bias(b2, nb),
        g3t, _block_weight(w3, nb), _block_bias(b3, nb),
        g4t, _block_weight(w4, nb), _block_bias(b4, nb),
        u1t, _block_weight(w5, nb), _block_bias(b5, nb),
        u2t, _block_weight(w6, nb), _block_bias(b6, nb),
    )
    return tuple(jnp.asarray(p, jnp.float32) for p in params)


# ============================================================================
# Fused Pallas kernel (whole forward pass, one block of the batch per step)
# ============================================================================

def _make_ae_kernel(H, W):
    M = H * W
    # jnp.roll convention: out[m] = in[m - shift].  We want out[m] =
    # in[m + (dy-1)*W + (dx-1)] (wrapped pixels get masked to zero).
    shifts = [(-((dy - 1) * W + (dx - 1))) % M
              for dy in range(3) for dx in range(3)]

    def kernel(x_ref, mask_ref,
               w1_ref, b1_ref,
               g2_ref, w2_ref, b2_ref,
               g3_ref, w3_ref, b3_ref,
               g4_ref, w4_ref, b4_ref,
               u1_ref, w5_ref, b5_ref,
               u2_ref, w6_ref, b6_ref,
               o_ref):
        f32 = jnp.float32

        def matmul(a, b):
            return jnp.dot(a, b, preferred_element_type=f32)

        def conv3x3_roll(x, w_ref, b_ref, relu):
            # Full-resolution 3x3/s1/p1 conv: 9 taps = lane roll (XLU) +
            # boundary mask, stacked along sublanes, one deep-K MXU matmul
            # against the pre-stacked block-diagonal weight.
            taps = []
            for t in range(9):
                r = x if shifts[t] == 0 else pltpu.roll(x, shifts[t], 1)
                taps.append(r * mask_ref[t])               # (R, M) * (1, M)
            y = jnp.concatenate(taps, axis=0)              # (9R, M)
            out = matmul(w_ref[...], y) + b_ref[...]
            return jnp.maximum(out, 0.0) if relu else out

        def conv_gather(x, g_ref, w_ref, b_ref):
            # Small layers (stride-2 and 8x8 3x3): per-tap spatial gather
            # matmul on the lane axis, taps stacked along sublanes, one
            # weight matmul, ReLU.
            ntaps = g_ref.shape[0]
            taps = [matmul(x, g_ref[t]) for t in range(ntaps)]
            y = jnp.concatenate(taps, axis=0)
            return jnp.maximum(matmul(w_ref[...], y) + b_ref[...], 0.0)

        x0 = x_ref[...]                                    # (NB, M)
        # ------------------------- encoder -------------------------
        a1 = conv3x3_roll(x0, w1_ref, b1_ref, relu=True)   # (NB*16, M)
        a2 = conv_gather(a1, g2_ref, w2_ref, b2_ref)       # (NB*16, M/4)
        a3 = conv_gather(a2, g3_ref, w3_ref, b3_ref)       # (NB*16, M/4)
        a4 = conv_gather(a3, g4_ref, w4_ref, b4_ref)       # (NB*16, M/16)
        # ------------------------- decoder -------------------------
        u5 = jnp.maximum(matmul(a4, u1_ref[...]), 0.0)     # bilinear x2 + ReLU
        a5 = conv_gather(u5, g3_ref, w5_ref, b5_ref)       # (NB*16, M/4)
        u6 = jnp.maximum(matmul(a5, u2_ref[...]), 0.0)     # bilinear x2 + ReLU
        z = conv3x3_roll(u6, w6_ref, b6_ref, relu=False)   # (NB, M)
        o_ref[...] = 1.0 / (1.0 + jnp.exp(-z))             # sigmoid (exp -> EUP)

    return kernel


@functools.partial(jax.jit, static_argnames=("block_batch",))
def ae_forward(x_nchw, params, *, block_batch):
    """sigmoid(decoder(encoder(x))) for x of shape (N, 1, H, W)."""
    N, C, H, W = x_nchw.shape
    assert C == 1 and H % 4 == 0 and W % 4 == 0
    assert N % block_batch == 0
    M = H * W
    NB = block_batch

    # Transposed, lane-dense layout: batch on sublanes, flat spatial on lanes.
    x2d = x_nchw.reshape(N, M).astype(jnp.float32)

    def _full(a):
        nd = a.ndim
        return pl.BlockSpec(a.shape, lambda n, _nd=nd: (0,) * _nd)

    out = pl.pallas_call(
        _make_ae_kernel(H, W),
        out_shape=jax.ShapeDtypeStruct((N, M), jnp.float32),
        grid=(N // NB,),
        in_specs=[pl.BlockSpec((NB, M), lambda n: (n, 0))]
                 + [_full(p) for p in params],
        out_specs=pl.BlockSpec((NB, M), lambda n: (n, 0)),
        compiler_params=pltpu.CompilerParams(
            dimension_semantics=("parallel",)),
    )(x2d, *params)

    return out.reshape(N, 1, H, W)


# ============================================================================
# Pure-JAX/XLA reference (exact PyTorch layer ordering) for validation
# ============================================================================

def ae_reference(x_nchw, raw):
    hi = jax.lax.Precision.HIGHEST

    def conv(x, w, b, stride, pad):
        y = jax.lax.conv_general_dilated(
            x, jnp.asarray(w), (stride, stride), [(pad, pad), (pad, pad)],
            dimension_numbers=("NCHW", "OIHW", "NCHW"), precision=hi)
        return y + jnp.asarray(b).reshape(1, -1, 1, 1)

    def up2(x):  # bilinear x2, align_corners=False (nn.Upsample default)
        n, c, h, w = x.shape
        u = jnp.asarray(_upsample2d_mat(h, w), jnp.float32)      # (4hw, hw)
        y = jnp.einsum("ncj,oj->nco", x.reshape(n, c, h * w), u, precision=hi)
        return y.reshape(n, c, 2 * h, 2 * w)

    relu = jax.nn.relu
    (w1, b1), (w2, b2), (w3, b3), (w4, b4), (w5, b5), (w6, b6) = raw
    a = relu(conv(x_nchw, w1, b1, 1, 1))
    a = relu(conv(a, w2, b2, 2, 0))
    a = relu(conv(a, w3, b3, 1, 1))
    a = relu(conv(a, w4, b4, 2, 0))
    a = relu(up2(a))
    a = relu(conv(a, w5, b5, 1, 1))
    a = relu(up2(a))
    a = conv(a, w6, b6, 1, 1)
    return jax.nn.sigmoid(a)


# ============================================================================
# Demo / self-check
# ============================================================================

if __name__ == "__main__":
    key = jax.random.PRNGKey(0)
    kx, kp = jax.random.split(key)
    N, H, W = 2, 16, 16

    x = jax.random.uniform(kx, (N, 1, H, W), dtype=jnp.float32)
    raw = init_raw_weights(kp)
    params = pack_params(raw, H, W, nb=N)

    y = ae_forward(x, params, block_batch=N)
    jax.block_until_ready(y)

    assert y.shape == (N, 1, H, W) and y.dtype == jnp.float32
    assert bool(jnp.all(jnp.isfinite(y)))
    assert bool(jnp.all((y >= 0.0) & (y <= 1.0)))          # sigmoid range

    # Validate against the pure-JAX/XLA reference of the PyTorch module.
    y_ref = ae_reference(x, raw)
    max_err = float(jnp.max(jnp.abs(y - y_ref)))
    assert max_err < 1e-2, f"kernel/reference mismatch: max abs err {max_err}"

    print("KERNEL_OK")
</pallas_src>

<mosaic_0001>
module attributes {stable_mosaic.version = 11 : i64} {
  func.func @kernel(%arg0: i32, %arg1: memref<2x256xf32, #tpu.memory_space<vmem>>, %arg2: memref<9x1x256xf32, #tpu.memory_space<vmem>>, %arg3: memref<32x18xf32, #tpu.memory_space<vmem>>, %arg4: memref<32x1xf32, #tpu.memory_space<vmem>>, %arg5: memref<4x256x64xf32, #tpu.memory_space<vmem>>, %arg6: memref<32x128xf32, #tpu.memory_space<vmem>>, %arg7: memref<32x1xf32, #tpu.memory_space<vmem>>, %arg8: memref<9x64x64xf32, #tpu.memory_space<vmem>>, %arg9: memref<32x288xf32, #tpu.memory_space<vmem>>, %arg10: memref<32x1xf32, #tpu.memory_space<vmem>>, %arg11: memref<4x64x16xf32, #tpu.memory_space<vmem>>, %arg12: memref<32x128xf32, #tpu.memory_space<vmem>>, %arg13: memref<32x1xf32, #tpu.memory_space<vmem>>, %arg14: memref<16x64xf32, #tpu.memory_space<vmem>>, %arg15: memref<32x288xf32, #tpu.memory_space<vmem>>, %arg16: memref<32x1xf32, #tpu.memory_space<vmem>>, %arg17: memref<64x256xf32, #tpu.memory_space<vmem>>, %arg18: memref<2x288xf32, #tpu.memory_space<vmem>>, %arg19: memref<2x1xf32, #tpu.memory_space<vmem>>, %arg20: memref<2x256xf32, #tpu.memory_space<vmem>>) attributes {dimension_semantics = [#tpu.dimension_semantics<parallel>], iteration_bounds = array<i64: 1>, scalar_prefetch = 0 : i64, scratch_operands = 0 : i64, tpu.core_type = #tpu.core_type<tc>, window_params = [{transform_indices = @transform_0, window_bounds = array<i64: 2, 256>}, {pipeline_mode = #tpu.pipeline_mode<synchronous>, transform_indices = @transform_1, window_bounds = array<i64: 9, 1, 256>}, {pipeline_mode = #tpu.pipeline_mode<synchronous>, transform_indices = @transform_2, window_bounds = array<i64: 32, 18>}, {pipeline_mode = #tpu.pipeline_mode<synchronous>, transform_indices = @transform_3, window_bounds = array<i64: 32, 1>}, {pipeline_mode = #tpu.pipeline_mode<synchronous>, transform_indices = @transform_4, window_bounds = array<i64: 4, 256, 64>}, {pipeline_mode = #tpu.pipeline_mode<synchronous>, transform_indices = @transform_5, window_bounds = array<i64: 32, 128>}, {pipeline_mode = #tpu.pipeline_mode<synchronous>, transform_indices = @transform_6, window_bounds = array<i64: 32, 1>}, {pipeline_mode = #tpu.pipeline_mode<synchronous>, transform_indices = @transform_7, window_bounds = array<i64: 9, 64, 64>}, {pipeline_mode = #tpu.pipeline_mode<synchronous>, transform_indices = @transform_8, window_bounds = array<i64: 32, 288>}, {pipeline_mode = #tpu.pipeline_mode<synchronous>, transform_indices = @transform_9, window_bounds = array<i64: 32, 1>}, {pipeline_mode = #tpu.pipeline_mode<synchronous>, transform_indices = @transform_10, window_bounds = array<i64: 4, 64, 16>}, {pipeline_mode = #tpu.pipeline_mode<synchronous>, transform_indices = @transform_11, window_bounds = array<i64: 32, 128>}, {pipeline_mode = #tpu.pipeline_mode<synchronous>, transform_indices = @transform_12, window_bounds = array<i64: 32, 1>}, {pipeline_mode = #tpu.pipeline_mode<synchronous>, transform_indices = @transform_13, window_bounds = array<i64: 16, 64>}, {pipeline_mode = #tpu.pipeline_mode<synchronous>, transform_indices = @transform_14, window_bounds = array<i64: 32, 288>}, {pipeline_mode = #tpu.pipeline_mode<synchronous>, transform_indices = @transform_15, window_bounds = array<i64: 32, 1>}, {pipeline_mode = #tpu.pipeline_mode<synchronous>, transform_indices = @transform_16, window_bounds = array<i64: 64, 256>}, {pipeline_mode = #tpu.pipeline_mode<synchronous>, transform_indices = @transform_17, window_bounds = array<i64: 2, 288>}, {pipeline_mode = #tpu.pipeline_mode<synchronous>, transform_indices = @transform_18, window_bounds = array<i64: 2, 1>}, {transform_indices = @transform_19, window_bounds = array<i64: 2, 256>}]} {
    %c0 = arith.constant 0 : index
    %c0_0 = arith.constant 0 : index
    %0 = vector.load %arg1[%c0, %c0_0] : memref<2x256xf32, #tpu.memory_space<vmem>>, vector<2x256xf32>
    %c17_i32 = arith.constant 17 : i32
    %1 = tpu.dynamic_rotate %0 by %c17_i32 dim 1 : vector<2x256xf32>, i32 -> vector<2x256xf32>
    %c0_1 = arith.constant 0 : index
    %c0_2 = arith.constant 0 : index
    %c0_3 = arith.constant 0 : index
    %2 = vector.load %arg2[%c0_1, %c0_2, %c0_3] : memref<9x1x256xf32, #tpu.memory_space<vmem>>, vector<1x1x256xf32>
    %3 = vector.shape_cast %2 : vector<1x1x256xf32> to vector<1x256xf32>
    %4 = vector.broadcast %3 : vector<1x256xf32> to vector<2x256xf32>
    %5 = arith.mulf %1, %4 : vector<2x256xf32>
    %c16_i32 = arith.constant 16 : i32
    %6 = tpu.dynamic_rotate %0 by %c16_i32 dim 1 : vector<2x256xf32>, i32 -> vector<2x256xf32>
    %c1 = arith.constant 1 : index
    %c0_4 = arith.constant 0 : index
    %c0_5 = arith.constant 0 : index
    %7 = vector.load %arg2[%c1, %c0_4, %c0_5] : memref<9x1x256xf32, #tpu.memory_space<vmem>>, vector<1x1x256xf32>
    %8 = vector.shape_cast %7 : vector<1x1x256xf32> to vector<1x256xf32>
    %9 = vector.broadcast %8 : vector<1x256xf32> to vector<2x256xf32>
    %10 = arith.mulf %6, %9 : vector<2x256xf32>
    %c15_i32 = arith.constant 15 : i32
    %11 = tpu.dynamic_rotate %0 by %c15_i32 dim 1 : vector<2x256xf32>, i32 -> vector<2x256xf32>
    %c2 = arith.constant 2 : index
    %c0_6 = arith.constant 0 : index
    %c0_7 = arith.constant 0 : index
    %12 = vector.load %arg2[%c2, %c0_6, %c0_7] : memref<9x1x256xf32, #tpu.memory_space<vmem>>, vector<1x1x256xf32>
    %13 = vector.shape_cast %12 : vector<1x1x256xf32> to vector<1x256xf32>
    %14 = vector.broadcast %13 : vector<1x256xf32> to vector<2x256xf32>
    %15 = arith.mulf %11, %14 : vector<2x256xf32>
    %c1_i32 = arith.constant 1 : i32
    %16 = tpu.dynamic_rotate %0 by %c1_i32 dim 1 : vector<2x256xf32>, i32 -> vector<2x256xf32>
    %c3 = arith.constant 3 : index
    %c0_8 = arith.constant 0 : index
    %c0_9 = arith.constant 0 : index
    %17 = vector.load %arg2[%c3, %c0_8, %c0_9] : memref<9x1x256xf32, #tpu.memory_space<vmem>>, vector<1x1x256xf32>
    %18 = vector.shape_cast %17 : vector<1x1x256xf32> to vector<1x256xf32>
    %19 = vector.broadcast %18 : vector<1x256xf32> to vector<2x256xf32>
    %20 = arith.mulf %16, %19 : vector<2x256xf32>
    %c4 = arith.constant 4 : index
    %c0_10 = arith.constant 0 : index
    %c0_11 = arith.constant 0 : index
    %21 = vector.load %arg2[%c4, %c0_10, %c0_11] : memref<9x1x256xf32, #tpu.memory_space<vmem>>, vector<1x1x256xf32>
    %22 = vector.shape_cast %21 : vector<1x1x256xf32> to vector<1x256xf32>
    %23 = vector.broadcast %22 : vector<1x256xf32> to vector<2x256xf32>
    %24 = arith.mulf %0, %23 : vector<2x256xf32>
    %c255_i32 = arith.constant 255 : i32
    %25 = tpu.dynamic_rotate %0 by %c255_i32 dim 1 : vector<2x256xf32>, i32 -> vector<2x256xf32>
    %c5 = arith.constant 5 : index
    %c0_12 = arith.constant 0 : index
    %c0_13 = arith.constant 0 : index
    %26 = vector.load %arg2[%c5, %c0_12, %c0_13] : memref<9x1x256xf32, #tpu.memory_space<vmem>>, vector<1x1x256xf32>
    %27 = vector.shape_cast %26 : vector<1x1x256xf32> to vector<1x256xf32>
    %28 = vector.broadcast %27 : vector<1x256xf32> to vector<2x256xf32>
    %29 = arith.mulf %25, %28 : vector<2x256xf32>
    %c241_i32 = arith.constant 241 : i32
    %30 = tpu.dynamic_rotate %0 by %c241_i32 dim 1 : vector<2x256xf32>, i32 -> vector<2x256xf32>
    %c6 = arith.constant 6 : index
    %c0_14 = arith.constant 0 : index
    %c0_15 = arith.constant 0 : index
    %31 = vector.load %arg2[%c6, %c0_14, %c0_15] : memref<9x1x256xf32, #tpu.memory_space<vmem>>, vector<1x1x256xf32>
    %32 = vector.shape_cast %31 : vector<1x1x256xf32> to vector<1x256xf32>
    %33 = vector.broadcast %32 : vector<1x256xf32> to vector<2x256xf32>
    %34 = arith.mulf %30, %33 : vector<2x256xf32>
    %c240_i32 = arith.constant 240 : i32
    %35 = tpu.dynamic_rotate %0 by %c240_i32 dim 1 : vector<2x256xf32>, i32 -> vector<2x256xf32>
    %c7 = arith.constant 7 : index
    %c0_16 = arith.constant 0 : index
    %c0_17 = arith.constant 0 : index
    %36 = vector.load %arg2[%c7, %c0_16, %c0_17] : memref<9x1x256xf32, #tpu.memory_space<vmem>>, vector<1x1x256xf32>
    %37 = vector.shape_cast %36 : vector<1x1x256xf32> to vector<1x256xf32>
    %38 = vector.broadcast %37 : vector<1x256xf32> to vector<2x256xf32>
    %39 = arith.mulf %35, %38 : vector<2x256xf32>
    %c239_i32 = arith.constant 239 : i32
    %40 = tpu.dynamic_rotate %0 by %c239_i32 dim 1 : vector<2x256xf32>, i32 -> vector<2x256xf32>
    %c8 = arith.constant 8 : index
    %c0_18 = arith.constant 0 : index
    %c0_19 = arith.constant 0 : index
    %41 = vector.load %arg2[%c8, %c0_18, %c0_19] : memref<9x1x256xf32, #tpu.memory_space<vmem>>, vector<1x1x256xf32>
    %42 = vector.shape_cast %41 : vector<1x1x256xf32> to vector<1x256xf32>
    %43 = vector.broadcast %42 : vector<1x256xf32> to vector<2x256xf32>
    %44 = arith.mulf %40, %43 : vector<2x256xf32>
    %45 = tpu.concatenate %5, %10, %15, %20, %24, %29, %34, %39, %44 in 0 : vector<2x256xf32>, vector<2x256xf32>, vector<2x256xf32>, vector<2x256xf32>, vector<2x256xf32>, vector<2x256xf32>, vector<2x256xf32>, vector<2x256xf32>, vector<2x256xf32> -> vector<18x256xf32>
    %c0_20 = arith.constant 0 : index
    %c0_21 = arith.constant 0 : index
    %46 = vector.load %arg3[%c0_20, %c0_21] : memref<32x18xf32, #tpu.memory_space<vmem>>, vector<32x18xf32>
    %cst = arith.constant dense<0.000000e+00> : vector<32x256xf32>
    %47 = tpu.matmul %46, %45, %cst {dimension_numbers = #tpu.dot_dimension_numbers<[1], [0], [0], [1], [0, 0, 1, 1], [], []>} : vector<32x18xf32>, vector<18x256xf32>, vector<32x256xf32> -> vector<32x256xf32>
    %c0_22 = arith.constant 0 : index
    %c0_23 = arith.constant 0 : index
    %48 = vector.load %arg4[%c0_22, %c0_23] : memref<32x1xf32, #tpu.memory_space<vmem>>, vector<32x1xf32>
    %49 = vector.broadcast %48 : vector<32x1xf32> to vector<32x256xf32>
    %50 = arith.addf %47, %49 : vector<32x256xf32>
    %cst_24 = arith.constant 0.000000e+00 : f32
    %51 = vector.broadcast %cst_24 : f32 to vector<32x256xf32>
    %52 = arith.maximumf %50, %51 : vector<32x256xf32>
    %c0_25 = arith.constant 0 : index
    %c0_26 = arith.constant 0 : index
    %c0_27 = arith.constant 0 : index
    %53 = vector.load %arg5[%c0_25, %c0_26, %c0_27] : memref<4x256x64xf32, #tpu.memory_space<vmem>>, vector<1x256x64xf32>
    %54 = vector.shape_cast %53 : vector<1x256x64xf32> to vector<256x64xf32>
    %cst_28 = arith.constant dense<0.000000e+00> : vector<32x64xf32>
    %55 = tpu.matmul %52, %54, %cst_28 {dimension_numbers = #tpu.dot_dimension_numbers<[1], [0], [0], [1], [0, 0, 1, 1], [], []>} : vector<32x256xf32>, vector<256x64xf32>, vector<32x64xf32> -> vector<32x64xf32>
    %c1_29 = arith.constant 1 : index
    %c0_30 = arith.constant 0 : index
    %c0_31 = arith.constant 0 : index
    %56 = vector.load %arg5[%c1_29, %c0_30, %c0_31] : memref<4x256x64xf32, #tpu.memory_space<vmem>>, vector<1x256x64xf32>
    %57 = vector.shape_cast %56 : vector<1x256x64xf32> to vector<256x64xf32>
    %cst_32 = arith.constant dense<0.000000e+00> : vector<32x64xf32>
    %58 = tpu.matmul %52, %57, %cst_32 {dimension_numbers = #tpu.dot_dimension_numbers<[1], [0], [0], [1], [0, 0, 1, 1], [], []>} : vector<32x256xf32>, vector<256x64xf32>, vector<32x64xf32> -> vector<32x64xf32>
    %c2_33 = arith.constant 2 : index
    %c0_34 = arith.constant 0 : index
    %c0_35 = arith.constant 0 : index
    %59 = vector.load %arg5[%c2_33, %c0_34, %c0_35] : memref<4x256x64xf32, #tpu.memory_space<vmem>>, vector<1x256x64xf32>
    %60 = vector.shape_cast %59 : vector<1x256x64xf32> to vector<256x64xf32>
    %cst_36 = arith.constant dense<0.000000e+00> : vector<32x64xf32>
    %61 = tpu.matmul %52, %60, %cst_36 {dimension_numbers = #tpu.dot_dimension_numbers<[1], [0], [0], [1], [0, 0, 1, 1], [], []>} : vector<32x256xf32>, vector<256x64xf32>, vector<32x64xf32> -> vector<32x64xf32>
    %c3_37 = arith.constant 3 : index
    %c0_38 = arith.constant 0 : index
    %c0_39 = arith.constant 0 : index
    %62 = vector.load %arg5[%c3_37, %c0_38, %c0_39] : memref<4x256x64xf32, #tpu.memory_space<vmem>>, vector<1x256x64xf32>
    %63 = vector.shape_cast %62 : vector<1x256x64xf32> to vector<256x64xf32>
    %cst_40 = arith.constant dense<0.000000e+00> : vector<32x64xf32>
    %64 = tpu.matmul %52, %63, %cst_40 {dimension_numbers = #tpu.dot_dimension_numbers<[1], [0], [0], [1], [0, 0, 1, 1], [], []>} : vector<32x256xf32>, vector<256x64xf32>, vector<32x64xf32> -> vector<32x64xf32>
    %65 = tpu.concatenate %55, %58, %61, %64 in 0 : vector<32x64xf32>, vector<32x64xf32>, vector<32x64xf32>, vector<32x64xf32> -> vector<128x64xf32>
    %c0_41 = arith.constant 0 : index
    %c0_42 = arith.constant 0 : index
    %66 = vector.load %arg6[%c0_41, %c0_42] : memref<32x128xf32, #tpu.memory_space<vmem>>, vector<32x128xf32>
    %cst_43 = arith.constant dense<0.000000e+00> : vector<32x64xf32>
    %67 = tpu.matmul %66, %65, %cst_43 {dimension_numbers = #tpu.dot_dimension_numbers<[1], [0], [0], [1], [0, 0, 1, 1], [], []>} : vector<32x128xf32>, vector<128x64xf32>, vector<32x64xf32> -> vector<32x64xf32>
    %c0_44 = arith.constant 0 : index
    %c0_45 = arith.constant 0 : index
    %68 = vector.load %arg7[%c0_44, %c0_45] : memref<32x1xf32, #tpu.memory_space<vmem>>, vector<32x1xf32>
    %69 = vector.broadcast %68 : vector<32x1xf32> to vector<32x64xf32>
    %70 = arith.addf %67, %69 : vector<32x64xf32>
    %cst_46 = arith.constant 0.000000e+00 : f32
    %71 = vector.broadcast %cst_46 : f32 to vector<32x64xf32>
    %72 = arith.maximumf %70, %71 : vector<32x64xf32>
    %c0_47 = arith.constant 0 : index
    %c0_48 = arith.constant 0 : index
    %c0_49 = arith.constant 0 : index
    %73 = vector.load %arg8[%c0_47, %c0_48, %c0_49] : memref<9x64x64xf32, #tpu.memory_space<vmem>>, vector<1x64x64xf32>
    %74 = vector.shape_cast %73 : vector<1x64x64xf32> to vector<64x64xf32>
    %cst_50 = arith.constant dense<0.000000e+00> : vector<32x64xf32>
    %75 = tpu.matmul %72, %74, %cst_50 {dimension_numbers = #tpu.dot_dimension_numbers<[1], [0], [0], [1], [0, 0, 1, 1], [], []>} : vector<32x64xf32>, vector<64x64xf32>, vector<32x64xf32> -> vector<32x64xf32>
    %c1_51 = arith.constant 1 : index
    %c0_52 = arith.constant 0 : index
    %c0_53 = arith.constant 0 : index
    %76 = vector.load %arg8[%c1_51, %c0_52, %c0_53] : memref<9x64x64xf32, #tpu.memory_space<vmem>>, vector<1x64x64xf32>
    %77 = vector.shape_cast %76 : vector<1x64x64xf32> to vector<64x64xf32>
    %cst_54 = arith.constant dense<0.000000e+00> : vector<32x64xf32>
    %78 = tpu.matmul %72, %77, %cst_54 {dimension_numbers = #tpu.dot_dimension_numbers<[1], [0], [0], [1], [0, 0, 1, 1], [], []>} : vector<32x64xf32>, vector<64x64xf32>, vector<32x64xf32> -> vector<32x64xf32>
    %c2_55 = arith.constant 2 : index
    %c0_56 = arith.constant 0 : index
    %c0_57 = arith.constant 0 : index
    %79 = vector.load %arg8[%c2_55, %c0_56, %c0_57] : memref<9x64x64xf32, #tpu.memory_space<vmem>>, vector<1x64x64xf32>
    %80 = vector.shape_cast %79 : vector<1x64x64xf32> to vector<64x64xf32>
    %cst_58 = arith.constant dense<0.000000e+00> : vector<32x64xf32>
    %81 = tpu.matmul %72, %80, %cst_58 {dimension_numbers = #tpu.dot_dimension_numbers<[1], [0], [0], [1], [0, 0, 1, 1], [], []>} : vector<32x64xf32>, vector<64x64xf32>, vector<32x64xf32> -> vector<32x64xf32>
    %c3_59 = arith.constant 3 : index
    %c0_60 = arith.constant 0 : index
    %c0_61 = arith.constant 0 : index
    %82 = vector.load %arg8[%c3_59, %c0_60, %c0_61] : memref<9x64x64xf32, #tpu.memory_space<vmem>>, vector<1x64x64xf32>
    %83 = vector.shape_cast %82 : vector<1x64x64xf32> to vector<64x64xf32>
    %cst_62 = arith.constant dense<0.000000e+00> : vector<32x64xf32>
    %84 = tpu.matmul %72, %83, %cst_62 {dimension_numbers = #tpu.dot_dimension_numbers<[1], [0], [0], [1], [0, 0, 1, 1], [], []>} : vector<32x64xf32>, vector<64x64xf32>, vector<32x64xf32> -> vector<32x64xf32>
    %c4_63 = arith.constant 4 : index
    %c0_64 = arith.constant 0 : index
    %c0_65 = arith.constant 0 : index
    %85 = vector.load %arg8[%c4_63, %c0_64, %c0_65] : memref<9x64x64xf32, #tpu.memory_space<vmem>>, vector<1x64x64xf32>
    %86 = vector.shape_cast %85 : vector<1x64x64xf32> to vector<64x64xf32>
    %cst_66 = arith.constant dense<0.000000e+00> : vector<32x64xf32>
    %87 = tpu.matmul %72, %86, %cst_66 {dimension_numbers = #tpu.dot_dimension_numbers<[1], [0], [0], [1], [0, 0, 1, 1], [], []>} : vector<32x64xf32>, vector<64x64xf32>, vector<32x64xf32> -> vector<32x64xf32>
    %c5_67 = arith.constant 5 : index
    %c0_68 = arith.constant 0 : index
    %c0_69 = arith.constant 0 : index
    %88 = vector.load %arg8[%c5_67, %c0_68, %c0_69] : memref<9x64x64xf32, #tpu.memory_space<vmem>>, vector<1x64x64xf32>
    %89 = vector.shape_cast %88 : vector<1x64x64xf32> to vector<64x64xf32>
    %cst_70 = arith.constant dense<0.000000e+00> : vector<32x64xf32>
    %90 = tpu.matmul %72, %89, %cst_70 {dimension_numbers = #tpu.dot_dimension_numbers<[1], [0], [0], [1], [0, 0, 1, 1], [], []>} : vector<32x64xf32>, vector<64x64xf32>, vector<32x64xf32> -> vector<32x64xf32>
    %c6_71 = arith.constant 6 : index
    %c0_72 = arith.constant 0 : index
    %c0_73 = arith.constant 0 : index
    %91 = vector.load %arg8[%c6_71, %c0_72, %c0_73] : memref<9x64x64xf32, #tpu.memory_space<vmem>>, vector<1x64x64xf32>
    %92 = vector.shape_cast %91 : vector<1x64x64xf32> to vector<64x64xf32>
    %cst_74 = arith.constant dense<0.000000e+00> : vector<32x64xf32>
    %93 = tpu.matmul %72, %92, %cst_74 {dimension_numbers = #tpu.dot_dimension_numbers<[1], [0], [0], [1], [0, 0, 1, 1], [], []>} : vector<32x64xf32>, vector<64x64xf32>, vector<32x64xf32> -> vector<32x64xf32>
    %c7_75 = arith.constant 7 : index
    %c0_76 = arith.constant 0 : index
    %c0_77 = arith.constant 0 : index
    %94 = vector.load %arg8[%c7_75, %c0_76, %c0_77] : memref<9x64x64xf32, #tpu.memory_space<vmem>>, vector<1x64x64xf32>
    %95 = vector.shape_cast %94 : vector<1x64x64xf32> to vector<64x64xf32>
    %cst_78 = arith.constant dense<0.000000e+00> : vector<32x64xf32>
    %96 = tpu.matmul %72, %95, %cst_78 {dimension_numbers = #tpu.dot_dimension_numbers<[1], [0], [0], [1], [0, 0, 1, 1], [], []>} : vector<32x64xf32>, vector<64x64xf32>, vector<32x64xf32> -> vector<32x64xf32>
    %c8_79 = arith.constant 8 : index
    %c0_80 = arith.constant 0 : index
    %c0_81 = arith.constant 0 : index
    %97 = vector.load %arg8[%c8_79, %c0_80, %c0_81] : memref<9x64x64xf32, #tpu.memory_space<vmem>>, vector<1x64x64xf32>
    %98 = vector.shape_cast %97 : vector<1x64x64xf32> to vector<64x64xf32>
    %cst_82 = arith.constant dense<0.000000e+00> : vector<32x64xf32>
    %99 = tpu.matmul %72, %98, %cst_82 {dimension_numbers = #tpu.dot_dimension_numbers<[1], [0], [0], [1], [0, 0, 1, 1], [], []>} : vector<32x64xf32>, vector<64x64xf32>, vector<32x64xf32> -> vector<32x64xf32>
    %100 = tpu.concatenate %75, %78, %81, %84, %87, %90, %93, %96, %99 in 0 : vector<32x64xf32>, vector<32x64xf32>, vector<32x64xf32>, vector<32x64xf32>, vector<32x64xf32>, vector<32x64xf32>, vector<32x64xf32>, vector<32x64xf32>, vector<32x64xf32> -> vector<288x64xf32>
    %c0_83 = arith.constant 0 : index
    %c0_84 = arith.constant 0 : index
    %101 = vector.load %arg9[%c0_83, %c0_84] : memref<32x288xf32, #tpu.memory_space<vmem>>, vector<32x288xf32>
    %cst_85 = arith.constant dense<0.000000e+00> : vector<32x64xf32>
    %102 = tpu.matmul %101, %100, %cst_85 {dimension_numbers = #tpu.dot_dimension_numbers<[1], [0], [0], [1], [0, 0, 1, 1], [], []>} : vector<32x288xf32>, vector<288x64xf32>, vector<32x64xf32> -> vector<32x64xf32>
    %c0_86 = arith.constant 0 : index
    %c0_87 = arith.constant 0 : index
    %103 = vector.load %arg10[%c0_86, %c0_87] : memref<32x1xf32, #tpu.memory_space<vmem>>, vector<32x1xf32>
    %104 = vector.broadcast %103 : vector<32x1xf32> to vector<32x64xf32>
    %105 = arith.addf %102, %104 : vector<32x64xf32>
    %cst_88 = arith.constant 0.000000e+00 : f32
    %106 = vector.broadcast %cst_88 : f32 to vector<32x64xf32>
    %107 = arith.maximumf %105, %106 : vector<32x64xf32>
    %c0_89 = arith.constant 0 : index
    %c0_90 = arith.constant 0 : index
    %c0_91 = arith.constant 0 : index
    %108 = vector.load %arg11[%c0_89, %c0_90, %c0_91] : memref<4x64x16xf32, #tpu.memory_space<vmem>>, vector<1x64x16xf32>
    %109 = vector.shape_cast %108 : vector<1x64x16xf32> to vector<64x16xf32>
    %cst_92 = arith.constant dense<0.000000e+00> : vector<32x16xf32>
    %110 = tpu.matmul %107, %109, %cst_92 {dimension_numbers = #tpu.dot_dimension_numbers<[1], [0], [0], [1], [0, 0, 1, 1], [], []>} : vector<32x64xf32>, vector<64x16xf32>, vector<32x16xf32> -> vector<32x16xf32>
    %c1_93 = arith.constant 1 : index
    %c0_94 = arith.constant 0 : index
    %c0_95 = arith.constant 0 : index
    %111 = vector.load %arg11[%c1_93, %c0_94, %c0_95] : memref<4x64x16xf32, #tpu.memory_space<vmem>>, vector<1x64x16xf32>
    %112 = vector.shape_cast %111 : vector<1x64x16xf32> to vector<64x16xf32>
    %cst_96 = arith.constant dense<0.000000e+00> : vector<32x16xf32>
    %113 = tpu.matmul %107, %112, %cst_96 {dimension_numbers = #tpu.dot_dimension_numbers<[1], [0], [0], [1], [0, 0, 1, 1], [], []>} : vector<32x64xf32>, vector<64x16xf32>, vector<32x16xf32> -> vector<32x16xf32>
    %c2_97 = arith.constant 2 : index
    %c0_98 = arith.constant 0 : index
    %c0_99 = arith.constant 0 : index
    %114 = vector.load %arg11[%c2_97, %c0_98, %c0_99] : memref<4x64x16xf32, #tpu.memory_space<vmem>>, vector<1x64x16xf32>
    %115 = vector.shape_cast %114 : vector<1x64x16xf32> to vector<64x16xf32>
    %cst_100 = arith.constant dense<0.000000e+00> : vector<32x16xf32>
    %116 = tpu.matmul %107, %115, %cst_100 {dimension_numbers = #tpu.dot_dimension_numbers<[1], [0], [0], [1], [0, 0, 1, 1], [], []>} : vector<32x64xf32>, vector<64x16xf32>, vector<32x16xf32> -> vector<32x16xf32>
    %c3_101 = arith.constant 3 : index
    %c0_102 = arith.constant 0 : index
    %c0_103 = arith.constant 0 : index
    %117 = vector.load %arg11[%c3_101, %c0_102, %c0_103] : memref<4x64x16xf32, #tpu.memory_space<vmem>>, vector<1x64x16xf32>
    %118 = vector.shape_cast %117 : vector<1x64x16xf32> to vector<64x16xf32>
    %cst_104 = arith.constant dense<0.000000e+00> : vector<32x16xf32>
    %119 = tpu.matmul %107, %118, %cst_104 {dimension_numbers = #tpu.dot_dimension_numbers<[1], [0], [0], [1], [0, 0, 1, 1], [], []>} : vector<32x64xf32>, vector<64x16xf32>, vector<32x16xf32> -> vector<32x16xf32>
    %120 = tpu.concatenate %110, %113, %116, %119 in 0 : vector<32x16xf32>, vector<32x16xf32>, vector<32x16xf32>, vector<32x16xf32> -> vector<128x16xf32>
    %c0_105 = arith.constant 0 : index
    %c0_106 = arith.constant 0 : index
    %121 = vector.load %arg12[%c0_105, %c0_106] : memref<32x128xf32, #tpu.memory_space<vmem>>, vector<32x128xf32>
    %cst_107 = arith.constant dense<0.000000e+00> : vector<32x16xf32>
    %122 = tpu.matmul %121, %120, %cst_107 {dimension_numbers = #tpu.dot_dimension_numbers<[1], [0], [0], [1], [0, 0, 1, 1], [], []>} : vector<32x128xf32>, vector<128x16xf32>, vector<32x16xf32> -> vector<32x16xf32>
    %c0_108 = arith.constant 0 : index
    %c0_109 = arith.constant 0 : index
    %123 = vector.load %arg13[%c0_108, %c0_109] : memref<32x1xf32, #tpu.memory_space<vmem>>, vector<32x1xf32>
    %124 = vector.broadcast %123 : vector<32x1xf32> to vector<32x16xf32>
    %125 = arith.addf %122, %124 : vector<32x16xf32>
    %cst_110 = arith.constant 0.000000e+00 : f32
    %126 = vector.broadcast %cst_110 : f32 to vector<32x16xf32>
    %127 = arith.maximumf %125, %126 : vector<32x16xf32>
    %c0_111 = arith.constant 0 : index
    %c0_112 = arith.constant 0 : index
    %128 = vector.load %arg14[%c0_111, %c0_112] : memref<16x64xf32, #tpu.memory_space<vmem>>, vector<16x64xf32>
    %cst_113 = arith.constant dense<0.000000e+00> : vector<32x64xf32>
    %129 = tpu.matmul %127, %128, %cst_113 {dimension_numbers = #tpu.dot_dimension_numbers<[1], [0], [0], [1], [0, 0, 1, 1], [], []>} : vector<32x16xf32>, vector<16x64xf32>, vector<32x64xf32> -> vector<32x64xf32>
    %cst_114 = arith.constant 0.000000e+00 : f32
    %130 = vector.broadcast %cst_114 : f32 to vector<32x64xf32>
    %131 = arith.maximumf %129, %130 : vector<32x64xf32>
    %c0_115 = arith.constant 0 : index
    %c0_116 = arith.constant 0 : index
    %c0_117 = arith.constant 0 : index
    %132 = vector.load %arg8[%c0_115, %c0_116, %c0_117] : memref<9x64x64xf32, #tpu.memory_space<vmem>>, vector<1x64x64xf32>
    %133 = vector.shape_cast %132 : vector<1x64x64xf32> to vector<64x64xf32>
    %cst_118 = arith.constant dense<0.000000e+00> : vector<32x64xf32>
    %134 = tpu.matmul %131, %133, %cst_118 {dimension_numbers = #tpu.dot_dimension_numbers<[1], [0], [0], [1], [0, 0, 1, 1], [], []>} : vector<32x64xf32>, vector<64x64xf32>, vector<32x64xf32> -> vector<32x64xf32>
    %c1_119 = arith.constant 1 : index
    %c0_120 = arith.constant 0 : index
    %c0_121 = arith.constant 0 : index
    %135 = vector.load %arg8[%c1_119, %c0_120, %c0_121] : memref<9x64x64xf32, #tpu.memory_space<vmem>>, vector<1x64x64xf32>
    %136 = vector.shape_cast %135 : vector<1x64x64xf32> to vector<64x64xf32>
    %cst_122 = arith.constant dense<0.000000e+00> : vector<32x64xf32>
    %137 = tpu.matmul %131, %136, %cst_122 {dimension_numbers = #tpu.dot_dimension_numbers<[1], [0], [0], [1], [0, 0, 1, 1], [], []>} : vector<32x64xf32>, vector<64x64xf32>, vector<32x64xf32> -> vector<32x64xf32>
    %c2_123 = arith.constant 2 : index
    %c0_124 = arith.constant 0 : index
    %c0_125 = arith.constant 0 : index
    %138 = vector.load %arg8[%c2_123, %c0_124, %c0_125] : memref<9x64x64xf32, #tpu.memory_space<vmem>>, vector<1x64x64xf32>
    %139 = vector.shape_cast %138 : vector<1x64x64xf32> to vector<64x64xf32>
    %cst_126 = arith.constant dense<0.000000e+00> : vector<32x64xf32>
    %140 = tpu.matmul %131, %139, %cst_126 {dimension_numbers = #tpu.dot_dimension_numbers<[1], [0], [0], [1], [0, 0, 1, 1], [], []>} : vector<32x64xf32>, vector<64x64xf32>, vector<32x64xf32> -> vector<32x64xf32>
    %c3_127 = arith.constant 3 : index
    %c0_128 = arith.constant 0 : index
    %c0_129 = arith.constant 0 : index
    %141 = vector.load %arg8[%c3_127, %c0_128, %c0_129] : memref<9x64x64xf32, #tpu.memory_space<vmem>>, vector<1x64x64xf32>
    %142 = vector.shape_cast %141 : vector<1x64x64xf32> to vector<64x64xf32>
    %cst_130 = arith.constant dense<0.000000e+00> : vector<32x64xf32>
    %143 = tpu.matmul %131, %142, %cst_130 {dimension_numbers = #tpu.dot_dimension_numbers<[1], [0], [0], [1], [0, 0, 1, 1], [], []>} : vector<32x64xf32>, vector<64x64xf32>, vector<32x64xf32> -> vector<32x64xf32>
    %c4_131 = arith.constant 4 : index
    %c0_132 = arith.constant 0 : index
    %c0_133 = arith.constant 0 : index
    %144 = vector.load %arg8[%c4_131, %c0_132, %c0_133] : memref<9x64x64xf32, #tpu.memory_space<vmem>>, vector<1x64x64xf32>
    %145 = vector.shape_cast %144 : vector<1x64x64xf32> to vector<64x64xf32>
    %cst_134 = arith.constant dense<0.000000e+00> : vector<32x64xf32>
    %146 = tpu.matmul %131, %145, %cst_134 {dimension_numbers = #tpu.dot_dimension_numbers<[1], [0], [0], [1], [0, 0, 1, 1], [], []>} : vector<32x64xf32>, vector<64x64xf32>, vector<32x64xf32> -> vector<32x64xf32>
    %c5_135 = arith.constant 5 : index
    %c0_136 = arith.constant 0 : index
    %c0_137 = arith.constant 0 : index
    %147 = vector.load %arg8[%c5_135, %c0_136, %c0_137] : memref<9x64x64xf32, #tpu.memory_space<vmem>>, vector<1x64x64xf32>
    %148 = vector.shape_cast %147 : vector<1x64x64xf32> to vector<64x64xf32>
    %cst_138 = arith.constant dense<0.000000e+00> : vector<32x64xf32>
    %149 = tpu.matmul %131, %148, %cst_138 {dimension_numbers = #tpu.dot_dimension_numbers<[1], [0], [0], [1], [0, 0, 1, 1], [], []>} : vector<32x64xf32>, vector<64x64xf32>, vector<32x64xf32> -> vector<32x64xf32>
    %c6_139 = arith.constant 6 : index
    %c0_140 = arith.constant 0 : index
    %c0_141 = arith.constant 0 : index
    %150 = vector.load %arg8[%c6_139, %c0_140, %c0_141] : memref<9x64x64xf32, #tpu.memory_space<vmem>>, vector<1x64x64xf32>
    %151 = vector.shape_cast %150 : vector<1x64x64xf32> to vector<64x64xf32>
    %cst_142 = arith.constant dense<0.000000e+00> : vector<32x64xf32>
    %152 = tpu.matmul %131, %151, %cst_142 {dimension_numbers = #tpu.dot_dimension_numbers<[1], [0], [0], [1], [0, 0, 1, 1], [], []>} : vector<32x64xf32>, vector<64x64xf32>, vector<32x64xf32> -> vector<32x64xf32>
    %c7_143 = arith.constant 7 : index
    %c0_144 = arith.constant 0 : index
    %c0_145 = arith.constant 0 : index
    %153 = vector.load %arg8[%c7_143, %c0_144, %c0_145] : memref<9x64x64xf32, #tpu.memory_space<vmem>>, vector<1x64x64xf32>
    %154 = vector.shape_cast %153 : vector<1x64x64xf32> to vector<64x64xf32>
    %cst_146 = arith.constant dense<0.000000e+00> : vector<32x64xf32>
    %155 = tpu.matmul %131, %154, %cst_146 {dimension_numbers = #tpu.dot_dimension_numbers<[1], [0], [0], [1], [0, 0, 1, 1], [], []>} : vector<32x64xf32>, vector<64x64xf32>, vector<32x64xf32> -> vector<32x64xf32>
    %c8_147 = arith.constant 8 : index
    %c0_148 = arith.constant 0 : index
    %c0_149 = arith.constant 0 : index
    %156 = vector.load %arg8[%c8_147, %c0_148, %c0_149] : memref<9x64x64xf32, #tpu.memory_space<vmem>>, vector<1x64x64xf32>
    %157 = vector.shape_cast %156 : vector<1x64x64xf32> to vector<64x64xf32>
    %cst_150 = arith.constant dense<0.000000e+00> : vector<32x64xf32>
    %158 = tpu.matmul %131, %157, %cst_150 {dimension_numbers = #tpu.dot_dimension_numbers<[1], [0], [0], [1], [0, 0, 1, 1], [], []>} : vector<32x64xf32>, vector<64x64xf32>, vector<32x64xf32> -> vector<32x64xf32>
    %159 = tpu.concatenate %134, %137, %140, %143, %146, %149, %152, %155, %158 in 0 : vector<32x64xf32>, vector<32x64xf32>, vector<32x64xf32>, vector<32x64xf32>, vector<32x64xf32>, vector<32x64xf32>, vector<32x64xf32>, vector<32x64xf32>, vector<32x64xf32> -> vector<288x64xf32>
    %c0_151 = arith.constant 0 : index
    %c0_152 = arith.constant 0 : index
    %160 = vector.load %arg15[%c0_151, %c0_152] : memref<32x288xf32, #tpu.memory_space<vmem>>, vector<32x288xf32>
    %cst_153 = arith.constant dense<0.000000e+00> : vector<32x64xf32>
    %161 = tpu.matmul %160, %159, %cst_153 {dimension_numbers = #tpu.dot_dimension_numbers<[1], [0], [0], [1], [0, 0, 1, 1], [], []>} : vector<32x288xf32>, vector<288x64xf32>, vector<32x64xf32> -> vector<32x64xf32>
    %c0_154 = arith.constant 0 : index
    %c0_155 = arith.constant 0 : index
    %162 = vector.load %arg16[%c0_154, %c0_155] : memref<32x1xf32, #tpu.memory_space<vmem>>, vector<32x1xf32>
    %163 = vector.broadcast %162 : vector<32x1xf32> to vector<32x64xf32>
    %164 = arith.addf %161, %163 : vector<32x64xf32>
    %cst_156 = arith.constant 0.000000e+00 : f32
    %165 = vector.broadcast %cst_156 : f32 to vector<32x64xf32>
    %166 = arith.maximumf %164, %165 : vector<32x64xf32>
    %c0_157 = arith.constant 0 : index
    %c0_158 = arith.constant 0 : index
    %167 = vector.load %arg17[%c0_157, %c0_158] : memref<64x256xf32, #tpu.memory_space<vmem>>, vector<64x256xf32>
    %cst_159 = arith.constant dense<0.000000e+00> : vector<32x256xf32>
    %168 = tpu.matmul %166, %167, %cst_159 {dimension_numbers = #tpu.dot_dimension_numbers<[1], [0], [0], [1], [0, 0, 1, 1], [], []>} : vector<32x64xf32>, vector<64x256xf32>, vector<32x256xf32> -> vector<32x256xf32>
    %cst_160 = arith.constant 0.000000e+00 : f32
    %169 = vector.broadcast %cst_160 : f32 to vector<32x256xf32>
    %170 = arith.maximumf %168, %169 : vector<32x256xf32>
    %c17_i32_161 = arith.constant 17 : i32
    %171 = tpu.dynamic_rotate %170 by %c17_i32_161 dim 1 : vector<32x256xf32>, i32 -> vector<32x256xf32>
    %c0_162 = arith.constant 0 : index
    %c0_163 = arith.constant 0 : index
    %c0_164 = arith.constant 0 : index
    %172 = vector.load %arg2[%c0_162, %c0_163, %c0_164] : memref<9x1x256xf32, #tpu.memory_space<vmem>>, vector<1x1x256xf32>
    %173 = vector.shape_cast %172 : vector<1x1x256xf32> to vector<1x256xf32>
    %174 = vector.broadcast %173 : vector<1x256xf32> to vector<32x256xf32>
    %175 = arith.mulf %171, %174 : vector<32x256xf32>
    %c16_i32_165 = arith.constant 16 : i32
    %176 = tpu.dynamic_rotate %170 by %c16_i32_165 dim 1 : vector<32x256xf32>, i32 -> vector<32x256xf32>
    %c1_166 = arith.constant 1 : index
    %c0_167 = arith.constant 0 : index
    %c0_168 = arith.constant 0 : index
    %177 = vector.load %arg2[%c1_166, %c0_167, %c0_168] : memref<9x1x256xf32, #tpu.memory_space<vmem>>, vector<1x1x256xf32>
    %178 = vector.shape_cast %177 : vector<1x1x256xf32> to vector<1x256xf32>
    %179 = vector.broadcast %178 : vector<1x256xf32> to vector<32x256xf32>
    %180 = arith.mulf %176, %179 : vector<32x256xf32>
    %c15_i32_169 = arith.constant 15 : i32
    %181 = tpu.dynamic_rotate %170 by %c15_i32_169 dim 1 : vector<32x256xf32>, i32 -> vector<32x256xf32>
    %c2_170 = arith.constant 2 : index
    %c0_171 = arith.constant 0 : index
    %c0_172 = arith.constant 0 : index
    %182 = vector.load %arg2[%c2_170, %c0_171, %c0_172] : memref<9x1x256xf32, #tpu.memory_space<vmem>>, vector<1x1x256xf32>
    %183 = vector.shape_cast %182 : vector<1x1x256xf32> to vector<1x256xf32>
    %184 = vector.broadcast %183 : vector<1x256xf32> to vector<32x256xf32>
    %185 = arith.mulf %181, %184 : vector<32x256xf32>
    %c1_i32_173 = arith.constant 1 : i32
    %186 = tpu.dynamic_rotate %170 by %c1_i32_173 dim 1 : vector<32x256xf32>, i32 -> vector<32x256xf32>
    %c3_174 = arith.constant 3 : index
    %c0_175 = arith.constant 0 : index
    %c0_176 = arith.constant 0 : index
    %187 = vector.load %arg2[%c3_174, %c0_175, %c0_176] : memref<9x1x256xf32, #tpu.memory_space<vmem>>, vector<1x1x256xf32>
    %188 = vector.shape_cast %187 : vector<1x1x256xf32> to vector<1x256xf32>
    %189 = vector.broadcast %188 : vector<1x256xf32> to vector<32x256xf32>
    %190 = arith.mulf %186, %189 : vector<32x256xf32>
    %c4_177 = arith.constant 4 : index
    %c0_178 = arith.constant 0 : index
    %c0_179 = arith.constant 0 : index
    %191 = vector.load %arg2[%c4_177, %c0_178, %c0_179] : memref<9x1x256xf32, #tpu.memory_space<vmem>>, vector<1x1x256xf32>
    %192 = vector.shape_cast %191 : vector<1x1x256xf32> to vector<1x256xf32>
    %193 = vector.broadcast %192 : vector<1x256xf32> to vector<32x256xf32>
    %194 = arith.mulf %170, %193 : vector<32x256xf32>
    %c255_i32_180 = arith.constant 255 : i32
    %195 = tpu.dynamic_rotate %170 by %c255_i32_180 dim 1 : vector<32x256xf32>, i32 -> vector<32x256xf32>
    %c5_181 = arith.constant 5 : index
    %c0_182 = arith.constant 0 : index
    %c0_183 = arith.constant 0 : index
    %196 = vector.load %arg2[%c5_181, %c0_182, %c0_183] : memref<9x1x256xf32, #tpu.memory_space<vmem>>, vector<1x1x256xf32>
    %197 = vector.shape_cast %196 : vector<1x1x256xf32> to vector<1x256xf32>
    %198 = vector.broadcast %197 : vector<1x256xf32> to vector<32x256xf32>
    %199 = arith.mulf %195, %198 : vector<32x256xf32>
    %c241_i32_184 = arith.constant 241 : i32
    %200 = tpu.dynamic_rotate %170 by %c241_i32_184 dim 1 : vector<32x256xf32>, i32 -> vector<32x256xf32>
    %c6_185 = arith.constant 6 : index
    %c0_186 = arith.constant 0 : index
    %c0_187 = arith.constant 0 : index
    %201 = vector.load %arg2[%c6_185, %c0_186, %c0_187] : memref<9x1x256xf32, #tpu.memory_space<vmem>>, vector<1x1x256xf32>
    %202 = vector.shape_cast %201 : vector<1x1x256xf32> to vector<1x256xf32>
    %203 = vector.broadcast %202 : vector<1x256xf32> to vector<32x256xf32>
    %204 = arith.mulf %200, %203 : vector<32x256xf32>
    %c240_i32_188 = arith.constant 240 : i32
    %205 = tpu.dynamic_rotate %170 by %c240_i32_188 dim 1 : vector<32x256xf32>, i32 -> vector<32x256xf32>
    %c7_189 = arith.constant 7 : index
    %c0_190 = arith.constant 0 : index
    %c0_191 = arith.constant 0 : index
    %206 = vector.load %arg2[%c7_189, %c0_190, %c0_191] : memref<9x1x256xf32, #tpu.memory_space<vmem>>, vector<1x1x256xf32>
    %207 = vector.shape_cast %206 : vector<1x1x256xf32> to vector<1x256xf32>
    %208 = vector.broadcast %207 : vector<1x256xf32> to vector<32x256xf32>
    %209 = arith.mulf %205, %208 : vector<32x256xf32>
    %c239_i32_192 = arith.constant 239 : i32
    %210 = tpu.dynamic_rotate %170 by %c239_i32_192 dim 1 : vector<32x256xf32>, i32 -> vector<32x256xf32>
    %c8_193 = arith.constant 8 : index
    %c0_194 = arith.constant 0 : index
    %c0_195 = arith.constant 0 : index
    %211 = vector.load %arg2[%c8_193, %c0_194, %c0_195] : memref<9x1x256xf32, #tpu.memory_space<vmem>>, vector<1x1x256xf32>
    %212 = vector.shape_cast %211 : vector<1x1x256xf32> to vector<1x256xf32>
    %213 = vector.broadcast %212 : vector<1x256xf32> to vector<32x256xf32>
    %214 = arith.mulf %210, %213 : vector<32x256xf32>
    %215 = tpu.concatenate %175, %180, %185, %190, %194, %199, %204, %209, %214 in 0 : vector<32x256xf32>, vector<32x256xf32>, vector<32x256xf32>, vector<32x256xf32>, vector<32x256xf32>, vector<32x256xf32>, vector<32x256xf32>, vector<32x256xf32>, vector<32x256xf32> -> vector<288x256xf32>
    %c0_196 = arith.constant 0 : index
    %c0_197 = arith.constant 0 : index
    %216 = vector.load %arg18[%c0_196, %c0_197] : memref<2x288xf32, #tpu.memory_space<vmem>>, vector<2x288xf32>
    %cst_198 = arith.constant dense<0.000000e+00> : vector<2x256xf32>
    %217 = tpu.matmul %216, %215, %cst_198 {dimension_numbers = #tpu.dot_dimension_numbers<[1], [0], [0], [1], [0, 0, 1, 1], [], []>} : vector<2x288xf32>, vector<288x256xf32>, vector<2x256xf32> -> vector<2x256xf32>
    %c0_199 = arith.constant 0 : index
    %c0_200 = arith.constant 0 : index
    %218 = vector.load %arg19[%c0_199, %c0_200] : memref<2x1xf32, #tpu.memory_space<vmem>>, vector<2x1xf32>
    %219 = vector.broadcast %218 : vector<2x1xf32> to vector<2x256xf32>
    %220 = arith.addf %217, %219 : vector<2x256xf32>
    %cst_201 = arith.constant 0.000000e+00 : f32
    %221 = vector.broadcast %cst_201 : f32 to vector<2x256xf32>
    %222 = arith.subf %221, %220 : vector<2x256xf32>
    %223 = math.exp %222 : vector<2x256xf32>
    %cst_202 = arith.constant 1.000000e+00 : f32
    %224 = vector.broadcast %cst_202 : f32 to vector<2x256xf32>
    %225 = arith.addf %224, %223 : vector<2x256xf32>
    %cst_203 = arith.constant 1.000000e+00 : f32
    %226 = vector.broadcast %cst_203 : f32 to vector<2x256xf32>
    %227 = arith.divf %226, %225 : vector<2x256xf32>
    %c0_204 = arith.constant 0 : index
    %c0_205 = arith.constant 0 : index
    %228 = vector.load %arg20[%c0_204, %c0_205] : memref<2x256xf32, #tpu.memory_space<vmem>>, vector<2x256xf32>
    tpu.vector_store %arg20[%c0_204, %c0_205], %227 {strides = array<i32>} : memref<2x256xf32, #tpu.memory_space<vmem>>, vector<2x256xf32>,
    return
  }
  func.func @transform_0(%arg0: i32) -> (i32, i32) {
    %c0_i32 = arith.constant 0 : i32
    %c0_i32_0 = arith.constant 0 : i32
    return %arg0, %c0_i32 : i32, i32
  }
  func.func @transform_1(%arg0: i32) -> (i32, i32, i32) {
    %c0_i32 = arith.constant 0 : i32
    %c0_i32_0 = arith.constant 0 : i32
    %c0_i32_1 = arith.constant 0 : i32
    %c0_i32_2 = arith.constant 0 : i32
    return %c0_i32, %c0_i32_0, %c0_i32_1 : i32, i32, i32
  }
  func.func @transform_2(%arg0: i32) -> (i32, i32) {
    %c0_i32 = arith.constant 0 : i32
    %c0_i32_0 = arith.constant 0 : i32
    %c0_i32_1 = arith.constant 0 : i32
    return %c0_i32, %c0_i32_0 : i32, i32
  }
  func.func @transform_3(%arg0: i32) -> (i32, i32) {
    %c0_i32 = arith.constant 0 : i32
    %c0_i32_0 = arith.constant 0 : i32
    %c0_i32_1 = arith.constant 0 : i32
    return %c0_i32, %c0_i32_0 : i32, i32
  }
  func.func @transform_4(%arg0: i32) -> (i32, i32, i32) {
    %c0_i32 = arith.constant 0 : i32
    %c0_i32_0 = arith.constant 0 : i32
    %c0_i32_1 = arith.constant 0 : i32
    %c0_i32_2 = arith.constant 0 : i32
    return %c0_i32, %c0_i32_0, %c0_i32_1 : i32, i32, i32
  }
  func.func @transform_5(%arg0: i32) -> (i32, i32) {
    %c0_i32 = arith.constant 0 : i32
    %c0_i32_0 = arith.constant 0 : i32
    %c0_i32_1 = arith.constant 0 : i32
    return %c0_i32, %c0_i32_0 : i32, i32
  }
  func.func @transform_6(%arg0: i32) -> (i32, i32) {
    %c0_i32 = arith.constant 0 : i32
    %c0_i32_0 = arith.constant 0 : i32
    %c0_i32_1 = arith.constant 0 : i32
    return %c0_i32, %c0_i32_0 : i32, i32
  }
  func.func @transform_7(%arg0: i32) -> (i32, i32, i32) {
    %c0_i32 = arith.constant 0 : i32
    %c0_i32_0 = arith.constant 0 : i32
    %c0_i32_1 = arith.constant 0 : i32
    %c0_i32_2 = arith.constant 0 : i32
    return %c0_i32, %c0_i32_0, %c0_i32_1 : i32, i32, i32
  }
  func.func @transform_8(%arg0: i32) -> (i32, i32) {
    %c0_i32 = arith.constant 0 : i32
    %c0_i32_0 = arith.constant 0 : i32
    %c0_i32_1 = arith.constant 0 : i32
    return %c0_i32, %c0_i32_0 : i32, i32
  }
  func.func @transform_9(%arg0: i32) -> (i32, i32) {
    %c0_i32 = arith.constant 0 : i32
    %c0_i32_0 = arith.constant 0 : i32
    %c0_i32_1 = arith.constant 0 : i32
    return %c0_i32, %c0_i32_0 : i32, i32
  }
  func.func @transform_10(%arg0: i32) -> (i32, i32, i32) {
    %c0_i32 = arith.constant 0 : i32
    %c0_i32_0 = arith.constant 0 : i32
    %c0_i32_1 = arith.constant 0 : i32
    %c0_i32_2 = arith.constant 0 : i32
    return %c0_i32, %c0_i32_0, %c0_i32_1 : i32, i32, i32
  }
  func.func @transform_11(%arg0: i32) -> (i32, i32) {
    %c0_i32 = arith.constant 0 : i32
    %c0_i32_0 = arith.constant 0 : i32
    %c0_i32_1 = arith.constant 0 : i32
    return %c0_i32, %c0_i32_0 : i32, i32
  }
  func.func @transform_12(%arg0: i32) -> (i32, i32) {
    %c0_i32 = arith.constant 0 : i32
    %c0_i32_0 = arith.constant 0 : i32
    %c0_i32_1 = arith.constant 0 : i32
    return %c0_i32, %c0_i32_0 : i32, i32
  }
  func.func @transform_13(%arg0: i32) -> (i32, i32) {
    %c0_i32 = arith.constant 0 : i32
    %c0_i32_0 = arith.constant 0 : i32
    %c0_i32_1 = arith.constant 0 : i32
    return %c0_i32, %c0_i32_0 : i32, i32
  }
  func.func @transform_14(%arg0: i32) -> (i32, i32) {
    %c0_i32 = arith.constant 0 : i32
    %c0_i32_0 = arith.constant 0 : i32
    %c0_i32_1 = arith.constant 0 : i32
    return %c0_i32, %c0_i32_0 : i32, i32
  }
  func.func @transform_15(%arg0: i32) -> (i32, i32) {
    %c0_i32 = arith.constant 0 : i32
    %c0_i32_0 = arith.constant 0 : i32
    %c0_i32_1 = arith.constant 0 : i32
    return %c0_i32, %c0_i32_0 : i32, i32
  }
  func.func @transform_16(%arg0: i32) -> (i32, i32) {
    %c0_i32 = arith.constant 0 : i32
    %c0_i32_0 = arith.constant 0 : i32
    %c0_i32_1 = arith.constant 0 : i32
    return %c0_i32, %c0_i32_0 : i32, i32
  }
  func.func @transform_17(%arg0: i32) -> (i32, i32) {
    %c0_i32 = arith.constant 0 : i32
    %c0_i32_0 = arith.constant 0 : i32
    %c0_i32_1 = arith.constant 0 : i32
    return %c0_i32, %c0_i32_0 : i32, i32
  }
  func.func @transform_18(%arg0: i32) -> (i32, i32) {
    %c0_i32 = arith.constant 0 : i32
    %c0_i32_0 = arith.constant 0 : i32
    %c0_i32_1 = arith.constant 0 : i32
    return %c0_i32, %c0_i32_0 : i32, i32
  }
  func.func @transform_19(%arg0: i32) -> (i32, i32) {
    %c0_i32 = arith.constant 0 : i32
    %c0_i32_0 = arith.constant 0 : i32
    return %arg0, %c0_i32 : i32, i32
  }
}

</mosaic_0001>

<bundles_post_ra>
// kernel: ae_forward.1
= control target key start
LH: loop header
LB: loop body
LE: loop exit
PB: predicated region body
PF: predicated region fallthrough
CT: control target
= control target key end

     0   :  { %v67_v0 = vlaneseq  ;;  %v5929_v1 = vmov 1983009808   ;;  %s8177_s21 = smov 113   ;;  %s8183_s22 = smov 16   ;;  %v5936_v9 = vmov 0.0   ;;  %v5939_v10 = vmov 0   ;;  %s8150_s0 = inlined_call_operand.vmem [shape: f32[2,256], index: 0, kind: input, shape index: {}]   ;;  %s8151_s3 = inlined_call_operand.vmem [shape: f32[32,1], index: 3, kind: input, shape index: {}]   ;;  %s8152_s6 = inlined_call_operand.vmem [shape: f32[32,1], index: 6, kind: input, shape index: {}]   ;;  %s8153_s4 = inlined_call_operand.vmem [shape: f32[4,256,64], index: 4, kind: input, shape index: {}]   ;;  %s8154_s9 = inlined_call_operand.vmem [shape: f32[32,1], index: 9, kind: input, shape index: {}]   ;;  %s8155_s12 = inlined_call_operand.vmem [shape: f32[32,1], index: 12, kind: input, shape index: {}]   ;;  %s8156_s15 = inlined_call_operand.vmem [shape: f32[32,1], index: 15, kind: input, shape index: {}]   ;;  %s8157_s1 = inlined_call_operand.vmem [shape: f32[9,1,256], index: 1, kind: input, shape index: {}]   ;;  %s8158_s2 = inlined_call_operand.vmem [shape: f32[32,18], index: 2, kind: input, shape index: {}]   ;;  %s8159_s5 = inlined_call_operand.vmem [shape: f32[32,128], index: 5, kind: input, shape index: {}]   ;;  %s8160_s7 = inlined_call_operand.vmem [shape: f32[9,64,64], index: 7, kind: input, shape index: {}]   ;;  %s8161_s8 = inlined_call_operand.vmem [shape: f32[32,288], index: 8, kind: input, shape index: {}]   ;;  %s8162_s10 = inlined_call_operand.vmem [shape: f32[4,64,16], index: 10, kind: input, shape index: {}]   ;;  %s8163_s11 = inlined_call_operand.vmem [shape: f32[32,128], index: 11, kind: input, shape index: {}]   ;;  %s8164_s13 = inlined_call_operand.vmem [shape: f32[16,64], index: 13, kind: input, shape index: {}]   ;;  %s8165_s14 = inlined_call_operand.vmem [shape: f32[32,288], index: 14, kind: input, shape index: {}]   ;;  %s8166_s16 = inlined_call_operand.vmem [shape: f32[64,256], index: 16, kind: input, shape index: {}]   ;;  %s8167_s17 = inlined_call_operand.vmem [shape: f32[2,288], index: 17, kind: input, shape index: {}]   ;;  %s8168_s18 = inlined_call_operand.vmem [shape: f32[2,1], index: 18, kind: input, shape index: {}]   ;;  %s8169_s19 = inlined_call_operand.vmem [shape: f32[2,256], index: 19, kind: output, shape index: {}]  }
   0x1   :  { %8194 = sst [smem:[#allocation11_spill]] %s8150_s0  ;;  %v65_v2 = vunpack.c.l.s4 %v5929_v1  ;;  %s5934_s23 = smov 15   ;;  %445 = vmatprep.mubr.f32.mxu1 %v5936_v9  ;;  %5846 = vset.pattern.permute.xlu0 %v5939_v10  ;;  %v1937_v28 = vld [vmem:[%s8154_s9 + $0x8] sm:$0xff]  ;;  %v1936_v30 = vld [vmem:[%s8154_s9] sm:$0xff]  ;;  %v1939_v34 = vld [vmem:[%s8154_s9 + $0x18] sm:$0xff]  ;;  %vm319_vm5 = vcmask 1041408  }
   0x2   :  { %8195 = sst [smem:[#allocation12_spill]] %s8151_s3  ;;  %v6041_v3 = vshrl.u32 %v67_v0, 7  ;;  %s8175_s3 = smov 127   ;;  %5847 = vset.pattern.permute.xlu1 %v5939_v10  ;;  %v1938_v36 = vld [vmem:[%s8154_s9 + $0x10] sm:$0xff]  ;;  %v2539_v40 = vld [vmem:[%s8155_s12 + $0x8] sm:$0xff]  ;;  %v2538_v42 = vld [vmem:[%s8155_s12] sm:$0xff] }
   0x3   :  { %8196 = sst [smem:[#allocation13_spill]] %s8152_s6  ;;  %v66_v4 = vunpack.c.0.s8 %v65_v2  ;;  %s8179_s6 = smov 112   ;;  %v2541_v46 = vld [vmem:[%s8155_s12 + $0x18] sm:$0xff]  ;;  %v2540_v48 = vld [vmem:[%s8155_s12 + $0x10] sm:$0xff]  ;;  %v3545_v52 = vld [vmem:[%s8156_s15 + $0x8] sm:$0xff]  ;;  %vm322_vm6 = vcmask 1043456  }
   0x4   :  { %8197 = sst [smem:[#allocation14_spill]] %s8153_s4  ;;  %s8173_s24 = smov 111   ;;  %v3544_v53 = vld [vmem:[%s8156_s15] sm:$0xff]  ;;  %v3547_v54 = vld [vmem:[%s8156_s15 + $0x18] sm:$0xff]  ;;  %v3546_v55 = vld [vmem:[%s8156_s15 + $0x10] sm:$0xff]  ;;  %v6206_v56 = vsub.s32 0, %v6041_v3 }
   0x5   :  { %s8198_s20 = sld [smem:[#allocation11_spill]]  ;;  %v6049_v6 = vsub.s32 %v66_v4, %v6041_v3  ;;  %s8181_s25 = smov 17   ;;  %v6209_v57 = vsub.s32 1, %v6041_v3  ;;  %v4346_v58 = vld [vmem:[%s8157_s1 + $0x8] sm:$0x3]  ;;  %v6223_v3 = vand.u32 127, %v67_v0 }
   0x6   :  { %s5938_s4 = smov 1   ;;  %s8200_s28 = sld [smem:[#allocation12_spill]]  ;;  %v6215_v59 = vrot.slane %v4346_v58, %v6206_v56  ;;  %vm325_vm9 = vcmask 1045504   ;;  %vm362_vm11 = vcmask 146432   ;;  %vm1074_vm12 = vcmask 523264  }
   0x7   :  { %8199 = vst [vmem:[#allocation2_spill] sm:$0xff] %v6049_v6  ;;  %s8201_s26 = sld [smem:[#allocation13_spill]]  ;;  %v6218_v60 = vrot.slane %v4346_v58, %v6209_v57  ;;  %vm188_vm0 = vcmp.lt.s32.totalorder %v6223_v3, 127  ;;  %vm210_vm1 = vcmp.lt.s32.totalorder %v6223_v3, 113  ;;  %vm232_vm2 = vcmp.lt.s32.totalorder %v6223_v3, 112  ;;  %s8212_s27 = smov 113  }
   0x8   :  { %vm101_vm3 = vcmp.lt.s32.totalorder %v6223_v3, 16  ;;  %vm123_vm4 = vcmp.lt.s32.totalorder %v6223_v3, 15  ;;  %vm254_vm7 = vcmp.lt.s32.totalorder %v6223_v3, 111  ;;  %vm80_vm8 = vcmp.lt.s32.totalorder %v6223_v3, 17  ;;  %s8215_s12 = smov 111  }
   0x9   :  { %v174_v63 = vcombine.low %v6215_v59, %v6218_v60  ;;  %vm145_vm10 = vcmp.lt.s32.totalorder %v6223_v3, 1  ;;  %vm1960_vm13 = vcmask 261120   ;;  %vm2653_vm14 = vcmask 130048  }
   0xb   :  { %v6046_v5 = vld [vmem:[%s8198_s20] sm:$0xf]  ;;  %v181_v4 = vrot.slane %v174_v63, %v6049_v6 }
   0xc   :  { %v70_v7 = vrot.slane %v6046_v5, %v6049_v6  ;;  %v338_v11 = vld [vmem:[%s8200_s28] sm:$0xff]  ;;  %v339_v12 = vld [vmem:[%s8200_s28 + $0x8] sm:$0xff]  ;;  %v341_v13 = vld [vmem:[%s8200_s28 + $0x18] sm:$0xff] }
   0xd   :  { %v340_v14 = vld [vmem:[%s8200_s28 + $0x10] sm:$0xff]  ;;  %v954_v15 = vld [vmem:[%s8201_s26 + $0x8] sm:$0xff]  ;;  %v953_v16 = vld [vmem:[%s8201_s26] sm:$0xff]  ;;  %s8207_s28 = smov 112  }
   0xe   :  { %206 = vrot.lane.b32.xlu1 %v70_v7, %s8177_s21  ;;  %184 = vrot.lane.b32.xlu0 %v70_v7, %s8175_s3  ;;  %v71_v8 = vcombine.high %v70_v7, %v70_v7  ;;  %v956_v22 = vld [vmem:[%s8201_s26 + $0x18] sm:$0xff]  ;;  %v955_v24 = vld [vmem:[%s8201_s26 + $0x10] sm:$0xff] }
  0x12   :  { %97 = vrot.lane.b32.xlu0 %v70_v7, %s8183_s22  ;;  %208 = vrot.lane.b32.xlu1 %v71_v8, %s8177_s21 }
  0x16   :  { %99 = vrot.lane.b32.xlu1 %v71_v8, %s8183_s22  ;;  %186 = vrot.lane.b32.xlu0 %v71_v8, %s8175_s3  ;;  %s8202_s22 = sld [smem:[#allocation14_spill]] }
  0x1a   :  { %230 = vrot.lane.b32.xlu1 %v71_v8, %s8179_s6  ;;  %228 = vrot.lane.b32.xlu0 %v70_v7, %s8179_s6 }
  0x1c   :  { %v4388_v17 = vld [vmem:[%s8202_s22 + $0x1f8] sm:$0xff]  ;;  %v4387_v19 = vld [vmem:[%s8202_s22 + $0x1f0] sm:$0xff]  ;;  %v4386_v21 = vld [vmem:[%s8202_s22 + $0x1e8] sm:$0xff] }
  0x1d   :  { %v4372_v18 = vld [vmem:[%s8202_s22 + $0x178] sm:$0xff]  ;;  %4691 = vmatprep.subr.mxu0 %v4388_v17  ;;  %v4371_v20 = vld [vmem:[%s8202_s22 + $0x170] sm:$0xff]  ;;  %v4370_v23 = vld [vmem:[%s8202_s22 + $0x168] sm:$0xff] }
  0x1e   :  { %121 = vrot.lane.b32.xlu1 %v71_v8, %s5934_s23  ;;  %119 = vrot.lane.b32.xlu0 %v70_v7, %s5934_s23  ;;  %v4385_v25 = vld [vmem:[%s8202_s22 + $0x1e0] sm:$0xff]  ;;  %v4384_v27 = vld [vmem:[%s8202_s22 + $0x1d8] sm:$0xff] }
  0x1f   :  { %4692 = vmatpush3.msra.mxu0 %v4372_v18  ;;  %v4369_v26 = vld [vmem:[%s8202_s22 + $0x160] sm:$0xff]  ;;  %v4368_v29 = vld [vmem:[%s8202_s22 + $0x158] sm:$0xff]  ;;  %v4383_v31 = vld [vmem:[%s8202_s22 + $0x1d0] sm:$0xff] }
  0x20   :  { %4693 = vmatprep.subr.mxu0 %v4387_v19  ;;  %v4367_v32 = vld [vmem:[%s8202_s22 + $0x150] sm:$0xff]  ;;  %v4382_v33 = vld [vmem:[%s8202_s22 + $0x1c8] sm:$0xff]  ;;  %v4381_v37 = vld [vmem:[%s8202_s22 + $0x1c0] sm:$0xff] }
  0x21   :  { %4694 = vmatpush3.msra.mxu0 %v4371_v20  ;;  %v4366_v35 = vld [vmem:[%s8202_s22 + $0x148] sm:$0xff]  ;;  %v4365_v38 = vld [vmem:[%s8202_s22 + $0x140] sm:$0xff]  ;;  %v4380_v39 = vld [vmem:[%s8202_s22 + $0x1b8] sm:$0xff] }
  0x22   :  { %252 = vrot.lane.b32.xlu1 %v71_v8, %s8173_s24  ;;  %250 = vrot.lane.b32.xlu0 %v70_v7, %s8173_s24  ;;  %v4364_v41 = vld [vmem:[%s8202_s22 + $0x138] sm:$0xff]  ;;  %v4379_v43 = vld [vmem:[%s8202_s22 + $0x1b0] sm:$0xff] }
  0x23   :  { %4695 = vmatprep.subr.mxu0 %v4386_v21  ;;  %v4363_v44 = vld [vmem:[%s8202_s22 + $0x130] sm:$0xff]  ;;  %v4378_v45 = vld [vmem:[%s8202_s22 + $0x1a8] sm:$0xff]  ;;  %v4377_v49 = vld [vmem:[%s8202_s22 + $0x1a0] sm:$0xff] }
  0x24   :  { %4696 = vmatpush3.msra.mxu0 %v4370_v23  ;;  %v4362_v47 = vld [vmem:[%s8202_s22 + $0x128] sm:$0xff]  ;;  %v4361_v50 = vld [vmem:[%s8202_s22 + $0x120] sm:$0xff]  ;;  %v4376_v51 = vld [vmem:[%s8202_s22 + $0x198] sm:$0xff] }
  0x25   :  { %4697 = vmatprep.subr.mxu0 %v4385_v25  ;;  %v4344_v25 = vld [vmem:[%s8157_s1 + $0x4] sm:$0x3] }
  0x26   :  { %76 = vrot.lane.b32.xlu1 %v71_v8, %s8181_s25  ;;  %74 = vrot.lane.b32.xlu0 %v70_v7, %s8181_s25  ;;  %s8206_s25 = smov 17  }
  0x27   :  { %4698 = vmatpush3.msra.mxu0 %v4369_v26 }
  0x28   :  { %4699 = vmatprep.subr.mxu0 %v4384_v27 }
  0x29   :  { %4700 = vmatpush3.msra.mxu0 %v4368_v29 }
  0x2a   :  { %143 = vrot.lane.b32.xlu1 %v71_v8, %s5938_s4  ;;  %141 = vrot.lane.b32.xlu0 %v70_v7, %s5938_s4  ;;  %v4347_v7 = vld [vmem:[%s8157_s1 + $0xa] sm:$0x3] }
  0x2b   :  { %4701 = vmatprep.subr.mxu0 %v4383_v31  ;;  %v6237_v0 = vrot.slane %v4347_v7, %v6209_v57 }
  0x2c   :  { %4702 = vmatpush3.msra.mxu0 %v4367_v32  ;;  %v4350_v32 = vld [vmem:[%s8157_s1 + $0x10] sm:$0x3] }
  0x2d   :  { %4703 = vmatprep.subr.mxu0 %v4382_v33 }
  0x2e   :  { %344 = vperm.xlu0 %5846, %v338_v11   ;;  %349 = vperm.xlu1 %5847, %v339_v12   ;;  %v4348_v11 = vld [vmem:[%s8157_s1 + $0xc] sm:$0x3]  ;;  %v4343_v12 = vld [vmem:[%s8157_s1 + $0x2] sm:$0x3] }
  0x2f   :  { %4704 = vmatpush3.msra.mxu0 %v4366_v35  ;;  %v6253_v18 = vrot.slane %v4348_v11, %v6206_v56  ;;  %v6260_v19 = vrot.slane %v4343_v12, %v6206_v56  ;;  %v6273_v27 = vrot.slane %v4343_v12, %v6209_v57 }
  0x30   :  { %4705 = vmatprep.subr.mxu0 %v4381_v37  ;;  %v6294_v37 = vrot.slane %v4344_v25, %v6209_v57 }
  0x31   :  { %4706 = vmatpush3.msra.mxu0 %v4365_v38 }
  0x32   :  { %359 = vperm.xlu0 %5846, %v341_v13   ;;  %354 = vperm.xlu1 %5847, %v340_v14   ;;  %v183_v13 = vmul.f32 %v181_v4, %v6046_v5  ;;  %v6242_v14 = vrot.slane %v4347_v7, %v6206_v56  ;;  %v6256_v5 = vrot.slane %v4348_v11, %v6209_v57 }
  0x33   :  { %4707 = vmatprep.subr.mxu0 %v4380_v39  ;;  %v83_v39 = vld [vmem:[%s8157_s1] sm:$0x3] }
  0x34   :  { %4708 = vmatpush3.msra.mxu0 %v4364_v41  ;;  %v297_v26 = vrot.slane %v183_v13, %v6049_v6 }
  0x35   :  { %4709 = vmatprep.subr.mxu0 %v4379_v43 }
  0x36   :  { %964 = vperm.xlu0 %5846, %v954_v15   ;;  %959 = vperm.xlu1 %5847, %v953_v16   ;;  %v4349_v16 = vld [vmem:[%s8157_s1 + $0xe] sm:$0x3] }
  0x37   :  { %4710 = vmatpush3.msra.mxu0 %v4363_v44  ;;  %v6277_v29 = vrot.slane %v4349_v16, %v6206_v56 }
  0x38   :  { %4711 = vmatprep.subr.mxu0 %v4378_v45  ;;  %v6303_v45 = vrot.slane %v4350_v32, %v6206_v56 }
  0x39   :  { %4712 = vmatpush3.msra.mxu0 %v4362_v47 }
  0x3a   :  { %974 = vperm.xlu0 %5846, %v956_v22   ;;  %969 = vperm.xlu1 %5847, %v955_v24   ;;  %v6266_v24 = vrot.slane %v4349_v16, %v6209_v57 }
  0x3b   :  { %4713 = vmatprep.subr.mxu0 %v4377_v49 }
  0x3c   :  { %4714 = vmatpush3.msra.mxu0 %v4361_v50 }
  0x3d   :  { %4715 = vmatprep.subr.mxu0 %v4376_v51 }
  0x3e   :  { %1947 = vperm.xlu0 %5846, %v1937_v28   ;;  %1942 = vperm.xlu1 %5847, %v1936_v30  }
  0x42   :  { %1957 = vperm.xlu0 %5846, %v1939_v34   ;;  %1952 = vperm.xlu1 %5847, %v1938_v36   ;;  %v6291_v36 = vrot.slane %v4344_v25, %v6206_v56 }
  0x46   :  { %2549 = vperm.xlu0 %5846, %v2539_v40   ;;  %2544 = vperm.xlu1 %5847, %v2538_v42   ;;  %v298_v42 = vcombine.high %v297_v26, %v297_v26 }
  0x4a   :  { %2559 = vperm.xlu0 %5846, %v2541_v46   ;;  %2554 = vperm.xlu1 %5847, %v2540_v48   ;;  %v6306_v46 = vrot.slane %v4350_v32, %v6209_v57  ;;  %v6311_v48 = vrot.slane %v83_v39, %v6206_v56 }
  0x4e   :  { %3555 = vperm.xlu0 %5846, %v3545_v52   ;;  %3550 = vperm.xlu1 %5847, %v3544_v53  }
  0x52   :  { %3565 = vperm.xlu0 %5846, %v3547_v54   ;;  %3560 = vperm.xlu1 %5847, %v3546_v55   ;;  %v6318_v54 = vrot.slane %v83_v39, %v6209_v57  ;;  %v4345_v55 = vld [vmem:[%s8157_s1 + $0x6] sm:$0x3] }
  0x53   :  { %v6334_v11 = vrot.slane %v4345_v55, %v6206_v56 }
  0x80   :  { %v207_v61 = vpop.permute.xlu1 %206  ;;  %v185_v62 = vpop.permute.xlu0 %184 }
  0x84   :  { %v98_v1 = vpop.permute.xlu0 %97  ;;  %v209_v2 = vpop.permute.xlu1 %208 }
  0x85   :  { %v212_v22 = vsel %vm210_vm1, %v209_v2, %v207_v61  ;;  %v211_v33 = vsel %vm210_vm1, %v207_v61, %v209_v2 }
  0x86   :  { %v227_v34 = vmul.f32 %v6256_v5, %v212_v22  ;;  %v226_v47 = vmul.f32 %v6253_v18, %v211_v33 }
  0x88   :  { %v100_v8 = vpop.permute.xlu1 %99  ;;  %v187_v10 = vpop.permute.xlu0 %186  ;;  %v310_v49 = vrot.slane %v227_v34, 4 }
  0x89   :  { %v190_v15 = vsel %vm188_vm0, %v187_v10, %v185_v62  ;;  %v189_v17 = vsel %vm188_vm0, %v185_v62, %v187_v10  ;;  %v102_v50 = vsel %vm101_vm3, %v98_v1, %v100_v8  ;;  %v103_v51 = vsel %vm101_vm3, %v100_v8, %v98_v1 }
  0x8a   :  { %v205_v23 = vmul.f32 %v6237_v0, %v190_v15  ;;  %v204_v28 = vmul.f32 %v6242_v14, %v189_v17  ;;  %v309_v8 = vrot.slane %v226_v47, 4  ;;  %v117_v10 = vmul.f32 %v6260_v19, %v103_v51 }
  0x8b   :  { %v118_v12 = vmul.f32 %v6273_v27, %v102_v50 }
  0x8c   :  { %v231_v20 = vpop.permute.xlu1 %230  ;;  %v229_v21 = vpop.permute.xlu0 %228  ;;  %v304_v40 = vrot.slane %v205_v23, 6  ;;  %v303_v43 = vrot.slane %v204_v28, 6  ;;  %v274_v33 = vrot.slane %v117_v10, 6  ;;  %v490_v10 = vld [vmem:[%s8202_s22 + $0x60] sm:$0xff] }
  0x8d   :  { %v234_v30 = vsel %vm232_vm2, %v231_v20, %v229_v21  ;;  %v233_v31 = vsel %vm232_vm2, %v229_v21, %v231_v20  ;;  %v275_v34 = vrot.slane %v118_v12, 6  ;;  %v336_v12 = vld [vmem:[%s8158_s2 + $0x10] sm:$0xff] }
  0x8e   :  { %v249_v41 = vmul.f32 %v6266_v24, %v234_v30  ;;  %v248_v44 = vmul.f32 %v6277_v29, %v233_v31  ;;  %v329_v63 = vsel %vm319_vm5, %v298_v42, %v304_v40  ;;  %v328_v7 = vsel %vm319_vm5, %v297_v26, %v303_v43 }
  0x8f   :  { %v331_v20 = vsel %vm322_vm6, %v329_v63, %v310_v49  ;;  %v330_v23 = vsel %vm322_vm6, %v328_v7, %v309_v8  ;;  %v6354_v30 = vrot.slane %v4345_v55, %v6209_v57  ;;  %v508_v63 = vld [vmem:[%s8202_s22 + $0xf0] sm:$0xff]  ;;  %v491_v7 = vld [vmem:[%s8202_s22 + $0x68] sm:$0xff]  ;;  %v506_v8 = vld [vmem:[%s8202_s22 + $0xe0] sm:$0xff] }
  0x90   :  { %v122_v35 = vpop.permute.xlu1 %121  ;;  %v120_v38 = vpop.permute.xlu0 %119  ;;  %v316_v58 = vrot.slane %v249_v41, 2  ;;  %v315_v2 = vrot.slane %v248_v44, 2 }
  0x91   :  { %v124_v13 = vsel %vm123_vm4, %v120_v38, %v122_v35  ;;  %v125_v15 = vsel %vm123_vm4, %v122_v35, %v120_v38 }
  0x92   :  { %v333_v22 = vsel %vm325_vm9, %v331_v20, %v316_v58  ;;  %v332_v28 = vsel %vm325_vm9, %v330_v23, %v315_v2  ;;  %v139_v31 = vmul.f32 %v6291_v36, %v125_v15  ;;  %v140_v32 = vmul.f32 %v6294_v37, %v124_v13  ;;  %v334_v58 = vld [vmem:[%s8158_s2] sm:$0xff]  ;;  %v492_v2 = vld [vmem:[%s8202_s22 + $0x70] sm:$0xff]  ;;  %v505_v13 = vld [vmem:[%s8202_s22 + $0xd8] sm:$0xff] }
  0x93   :  { %v489_v15 = vld [vmem:[%s8202_s22 + $0x58] sm:$0xff]  ;;  %v486_v23 = vld [vmem:[%s8202_s22 + $0x40] sm:$0xff] }
  0x94   :  { %v253_v52 = vpop.permute.xlu1 %252  ;;  %v251_v53 = vpop.permute.xlu0 %250  ;;  %v280_v44 = vrot.slane %v139_v31, 4  ;;  %v281_v47 = vrot.slane %v140_v32, 4  ;;  %v337_v20 = vld [vmem:[%s8158_s2 + $0x18] sm:$0xff]  ;;  %v484_v31 = vld [vmem:[%s8202_s22 + $0x30] sm:$0xff]  ;;  %v499_v32 = vld [vmem:[%s8202_s22 + $0xa8] sm:$0xff] }
  0x95   :  { %v255_v61 = vsel %vm254_vm7, %v251_v53, %v253_v52  ;;  %v256_v62 = vsel %vm254_vm7, %v253_v52, %v251_v53 }
  0x96   :  { %v270_v1 = vmul.f32 %v6303_v45, %v255_v61  ;;  %v271_v4 = vmul.f32 %v6306_v46, %v256_v62  ;;  %v509_v61 = vld [vmem:[%s8202_s22 + $0xf8] sm:$0xff] }
  0x97   :  { %v493_v62 = vld [vmem:[%s8202_s22 + $0x78] sm:$0xff] }
  0x98   :  { %v77_v16 = vpop.permute.xlu1 %76  ;;  %4351 = vmatprep.subr.msk.mxu1 %vm319_vm5, %v271_v4  ;;  %v75_v17 = vpop.permute.xlu0 %74  ;;  %v507_v4 = vld [vmem:[%s8202_s22 + $0xe8] sm:$0xff] }
  0x99   :  { %v81_v21 = vsel %vm80_vm8, %v75_v17, %v77_v16  ;;  %v82_v56 = vsel %vm80_vm8, %v77_v16, %v75_v17  ;;  %4352 = vmatpush1.msk.msra.mxu1 %vm319_vm5, %v270_v1  ;;  %v335_v1 = vld [vmem:[%s8158_s2 + $0x8] sm:$0xff]  ;;  %v504_v16 = vld [vmem:[%s8202_s22 + $0xd0] sm:$0xff] }
  0x9a   :  { %v95_v25 = vmul.f32 %v6311_v48, %v82_v56  ;;  %v96_v26 = vmul.f32 %v6318_v54, %v81_v21  ;;  %409 = vmatprep.subr.mxu1 %v333_v22  ;;  %v488_v17 = vld [vmem:[%s8202_s22 + $0x50] sm:$0xff]  ;;  %v503_v21 = vld [vmem:[%s8202_s22 + $0xc8] sm:$0xff]  ;;  %v502_v22 = vld [vmem:[%s8202_s22 + $0xc0] sm:$0xff] }
  0x9b   :  { %410 = vmatpush1.msra.mxu1 %v332_v28  ;;  %v487_v56 = vld [vmem:[%s8202_s22 + $0x48] sm:$0xff]  ;;  %v500_v28 = vld [vmem:[%s8202_s22 + $0xb0] sm:$0xff] }
  0x9c   :  { %v144_v35 = vpop.permute.xlu1 %143  ;;  %v142_v38 = vpop.permute.xlu0 %141  ;;  %v321_v42 = vsel %vm319_vm5, %v96_v26, %v275_v34  ;;  %v320_v43 = vsel %vm319_vm5, %v95_v25, %v274_v33  ;;  %v501_v25 = vld [vmem:[%s8202_s22 + $0xb8] sm:$0xff]  ;;  %v483_v33 = vld [vmem:[%s8202_s22 + $0x28] sm:$0xff]  ;;  %v498_v34 = vld [vmem:[%s8202_s22 + $0xa0] sm:$0xff] }
  0x9d   :  { %v146_v39 = vsel %vm145_vm10, %v142_v38, %v144_v35  ;;  %v147_v40 = vsel %vm145_vm10, %v144_v35, %v142_v38  ;;  %v324_v51 = vsel %vm322_vm6, %v321_v42, %v281_v47  ;;  %v323_v52 = vsel %vm322_vm6, %v320_v43, %v280_v44  ;;  %v485_v26 = vld [vmem:[%s8202_s22 + $0x38] sm:$0xff]  ;;  %v482_v35 = vld [vmem:[%s8202_s22 + $0x20] sm:$0xff]  ;;  %v480_v42 = vld [vmem:[%s8202_s22 + $0x10] sm:$0xff] }
  0x9e   :  { %v161_v41 = vmul.f32 %v6334_v11, %v147_v40  ;;  %v162_v57 = vmul.f32 %v6354_v30, %v146_v39  ;;  %v497_v38 = vld [vmem:[%s8202_s22 + $0x98] sm:$0xff]  ;;  %v4359_v43 = vld [vmem:[%s8202_s22 + $0x110] sm:$0xff]  ;;  %v495_v44 = vld [vmem:[%s8202_s22 + $0x88] sm:$0xff] }
  0x9f   :  { %v481_v39 = vld [vmem:[%s8202_s22 + $0x18] sm:$0xff]  ;;  %v4374_v47 = vld [vmem:[%s8202_s22 + $0x188] sm:$0xff] }
  0xa0   :  { %v286_v49 = vrot.slane %v161_v41, 2  ;;  %v287_v50 = vrot.slane %v162_v57, 2  ;;  %v4360_v40 = vld [vmem:[%s8202_s22 + $0x118] sm:$0xff]  ;;  %v4375_v41 = vld [vmem:[%s8202_s22 + $0x190] sm:$0xff] }
  0xa1   :  { %4716 = vmatpush3.msra.mxu0 %v4360_v40  ;;  %v496_v57 = vld [vmem:[%s8202_s22 + $0x90] sm:$0xff]  ;;  %v4402_v40 = vld [vmem:[%s8202_s22 + $0x268] sm:$0xff] }
  0xa2   :  { %v327_v53 = vsel %vm325_vm9, %v324_v51, %v287_v50  ;;  %v326_v55 = vsel %vm325_vm9, %v323_v52, %v286_v49  ;;  %4717 = vmatprep.subr.mxu0 %v4375_v41  ;;  %v479_v49 = vld [vmem:[%s8202_s22 + $0x8] sm:$0xff]  ;;  %v4373_v51 = vld [vmem:[%s8202_s22 + $0x180] sm:$0xff] }
  0xa3   :  { %411 = vmatprep.subr.mxu1 %v327_v53  ;;  %4718 = vmatpush3.msra.mxu0 %v4359_v43  ;;  %v4358_v50 = vld [vmem:[%s8202_s22 + $0x108] sm:$0xff]  ;;  %v494_v52 = vld [vmem:[%s8202_s22 + $0x80] sm:$0xff] }
  0xa4   :  { %412 = vmatpush1.msra.mxu1 %v326_v55  ;;  %4719 = vmatprep.subr.mxu0 %v4374_v47  ;;  %v478_v53 = vld [vmem:[%s8202_s22] sm:$0xff]  ;;  %v4434_v41 = vld [vmem:[%s8202_s22 + $0x368] sm:$0xff] }
  0xa5   :  { %4353 = vmatmul.mubr.msk.f32.vlgmr.msra.gmra.mxu1 %vm362_vm11, %v334_v58  ;;  %4647 = vmatprep.subr.mxu1 %v509_v61  ;;  %v4357_v55 = vld [vmem:[%s8202_s22 + $0x100] sm:$0xff]  ;;  %v4420_v58 = vld [vmem:[%s8202_s22 + $0x2f8] sm:$0xff] }
  0xa6   :  { %451 = vmatprep.mubr.f32.mxu1 %v5936_v9  ;;  %4648 = vmatpush3.msra.mxu1 %v493_v62  ;;  %v4452_v61 = vld [vmem:[%s8202_s22 + $0x3f8] sm:$0xff]  ;;  %v4401_v47 = vld [vmem:[%s8202_s22 + $0x260] sm:$0xff] }
  0xa7   :  { %4649 = vmatprep.subr.mxu1 %v508_v63  ;;  %4720 = vmatpush3.msra.mxu0 %v4358_v50 }
  0xa8   :  { %4650 = vmatpush3.msra.mxu1 %v492_v2  ;;  %4721 = vmatprep.subr.mxu0 %v4373_v51 }
  0xa9   :  { %4354 = vmatmul.mubr.msk.f32.gmra.mxu1 %vm362_vm11, %v335_v1  ;;  %4651 = vmatprep.subr.mxu1 %v507_v4  ;;  %v345_v63 = vpop.permute.xlu0 %344 }
  0xaa   :  { %457 = vmatprep.mubr.f32.mxu1 %v5936_v9  ;;  %4652 = vmatpush3.msra.mxu1 %v491_v7  ;;  %v350_v7 = vpop.permute.xlu1 %349 }
  0xab   :  { %4653 = vmatprep.subr.mxu1 %v506_v8  ;;  %4722 = vmatpush3.msra.mxu0 %v4357_v55  ;;  %v4448_v55 = vld [vmem:[%s8202_s22 + $0x3d8] sm:$0xff] }
  0xac   :  { %4654 = vmatpush3.msra.mxu1 %v490_v10  ;;  %4779 = vmatprep.subr.mxu0 %v4452_v61  ;;  %v4432_v61 = vld [vmem:[%s8202_s22 + $0x358] sm:$0xff] }
  0xad   :  { %4355 = vmatmul.mubr.msk.f32.gmra.mxu1 %vm362_vm11, %v336_v12  ;;  %4655 = vmatprep.subr.mxu1 %v505_v13  ;;  %v360_v50 = vpop.permute.xlu0 %359 }
  0xae   :  { %463 = vmatprep.mubr.f32.mxu1 %v5936_v9  ;;  %4656 = vmatpush3.msra.mxu1 %v489_v15 }
  0xaf   :  { %4657 = vmatprep.subr.mxu1 %v504_v16  ;;  %v4404_v16 = vld [vmem:[%s8202_s22 + $0x278] sm:$0xff] }
  0xb0   :  { %4658 = vmatpush3.msra.mxu1 %v488_v17  ;;  %v4436_v17 = vld [vmem:[%s8202_s22 + $0x378] sm:$0xff] }
  0xb1   :  { %4356 = vmatmul.mubr.msk.f32.gmra.mxu1 %vm362_vm11, %v337_v20  ;;  %4659 = vmatprep.subr.mxu1 %v503_v21  ;;  %v4419_v21 = vld [vmem:[%s8202_s22 + $0x2f0] sm:$0xff] }
  0xb2   :  { %4660 = vmatpush3.msra.mxu1 %v487_v56  ;;  %v4451_v56 = vld [vmem:[%s8202_s22 + $0x3f0] sm:$0xff] }
  0xb3   :  { %4661 = vmatprep.subr.mxu1 %v502_v22 }
  0xb4   :  { %4662 = vmatpush3.msra.mxu1 %v486_v23  ;;  %v4403_v23 = vld [vmem:[%s8202_s22 + $0x270] sm:$0xff] }
  0xb5   :  { %4663 = vmatprep.subr.mxu1 %v501_v25  ;;  %v4435_v25 = vld [vmem:[%s8202_s22 + $0x370] sm:$0xff] }
  0xb6   :  { %4664 = vmatpush3.msra.mxu1 %v485_v26 }
  0xb7   :  { %4665 = vmatprep.subr.mxu1 %v500_v28  ;;  %v355_v28 = vpop.permute.xlu1 %354 }
  0xb8   :  { %4666 = vmatpush3.msra.mxu1 %v484_v31 }
  0xb9   :  { %4667 = vmatprep.subr.mxu1 %v499_v32 }
  0xba   :  { %4668 = vmatpush3.msra.mxu1 %v483_v33  ;;  %v4418_v33 = vld [vmem:[%s8202_s22 + $0x2e8] sm:$0xff] }
  0xbb   :  { %4669 = vmatprep.subr.mxu1 %v498_v34  ;;  %v4450_v34 = vld [vmem:[%s8202_s22 + $0x3e8] sm:$0xff] }
  0xbc   :  { %4670 = vmatpush3.msra.mxu1 %v482_v35 }
  0xbd   :  { %4671 = vmatprep.subr.mxu1 %v497_v38 }
  0xbe   :  { %4672 = vmatpush3.msra.mxu1 %v481_v39 }
  0xbf   :  { %4673 = vmatprep.subr.mxu1 %v496_v57  ;;  %v4417_v57 = vld [vmem:[%s8202_s22 + $0x2e0] sm:$0xff] }
  0xc0   :  { %4674 = vmatpush3.msra.mxu1 %v480_v42  ;;  %v4449_v42 = vld [vmem:[%s8202_s22 + $0x3e0] sm:$0xff] }
  0xc1   :  { %4675 = vmatprep.subr.mxu1 %v495_v44 }
  0xc2   :  { %4676 = vmatpush3.msra.mxu1 %v479_v49  ;;  %v4433_v49 = vld [vmem:[%s8202_s22 + $0x360] sm:$0xff] }
  0xc3   :  { %4677 = vmatprep.subr.mxu1 %v494_v52 }
  0xc4   :  { %4678 = vmatpush3.msra.mxu1 %v478_v53  ;;  %v4416_v53 = vld [vmem:[%s8202_s22 + $0x2d8] sm:$0xff] }
  0xc5   :  { %4735 = vmatprep.subr.mxu1 %v4420_v58  ;;  %v4400_v58 = vld [vmem:[%s8202_s22 + $0x258] sm:$0xff] }
 0x165   :  { %v447_v62 = vpop.f32.mrf.mxu1 }
 0x166   :  { %v448_v2 = vadd.f32 %v447_v62, %v345_v63  ;;  %v4415_v62 = vld [vmem:[%s8202_s22 + $0x2d0] sm:$0xff] }
 0x167   :  { %v449_v1 = vpop.f32.mrf.mxu1 }
 0x168   :  { %v450_v4 = vadd.f32 %v449_v1, %v345_v63  ;;  %v6514_v12 = vmax.f32 %v448_v2, 0.0  ;;  %v4447_v63 = vld [vmem:[%s8202_s22 + $0x3d0] sm:$0xff] }
 0x169   :  { %v453_v8 = vpop.f32.mrf.mxu1 }
 0x16a   :  { %v6512_v10 = vmax.f32 %v450_v4, 0.0  ;;  %v454_v13 = vadd.f32 %v453_v8, %v350_v7  ;;  %v4399_v4 = vld [vmem:[%s8202_s22 + $0x250] sm:$0xff]  ;;  %v4414_v8 = vld [vmem:[%s8202_s22 + $0x2c8] sm:$0xff] }
 0x16b   :  { %v455_v15 = vpop.f32.mrf.mxu1 }
 0x16c   :  { %v456_v20 = vadd.f32 %v455_v15, %v350_v7  ;;  %574 = vmatprep.mubr.f32.mxu1 %v6512_v10  ;;  %692 = vmatprep.mubr.f32.mxu0 %v6512_v10  ;;  %v6540_v31 = vmax.f32 %v454_v13, 0.0  ;;  %v4431_v7 = vld [vmem:[%s8202_s22 + $0x350] sm:$0xff]  ;;  %v4446_v13 = vld [vmem:[%s8202_s22 + $0x3c8] sm:$0xff] }
 0x16d   :  { %v459_v22 = vpop.f32.mrf.mxu1  ;;  %575 = vmatmul.mubr.f32.vlgmr.msra.gmra.mxu1 %v6514_v12  ;;  %693 = vmatmul.mubr.f32.vlgmr.msra.gmra.mxu0 %v6514_v12 }
 0x16e   :  { %v6538_v26 = vmax.f32 %v456_v20, 0.0  ;;  %4736 = vmatpush3.msra.mxu1 %v4404_v16  ;;  %4780 = vmatpush3.msra.mxu0 %v4436_v17  ;;  %v460_v38 = vadd.f32 %v459_v22, %v355_v28  ;;  %v4398_v16 = vld [vmem:[%s8202_s22 + $0x248] sm:$0xff]  ;;  %v4413_v20 = vld [vmem:[%s8202_s22 + $0x2c0] sm:$0xff] }
 0x16f   :  { %4737 = vmatprep.subr.mxu1 %v4419_v21  ;;  %4781 = vmatprep.subr.mxu0 %v4451_v56  ;;  %v461_v32 = vpop.f32.mrf.mxu1  ;;  %v4430_v17 = vld [vmem:[%s8202_s22 + $0x348] sm:$0xff]  ;;  %v4445_v21 = vld [vmem:[%s8202_s22 + $0x3c0] sm:$0xff] }
 0x170   :  { %v462_v35 = vadd.f32 %v461_v32, %v355_v28  ;;  %4738 = vmatpush3.msra.mxu1 %v4403_v23  ;;  %4782 = vmatpush3.msra.mxu0 %v4435_v25  ;;  %v6572_v51 = vmax.f32 %v460_v38, 0.0  ;;  %v4397_v56 = vld [vmem:[%s8202_s22 + $0x240] sm:$0xff]  ;;  %v4412_v23 = vld [vmem:[%s8202_s22 + $0x2b8] sm:$0xff]  ;;  %v4410_v38 = vld [vmem:[%s8202_s22 + $0x2a8] sm:$0xff] }
 0x171   :  { %579 = vmatprep.mubr.f32.mxu1 %v6538_v26  ;;  %697 = vmatprep.mubr.f32.mxu0 %v6538_v26  ;;  %v465_v39 = vpop.f32.mrf.mxu1  ;;  %v4429_v22 = vld [vmem:[%s8202_s22 + $0x340] sm:$0xff]  ;;  %v4444_v25 = vld [vmem:[%s8202_s22 + $0x3b8] sm:$0xff] }
 0x172   :  { %4739 = vmatprep.subr.mxu1 %v4418_v33  ;;  %4783 = vmatprep.subr.mxu0 %v4450_v34  ;;  %v6562_v43 = vmax.f32 %v462_v35, 0.0  ;;  %v466_v2 = vadd.f32 %v465_v39, %v360_v50  ;;  %v4396_v28 = vld [vmem:[%s8202_s22 + $0x238] sm:$0xff]  ;;  %v4411_v33 = vld [vmem:[%s8202_s22 + $0x2b0] sm:$0xff]  ;;  %v4442_v39 = vld [vmem:[%s8202_s22 + $0x3a8] sm:$0xff] }
 0x173   :  { %580 = vmatmul.mubr.f32.gmra.mxu1 %v6540_v31  ;;  %698 = vmatmul.mubr.f32.gmra.mxu0 %v6540_v31  ;;  %v467_v44 = vpop.f32.mrf.mxu1  ;;  %v4428_v32 = vld [vmem:[%s8202_s22 + $0x338] sm:$0xff]  ;;  %v4443_v34 = vld [vmem:[%s8202_s22 + $0x3b0] sm:$0xff] }
 0x174   :  { %4740 = vmatpush3.msra.mxu1 %v4402_v40  ;;  %4784 = vmatpush3.msra.mxu0 %v4434_v41  ;;  %v468_v52 = vadd.f32 %v467_v44, %v360_v50  ;;  %v6610_v15 = vmax.f32 %v466_v2, 0.0  ;;  %v4427_v35 = vld [vmem:[%s8202_s22 + $0x330] sm:$0xff]  ;;  %v4394_v40 = vld [vmem:[%s8202_s22 + $0x228] sm:$0xff]  ;;  %v4393_v44 = vld [vmem:[%s8202_s22 + $0x220] sm:$0xff] }
 0x175   :  { %4741 = vmatprep.subr.mxu1 %v4417_v57  ;;  %4785 = vmatprep.subr.mxu0 %v4449_v42  ;;  %v4426_v41 = vld [vmem:[%s8202_s22 + $0x328] sm:$0xff]  ;;  %v4409_v57 = vld [vmem:[%s8202_s22 + $0x2a0] sm:$0xff]  ;;  %v4440_v50 = vld [vmem:[%s8202_s22 + $0x398] sm:$0xff] }
 0x176   :  { %4742 = vmatpush3.msra.mxu1 %v4401_v47  ;;  %4786 = vmatpush3.msra.mxu0 %v4433_v49  ;;  %v6594_v1 = vmax.f32 %v468_v52, 0.0  ;;  %v4441_v42 = vld [vmem:[%s8202_s22 + $0x3a0] sm:$0xff]  ;;  %v4408_v49 = vld [vmem:[%s8202_s22 + $0x298] sm:$0xff]  ;;  %v4438_v2 = vld [vmem:[%s8202_s22 + $0x388] sm:$0xff] }
 0x177   :  { %584 = vmatprep.mubr.f32.mxu1 %v6562_v43  ;;  %702 = vmatprep.mubr.f32.mxu0 %v6562_v43  ;;  %v4425_v47 = vld [vmem:[%s8202_s22 + $0x320] sm:$0xff]  ;;  %v4392_v52 = vld [vmem:[%s8202_s22 + $0x218] sm:$0xff] }
 0x178   :  { %4743 = vmatprep.subr.mxu1 %v4416_v53  ;;  %4787 = vmatprep.subr.mxu0 %v4448_v55  ;;  %v4424_v53 = vld [vmem:[%s8202_s22 + $0x318] sm:$0xff]  ;;  %v4407_v55 = vld [vmem:[%s8202_s22 + $0x290] sm:$0xff] }
 0x179   :  { %585 = vmatmul.mubr.f32.gmra.mxu1 %v6572_v51  ;;  %703 = vmatmul.mubr.f32.gmra.mxu0 %v6572_v51 }
 0x17a   :  { %4744 = vmatpush3.msra.mxu1 %v4400_v58  ;;  %4788 = vmatpush3.msra.mxu0 %v4432_v61  ;;  %v4439_v58 = vld [vmem:[%s8202_s22 + $0x390] sm:$0xff] }
 0x17b   :  { %4745 = vmatprep.subr.mxu1 %v4415_v62  ;;  %4789 = vmatprep.subr.mxu0 %v4447_v63  ;;  %v4391_v61 = vld [vmem:[%s8202_s22 + $0x210] sm:$0xff]  ;;  %v4406_v63 = vld [vmem:[%s8202_s22 + $0x288] sm:$0xff] }
 0x17c   :  { %4746 = vmatpush3.msra.mxu1 %v4399_v4  ;;  %4790 = vmatpush3.msra.mxu0 %v4431_v7  ;;  %v4423_v62 = vld [vmem:[%s8202_s22 + $0x310] sm:$0xff]  ;;  %v4390_v4 = vld [vmem:[%s8202_s22 + $0x208] sm:$0xff] }
 0x17d   :  { %589 = vmatprep.mubr.f32.mxu1 %v6594_v1  ;;  %707 = vmatprep.mubr.f32.mxu0 %v6594_v1  ;;  %v4422_v7 = vld [vmem:[%s8202_s22 + $0x308] sm:$0xff] }
 0x17e   :  { %4747 = vmatprep.subr.mxu1 %v4414_v8  ;;  %4791 = vmatprep.subr.mxu0 %v4446_v13  ;;  %v4405_v8 = vld [vmem:[%s8202_s22 + $0x280] sm:$0xff] }
 0x17f   :  { %590 = vmatmul.mubr.f32.gmra.mxu1 %v6610_v15  ;;  %708 = vmatmul.mubr.f32.gmra.mxu0 %v6610_v15  ;;  %v4437_v13 = vld [vmem:[%s8202_s22 + $0x380] sm:$0xff] }
 0x180   :  { %4748 = vmatpush3.msra.mxu1 %v4398_v16  ;;  %4792 = vmatpush3.msra.mxu0 %v4430_v17  ;;  %v4389_v16 = vld [vmem:[%s8202_s22 + $0x200] sm:$0xff] }
 0x181   :  { %4749 = vmatprep.subr.mxu1 %v4413_v20  ;;  %810 = vmatprep.mubr.f32.mxu1 %v6512_v10  ;;  %v4421_v17 = vld [vmem:[%s8202_s22 + $0x300] sm:$0xff] }
 0x182   :  { %4793 = vmatprep.subr.mxu0 %v4445_v21  ;;  %928 = vmatprep.mubr.f32.mxu0 %v6512_v10  ;;  %v4395_v10 = vld [vmem:[%s8202_s22 + $0x230] sm:$0xff] }
 0x183   :  { %4750 = vmatpush3.msra.mxu1 %v4397_v56  ;;  %4794 = vmatpush3.msra.mxu0 %v4429_v22 }
 0x184   :  { %4751 = vmatprep.subr.mxu1 %v4412_v23  ;;  %4795 = vmatprep.subr.mxu0 %v4444_v25 }
 0x185   :  { %4752 = vmatpush3.msra.mxu1 %v4396_v28  ;;  %4796 = vmatpush3.msra.mxu0 %v4428_v32 }
 0x186   :  { %4753 = vmatprep.subr.mxu1 %v4411_v33  ;;  %4797 = vmatprep.subr.mxu0 %v4443_v34 }
 0x187   :  { %4754 = vmatpush3.msra.mxu1 %v4395_v10  ;;  %4798 = vmatpush3.msra.mxu0 %v4427_v35 }
 0x188   :  { %4755 = vmatprep.subr.mxu1 %v4410_v38  ;;  %4799 = vmatprep.subr.mxu0 %v4442_v39 }
 0x189   :  { %4756 = vmatpush3.msra.mxu1 %v4394_v40  ;;  %4800 = vmatpush3.msra.mxu0 %v4426_v41 }
 0x18a   :  { %4757 = vmatprep.subr.mxu1 %v4409_v57  ;;  %4801 = vmatprep.subr.mxu0 %v4441_v42 }
 0x18b   :  { %4758 = vmatpush3.msra.mxu1 %v4393_v44  ;;  %4802 = vmatpush3.msra.mxu0 %v4425_v47 }
 0x18c   :  { %4759 = vmatprep.subr.mxu1 %v4408_v49  ;;  %4803 = vmatprep.subr.mxu0 %v4440_v50 }
 0x18d   :  { %4760 = vmatpush3.msra.mxu1 %v4392_v52  ;;  %4804 = vmatpush3.msra.mxu0 %v4424_v53 }
 0x18e   :  { %4761 = vmatprep.subr.mxu1 %v4407_v55  ;;  %4805 = vmatprep.subr.mxu0 %v4439_v58 }
 0x18f   :  { %4762 = vmatpush3.msra.mxu1 %v4391_v61  ;;  %4806 = vmatpush3.msra.mxu0 %v4423_v62 }
 0x190   :  { %4763 = vmatprep.subr.mxu1 %v4406_v63  ;;  %4807 = vmatprep.subr.mxu0 %v4438_v2 }
 0x191   :  { %4764 = vmatpush3.msra.mxu1 %v4390_v4  ;;  %4808 = vmatpush3.msra.mxu0 %v4422_v7 }
 0x192   :  { %4765 = vmatprep.subr.mxu1 %v4405_v8  ;;  %4809 = vmatprep.subr.mxu0 %v4437_v13 }
 0x193   :  { %4766 = vmatpush3.msra.mxu1 %v4389_v16  ;;  %4810 = vmatpush3.msra.mxu0 %v4421_v17 }
 0x194   :  { %811 = vmatmul.mubr.f32.vlgmr.msra.gmra.mxu1 %v6514_v12  ;;  %929 = vmatmul.mubr.f32.vlgmr.msra.gmra.mxu0 %v6514_v12  ;;  %v949_v12 = vld [vmem:[%s8159_s5] sm:$0xff] }
 0x195   :  { %815 = vmatprep.mubr.f32.mxu1 %v6538_v26  ;;  %933 = vmatprep.mubr.f32.mxu0 %v6538_v26  ;;  %v4464_v26 = vld [vmem:[%s8160_s7 + $0x78] sm:$0xff] }
 0x196   :  { %5297 = vmatprep.subr.mxu0 %v4464_v26 }
 0x197   :  { %5298 = vmatpush3.msra.mxu0 %v4464_v26 }
 0x198   :  { %816 = vmatmul.mubr.f32.gmra.mxu1 %v6540_v31  ;;  %934 = vmatmul.mubr.f32.gmra.mxu0 %v6540_v31  ;;  %v4463_v31 = vld [vmem:[%s8160_s7 + $0x70] sm:$0xff] }
 0x199   :  { %820 = vmatprep.mubr.f32.mxu1 %v6562_v43  ;;  %938 = vmatprep.mubr.f32.mxu0 %v6562_v43  ;;  %v4462_v43 = vld [vmem:[%s8160_s7 + $0x68] sm:$0xff] }
 0x19a   :  { %5299 = vmatprep.subr.mxu0 %v4463_v31 }
 0x19b   :  { %5300 = vmatpush3.msra.mxu0 %v4463_v31 }
 0x19c   :  { %821 = vmatmul.mubr.f32.gmra.mxu1 %v6572_v51  ;;  %939 = vmatmul.mubr.f32.gmra.mxu0 %v6572_v51  ;;  %v4461_v51 = vld [vmem:[%s8160_s7 + $0x60] sm:$0xff] }
 0x19d   :  { %825 = vmatprep.mubr.f32.mxu1 %v6594_v1  ;;  %943 = vmatprep.mubr.f32.mxu0 %v6594_v1  ;;  %v4460_v1 = vld [vmem:[%s8160_s7 + $0x58] sm:$0xff] }
 0x19e   :  { %5301 = vmatprep.subr.mxu0 %v4462_v43 }
 0x19f   :  { %5302 = vmatpush3.msra.mxu0 %v4462_v43 }
 0x1a0   :  { %826 = vmatmul.mubr.f32.gmra.mxu1 %v6610_v15  ;;  %944 = vmatmul.mubr.f32.gmra.mxu0 %v6610_v15 }
 0x1a1   :  { %5269 = vmatprep.mubr.f32.mxu1 %v949_v12  ;;  %5303 = vmatprep.subr.mxu0 %v4461_v51 }
 0x1a2   :  { %5304 = vmatpush3.msra.mxu0 %v4461_v51 }
 0x1a3   :  { %5305 = vmatprep.subr.mxu0 %v4460_v1 }
 0x1a4   :  { %5306 = vmatpush3.msra.mxu0 %v4460_v1 }
 0x22d   :  { %v6764_v15 = vpop.f32.mrf.mxu1  ;;  %v4723_v20 = vpop.f32.mrf.mxu0 }
 0x22f   :  { %v6766_v21 = vpop.f32.mrf.mxu1  ;;  %v4724_v56 = vpop.f32.mrf.mxu0 }
 0x233   :  { %v6768_v22 = vpop.f32.mrf.mxu1  ;;  %v4726_v23 = vpop.f32.mrf.mxu0 }
 0x235   :  { %v6770_v25 = vpop.f32.mrf.mxu1  ;;  %v4727_v28 = vpop.f32.mrf.mxu0 }
 0x236   :  { %v4728_v1 = vadd.f32 %v4727_v28, %v4726_v23  ;;  %v1071_v23 = vld [vmem:[%s8160_s7 + $0x28] sm:$0xff]  ;;  %v1069_v28 = vld [vmem:[%s8160_s7 + $0x18] sm:$0xff] }
 0x239   :  { %v4685_v32 = vpop.f32.mrf.mxu1  ;;  %v4729_v33 = vpop.f32.mrf.mxu0 }
 0x23b   :  { %v4686_v34 = vpop.f32.mrf.mxu1  ;;  %v4730_v10 = vpop.f32.mrf.mxu0 }
 0x23c   :  { %v4731_v51 = vadd.f32 %v4730_v10, %v4729_v33  ;;  %v4681_v33 = vadd.f32 %v6766_v21, %v6764_v15  ;;  %v1072_v15 = vld [vmem:[%s8160_s7 + $0x30] sm:$0xff]  ;;  %v952_v21 = vld [vmem:[%s8159_s5 + $0x18] sm:$0xff]  ;;  %v1067_v10 = vld [vmem:[%s8160_s7 + $0x8] sm:$0xff] }
 0x23f   :  { %v4688_v35 = vpop.f32.mrf.mxu1  ;;  %v4732_v38 = vpop.f32.mrf.mxu0 }
 0x241   :  { %v4689_v39 = vpop.f32.mrf.mxu1  ;;  %v4733_v40 = vpop.f32.mrf.mxu0 }
 0x242   :  { %v4734_v43 = vadd.f32 %v4733_v40, %v4732_v38  ;;  %v4684_v38 = vadd.f32 %v6770_v25, %v6768_v22  ;;  %v951_v22 = vld [vmem:[%s8159_s5 + $0x10] sm:$0xff]  ;;  %v1070_v25 = vld [vmem:[%s8160_s7 + $0x20] sm:$0xff] }
 0x243   :  { %v4457_v40 = vld [vmem:[%s8160_s7 + $0x40] sm:$0xff] }
 0x254   :  { %v4767_v41 = vpop.f32.mrf.mxu1  ;;  %v4811_v57 = vpop.f32.mrf.mxu0 }
 0x256   :  { %v4768_v42 = vpop.f32.mrf.mxu1  ;;  %v4812_v44 = vpop.f32.mrf.mxu0 }
 0x257   :  { %v4813_v16 = vadd.f32 %v4812_v44, %v4811_v57  ;;  %v4769_v31 = vadd.f32 %v4768_v42, %v4767_v41  ;;  %v4725_v57 = vadd.f32 %v4724_v56, %v4723_v20  ;;  %v4690_v44 = vadd.f32 %v4689_v39, %v4688_v35  ;;  %v950_v20 = vld [vmem:[%s8159_s5 + $0x8] sm:$0xff]  ;;  %v1073_v56 = vld [vmem:[%s8160_s7 + $0x38] sm:$0xff]  ;;  %v1066_v39 = vld [vmem:[%s8160_s7] sm:$0xff] }
 0x258   :  { %v4770_v47 = vpop.f32.mrf.mxu1  ;;  %v4814_v49 = vpop.f32.mrf.mxu0  ;;  %v4458_v35 = vld [vmem:[%s8160_s7 + $0x48] sm:$0xff]  ;;  %v4476_v41 = vld [vmem:[%s8160_s7 + $0xb8] sm:$0xff] }
 0x259   :  { %v4488_v42 = vld [vmem:[%s8160_s7 + $0xf8] sm:$0xff] }
 0x25a   :  { %v4771_v50 = vpop.f32.mrf.mxu1  ;;  %v4815_v52 = vpop.f32.mrf.mxu0 }
 0x25b   :  { %v4816_v8 = vadd.f32 %v4815_v52, %v4814_v49  ;;  %v4772_v26 = vadd.f32 %v4771_v50, %v4770_v47  ;;  %v4687_v47 = vadd.f32 %v4686_v34, %v4685_v32  ;;  %v1068_v32 = vld [vmem:[%s8160_s7 + $0x10] sm:$0xff]  ;;  %v960_v49 = vpop.permute.xlu1 %959  ;;  %v965_v52 = vpop.permute.xlu0 %964 }
 0x25c   :  { %v4773_v53 = vpop.f32.mrf.mxu1  ;;  %v4817_v55 = vpop.f32.mrf.mxu0  ;;  %v4459_v34 = vld [vmem:[%s8160_s7 + $0x50] sm:$0xff] }
 0x25d   :  { %5307 = vmatprep.subr.mxu0 %v4459_v34 }
 0x25e   :  { %v4818_v58 = vpop.f32.mrf.mxu0  ;;  %v4774_v61 = vpop.f32.mrf.mxu1  ;;  %5308 = vmatpush3.msra.mxu0 %v4459_v34  ;;  %v4497_v34 = vld [vmem:[%s8160_s7 + $0x120] sm:$0xff] }
 0x25f   :  { %v4819_v7 = vadd.f32 %v4818_v58, %v4817_v55  ;;  %v4775_v12 = vadd.f32 %v4774_v61, %v4773_v53  ;;  %5309 = vmatprep.subr.mxu0 %v4458_v35 }
 0x260   :  { %v4820_v62 = vpop.f32.mrf.mxu0  ;;  %v4776_v4 = vpop.f32.mrf.mxu1  ;;  %5310 = vmatpush3.msra.mxu0 %v4458_v35  ;;  %v4496_v35 = vld [vmem:[%s8160_s7 + $0x118] sm:$0xff] }
 0x261   :  { %5311 = vmatprep.subr.mxu0 %v4457_v40 }
 0x262   :  { %v4821_v63 = vpop.f32.mrf.mxu0  ;;  %v4777_v13 = vpop.f32.mrf.mxu1  ;;  %5312 = vmatpush3.msra.mxu0 %v4457_v40  ;;  %v4495_v40 = vld [vmem:[%s8160_s7 + $0x110] sm:$0xff] }
 0x263   :  { %v4822_v2 = vadd.f32 %v4821_v63, %v4820_v62  ;;  %v4778_v17 = vadd.f32 %v4777_v13, %v4776_v4  ;;  %5341 = vmatprep.subr.mxu0 %v4488_v42  ;;  %v970_v63 = vpop.permute.xlu1 %969  ;;  %v4475_v13 = vld [vmem:[%s8160_s7 + $0xb0] sm:$0xff] }
 0x265   :  { %5237 = vmatprep.subr.mxu1 %v4822_v2 }
 0x266   :  { %5238 = vmatpush3.msra.mxu1 %v4822_v2 }
 0x267   :  { %5239 = vmatprep.subr.mxu1 %v4819_v7 }
 0x268   :  { %5240 = vmatpush3.msra.mxu1 %v4819_v7  ;;  %v975_v7 = vpop.permute.xlu0 %974 }
 0x269   :  { %5241 = vmatprep.subr.mxu1 %v4816_v8 }
 0x26a   :  { %5242 = vmatpush3.msra.mxu1 %v4816_v8 }
 0x26b   :  { %5243 = vmatprep.subr.mxu1 %v4813_v16 }
 0x26c   :  { %5244 = vmatpush3.msra.mxu1 %v4813_v16  ;;  %v4487_v16 = vld [vmem:[%s8160_s7 + $0xf0] sm:$0xff] }
 0x26d   :  { %5245 = vmatprep.subr.mxu1 %v4778_v17 }
 0x26e   :  { %5246 = vmatpush3.msra.mxu1 %v4778_v17 }
 0x26f   :  { %5247 = vmatprep.subr.mxu1 %v4775_v12 }
 0x270   :  { %5248 = vmatpush3.msra.mxu1 %v4775_v12 }
 0x271   :  { %5249 = vmatprep.subr.mxu1 %v4772_v26 }
 0x272   :  { %5250 = vmatpush3.msra.mxu1 %v4772_v26  ;;  %v4474_v26 = vld [vmem:[%s8160_s7 + $0xa8] sm:$0xff] }
 0x273   :  { %5251 = vmatprep.subr.mxu1 %v4769_v31 }
 0x274   :  { %5252 = vmatpush3.msra.mxu1 %v4769_v31  ;;  %v4486_v31 = vld [vmem:[%s8160_s7 + $0xe8] sm:$0xff] }
 0x275   :  { %5253 = vmatprep.subr.mxu1 %v4734_v43 }
 0x276   :  { %5254 = vmatpush3.msra.mxu1 %v4734_v43 }
 0x277   :  { %5255 = vmatprep.subr.mxu1 %v4731_v51 }
 0x278   :  { %5256 = vmatpush3.msra.mxu1 %v4731_v51  ;;  %v4473_v51 = vld [vmem:[%s8160_s7 + $0xa0] sm:$0xff] }
 0x279   :  { %5257 = vmatprep.subr.mxu1 %v4728_v1 }
 0x27a   :  { %5258 = vmatpush3.msra.mxu1 %v4728_v1  ;;  %v4485_v1 = vld [vmem:[%s8160_s7 + $0xe0] sm:$0xff] }
 0x27b   :  { %5259 = vmatprep.subr.mxu1 %v4725_v57 }
 0x27c   :  { %5260 = vmatpush3.msra.mxu1 %v4725_v57  ;;  %v4472_v57 = vld [vmem:[%s8160_s7 + $0x98] sm:$0xff] }
 0x27d   :  { %5261 = vmatprep.subr.mxu1 %v4690_v44 }
 0x27e   :  { %5262 = vmatpush3.msra.mxu1 %v4690_v44  ;;  %v4484_v44 = vld [vmem:[%s8160_s7 + $0xd8] sm:$0xff] }
 0x27f   :  { %5263 = vmatprep.subr.mxu1 %v4687_v47 }
 0x280   :  { %5264 = vmatpush3.msra.mxu1 %v4687_v47  ;;  %v4471_v47 = vld [vmem:[%s8160_s7 + $0x90] sm:$0xff] }
 0x281   :  { %5265 = vmatprep.subr.mxu1 %v4684_v38 }
 0x282   :  { %5266 = vmatpush3.msra.mxu1 %v4684_v38  ;;  %v4483_v38 = vld [vmem:[%s8160_s7 + $0xd0] sm:$0xff] }
 0x283   :  { %5267 = vmatprep.subr.mxu1 %v4681_v33 }
 0x284   :  { %5268 = vmatpush3.msra.mxu1 %v4681_v33  ;;  %v4470_v33 = vld [vmem:[%s8160_s7 + $0x88] sm:$0xff] }
 0x285   :  { %5270 = vmatmul.mubr.f32.vlgmr.msra.gmra.mxu1 %v950_v20  ;;  %5275 = vmatprep.subr.mxu1 %v1073_v56  ;;  %v4482_v20 = vld [vmem:[%s8160_s7 + $0xc8] sm:$0xff] }
 0x286   :  { %5272 = vmatprep.mubr.f32.mxu1 %v951_v22  ;;  %5276 = vmatpush3.msra.mxu1 %v1073_v56  ;;  %v4469_v56 = vld [vmem:[%s8160_s7 + $0x80] sm:$0xff] }
 0x287   :  { %5277 = vmatprep.subr.mxu1 %v1072_v15  ;;  %v4481_v22 = vld [vmem:[%s8160_s7 + $0xc0] sm:$0xff] }
 0x288   :  { %5278 = vmatpush3.msra.mxu1 %v1072_v15  ;;  %v4500_v15 = vld [vmem:[%s8160_s7 + $0x138] sm:$0xff] }
 0x289   :  { %5273 = vmatmul.mubr.f32.gmra.mxu1 %v952_v21  ;;  %5279 = vmatprep.subr.mxu1 %v1071_v23  ;;  %v4512_v21 = vld [vmem:[%s8160_s7 + $0x178] sm:$0xff] }
 0x28a   :  { %5280 = vmatpush3.msra.mxu1 %v1071_v23  ;;  %v4499_v23 = vld [vmem:[%s8160_s7 + $0x130] sm:$0xff] }
 0x28b   :  { %5281 = vmatprep.subr.mxu1 %v1070_v25 }
 0x28c   :  { %5282 = vmatpush3.msra.mxu1 %v1070_v25  ;;  %v4511_v25 = vld [vmem:[%s8160_s7 + $0x170] sm:$0xff] }
 0x28d   :  { %5283 = vmatprep.subr.mxu1 %v1069_v28 }
 0x28e   :  { %5284 = vmatpush3.msra.mxu1 %v1069_v28  ;;  %v4498_v28 = vld [vmem:[%s8160_s7 + $0x128] sm:$0xff] }
 0x28f   :  { %5285 = vmatprep.subr.mxu1 %v1068_v32 }
 0x290   :  { %5286 = vmatpush3.msra.mxu1 %v1068_v32  ;;  %v4510_v32 = vld [vmem:[%s8160_s7 + $0x168] sm:$0xff] }
 0x291   :  { %5287 = vmatprep.subr.mxu1 %v1067_v10 }
 0x292   :  { %5288 = vmatpush3.msra.mxu1 %v1067_v10  ;;  %v4509_v10 = vld [vmem:[%s8160_s7 + $0x160] sm:$0xff] }
 0x293   :  { %5289 = vmatprep.subr.mxu1 %v1066_v39 }
 0x294   :  { %5290 = vmatpush3.msra.mxu1 %v1066_v39  ;;  %v4508_v39 = vld [vmem:[%s8160_s7 + $0x158] sm:$0xff] }
 0x295   :  { %5319 = vmatprep.subr.mxu1 %v4476_v41 }
 0x345   :  { %v5271_v50 = vpop.f32.mrf.mxu1 }
 0x346   :  { %v1049_v53 = vadd.f32 %v5271_v50, %v965_v52  ;;  %v4493_v50 = vld [vmem:[%s8160_s7 + $0x100] sm:$0xff] }
 0x347   :  { %v1043_v55 = vpop.f32.mrf.mxu1  ;;  %v4505_v52 = vld [vmem:[%s8160_s7 + $0x140] sm:$0xff] }
 0x348   :  { %v1044_v58 = vadd.f32 %v1043_v55, %v960_v49  ;;  %v6826_v2 = vmax.f32 %v1049_v53, 0.0  ;;  %v4506_v49 = vld [vmem:[%s8160_s7 + $0x148] sm:$0xff]  ;;  %v4524_v53 = vld [vmem:[%s8160_s7 + $0x1b8] sm:$0xff] }
 0x349   :  { %v5274_v61 = vpop.f32.mrf.mxu1  ;;  %v4536_v55 = vld [vmem:[%s8160_s7 + $0x1f8] sm:$0xff] }
 0x34a   :  { %v6824_v62 = vmax.f32 %v1044_v58, 0.0  ;;  %v1059_v17 = vadd.f32 %v5274_v61, %v975_v7  ;;  %v4523_v58 = vld [vmem:[%s8160_s7 + $0x1b0] sm:$0xff]  ;;  %v4521_v7 = vld [vmem:[%s8160_s7 + $0x1a0] sm:$0xff] }
 0x34b   :  { %v1053_v4 = vpop.f32.mrf.mxu1  ;;  %v4535_v61 = vld [vmem:[%s8160_s7 + $0x1f0] sm:$0xff] }
 0x34c   :  { %v1054_v8 = vadd.f32 %v1053_v4, %v970_v63  ;;  %5291 = vmatprep.mubr.msk.f32.mxu1 %vm1074_vm12, %v6824_v62  ;;  %5313 = vmatprep.mubr.msk.f32.mxu0 %vm1074_vm12, %v6824_v62  ;;  %v6850_v43 = vmax.f32 %v1059_v17, 0.0  ;;  %v4522_v63 = vld [vmem:[%s8160_s7 + $0x1a8] sm:$0xff]  ;;  %v4519_v17 = vld [vmem:[%s8160_s7 + $0x190] sm:$0xff] }
 0x34d   :  { %5292 = vmatmul.mubr.msk.f32.vlgmr.msra.gmra.mxu1 %vm1074_vm12, %v6826_v2  ;;  %5314 = vmatmul.mubr.msk.f32.vlgmr.msra.gmra.mxu0 %vm1074_vm12, %v6826_v2  ;;  %v4534_v4 = vld [vmem:[%s8160_s7 + $0x1e8] sm:$0xff] }
 0x34e   :  { %v6842_v12 = vmax.f32 %v1054_v8, 0.0  ;;  %5320 = vmatpush3.msra.mxu1 %v4476_v41  ;;  %5342 = vmatpush3.msra.mxu0 %v4488_v42  ;;  %v4507_v41 = vld [vmem:[%s8160_s7 + $0x150] sm:$0xff]  ;;  %v4494_v42 = vld [vmem:[%s8160_s7 + $0x108] sm:$0xff]  ;;  %v4533_v8 = vld [vmem:[%s8160_s7 + $0x1e0] sm:$0xff] }
 0x34f   :  { %5321 = vmatprep.subr.mxu1 %v4475_v13  ;;  %5343 = vmatprep.subr.mxu0 %v4487_v16 }
 0x350   :  { %5322 = vmatpush3.msra.mxu1 %v4475_v13  ;;  %5344 = vmatpush3.msra.mxu0 %v4487_v16  ;;  %v4520_v13 = vld [vmem:[%s8160_s7 + $0x198] sm:$0xff] }
 0x351   :  { %5294 = vmatprep.mubr.msk.f32.mxu1 %vm1074_vm12, %v6842_v12  ;;  %5316 = vmatprep.mubr.msk.f32.mxu0 %vm1074_vm12, %v6842_v12  ;;  %v4532_v16 = vld [vmem:[%s8160_s7 + $0x1d8] sm:$0xff] }
 0x352   :  { %5323 = vmatprep.subr.mxu1 %v4474_v26  ;;  %5345 = vmatprep.subr.mxu0 %v4486_v31 }
 0x353   :  { %5295 = vmatmul.mubr.msk.f32.gmra.mxu1 %vm1074_vm12, %v6850_v43  ;;  %5317 = vmatmul.mubr.msk.f32.gmra.mxu0 %vm1074_vm12, %v6850_v43 }
 0x354   :  { %5324 = vmatpush3.msra.mxu1 %v4474_v26  ;;  %5346 = vmatpush3.msra.mxu0 %v4486_v31  ;;  %v4531_v26 = vld [vmem:[%s8160_s7 + $0x1d0] sm:$0xff]  ;;  %v4518_v31 = vld [vmem:[%s8160_s7 + $0x188] sm:$0xff] }
 0x355   :  { %5325 = vmatprep.subr.mxu1 %v4473_v51  ;;  %5335 = vmatprep.mubr.msk.f32.mxu1 %vm1074_vm12, %v6824_v62 }
 0x356   :  { %5347 = vmatprep.subr.mxu0 %v4485_v1  ;;  %5357 = vmatprep.mubr.msk.f32.mxu0 %vm1074_vm12, %v6824_v62 }
 0x357   :  { %5326 = vmatpush3.msra.mxu1 %v4473_v51  ;;  %5348 = vmatpush3.msra.mxu0 %v4485_v1  ;;  %v4530_v51 = vld [vmem:[%s8160_s7 + $0x1c8] sm:$0xff]  ;;  %v4517_v1 = vld [vmem:[%s8160_s7 + $0x180] sm:$0xff] }
 0x358   :  { %5327 = vmatprep.subr.mxu1 %v4472_v57  ;;  %5349 = vmatprep.subr.mxu0 %v4484_v44 }
 0x359   :  { %5328 = vmatpush3.msra.mxu1 %v4472_v57  ;;  %5350 = vmatpush3.msra.mxu0 %v4484_v44  ;;  %v4529_v57 = vld [vmem:[%s8160_s7 + $0x1c0] sm:$0xff]  ;;  %v4548_v44 = vld [vmem:[%s8160_s7 + $0x238] sm:$0xff] }
 0x35a   :  { %5329 = vmatprep.subr.mxu1 %v4471_v47  ;;  %5351 = vmatprep.subr.mxu0 %v4483_v38 }
 0x35b   :  { %5330 = vmatpush3.msra.mxu1 %v4471_v47  ;;  %5352 = vmatpush3.msra.mxu0 %v4483_v38  ;;  %v4547_v47 = vld [vmem:[%s8160_s7 + $0x230] sm:$0xff]  ;;  %v4546_v38 = vld [vmem:[%s8160_s7 + $0x228] sm:$0xff] }
 0x35c   :  { %5331 = vmatprep.subr.mxu1 %v4470_v33  ;;  %5353 = vmatprep.subr.mxu0 %v4482_v20 }
 0x35d   :  { %5332 = vmatpush3.msra.mxu1 %v4470_v33  ;;  %5354 = vmatpush3.msra.mxu0 %v4482_v20  ;;  %v4545_v33 = vld [vmem:[%s8160_s7 + $0x220] sm:$0xff]  ;;  %v4544_v20 = vld [vmem:[%s8160_s7 + $0x218] sm:$0xff] }
 0x35e   :  { %5333 = vmatprep.subr.mxu1 %v4469_v56  ;;  %5355 = vmatprep.subr.mxu0 %v4481_v22 }
 0x35f   :  { %5334 = vmatpush3.msra.mxu1 %v4469_v56  ;;  %5356 = vmatpush3.msra.mxu0 %v4481_v22  ;;  %v4543_v56 = vld [vmem:[%s8160_s7 + $0x210] sm:$0xff]  ;;  %v4542_v22 = vld [vmem:[%s8160_s7 + $0x208] sm:$0xff] }
 0x360   :  { %5336 = vmatmul.mubr.msk.f32.vlgmr.msra.gmra.mxu1 %vm1074_vm12, %v6826_v2  ;;  %5358 = vmatmul.mubr.msk.f32.vlgmr.msra.gmra.mxu0 %vm1074_vm12, %v6826_v2 }
 0x361   :  { %5363 = vmatprep.subr.mxu1 %v4500_v15  ;;  %5385 = vmatprep.subr.mxu0 %v4512_v21 }
 0x362   :  { %5338 = vmatprep.mubr.msk.f32.mxu1 %vm1074_vm12, %v6842_v12  ;;  %5360 = vmatprep.mubr.msk.f32.mxu0 %vm1074_vm12, %v6842_v12 }
 0x363   :  { %5364 = vmatpush3.msra.mxu1 %v4500_v15  ;;  %5386 = vmatpush3.msra.mxu0 %v4512_v21  ;;  %v1925_v15 = vld [vmem:[%s8161_s8 + $0x8] sm:$0xff]  ;;  %v1926_v21 = vld [vmem:[%s8161_s8 + $0x10] sm:$0xff] }
 0x364   :  { %5365 = vmatprep.subr.mxu1 %v4499_v23  ;;  %5387 = vmatprep.subr.mxu0 %v4511_v25 }
 0x365   :  { %5366 = vmatpush3.msra.mxu1 %v4499_v23  ;;  %5388 = vmatpush3.msra.mxu0 %v4511_v25 }
 0x366   :  { %5339 = vmatmul.mubr.msk.f32.gmra.mxu1 %vm1074_vm12, %v6850_v43  ;;  %5361 = vmatmul.mubr.msk.f32.gmra.mxu0 %vm1074_vm12, %v6850_v43 }
 0x367   :  { %5367 = vmatprep.subr.mxu1 %v4498_v28  ;;  %5389 = vmatprep.subr.mxu0 %v4510_v32 }
 0x368   :  { %5368 = vmatpush3.msra.mxu1 %v4498_v28  ;;  %5379 = vmatprep.mubr.msk.f32.mxu1 %vm1074_vm12, %v6824_v62 }
 0x369   :  { %5390 = vmatpush3.msra.mxu0 %v4510_v32  ;;  %5401 = vmatprep.mubr.msk.f32.mxu0 %vm1074_vm12, %v6824_v62 }
 0x36a   :  { %5369 = vmatprep.subr.mxu1 %v4497_v34  ;;  %5391 = vmatprep.subr.mxu0 %v4509_v10 }
 0x36b   :  { %5370 = vmatpush3.msra.mxu1 %v4497_v34  ;;  %5392 = vmatpush3.msra.mxu0 %v4509_v10 }
 0x36c   :  { %5371 = vmatprep.subr.mxu1 %v4496_v35  ;;  %5393 = vmatprep.subr.mxu0 %v4508_v39 }
 0x36d   :  { %5372 = vmatpush3.msra.mxu1 %v4496_v35  ;;  %5394 = vmatpush3.msra.mxu0 %v4508_v39 }
 0x36e   :  { %5373 = vmatprep.subr.mxu1 %v4495_v40  ;;  %5395 = vmatprep.subr.mxu0 %v4507_v41 }
 0x36f   :  { %5374 = vmatpush3.msra.mxu1 %v4495_v40  ;;  %5396 = vmatpush3.msra.mxu0 %v4507_v41 }
 0x370   :  { %5375 = vmatprep.subr.mxu1 %v4494_v42  ;;  %5397 = vmatprep.subr.mxu0 %v4506_v49 }
 0x371   :  { %5376 = vmatpush3.msra.mxu1 %v4494_v42  ;;  %5398 = vmatpush3.msra.mxu0 %v4506_v49 }
 0x372   :  { %5377 = vmatprep.subr.mxu1 %v4493_v50  ;;  %5399 = vmatprep.subr.mxu0 %v4505_v52 }
 0x373   :  { %5378 = vmatpush3.msra.mxu1 %v4493_v50  ;;  %5400 = vmatpush3.msra.mxu0 %v4505_v52 }
 0x374   :  { %5380 = vmatmul.mubr.msk.f32.vlgmr.msra.gmra.mxu1 %vm1074_vm12, %v6826_v2  ;;  %5402 = vmatmul.mubr.msk.f32.vlgmr.msra.gmra.mxu0 %vm1074_vm12, %v6826_v2 }
 0x375   :  { %5407 = vmatprep.subr.mxu1 %v4524_v53  ;;  %5429 = vmatprep.subr.mxu0 %v4536_v55 }
 0x376   :  { %5382 = vmatprep.mubr.msk.f32.mxu1 %vm1074_vm12, %v6842_v12  ;;  %5404 = vmatprep.mubr.msk.f32.mxu0 %vm1074_vm12, %v6842_v12 }
 0x377   :  { %5408 = vmatpush3.msra.mxu1 %v4524_v53  ;;  %5430 = vmatpush3.msra.mxu0 %v4536_v55 }
 0x378   :  { %5409 = vmatprep.subr.mxu1 %v4523_v58  ;;  %5431 = vmatprep.subr.mxu0 %v4535_v61 }
 0x379   :  { %5410 = vmatpush3.msra.mxu1 %v4523_v58  ;;  %5432 = vmatpush3.msra.mxu0 %v4535_v61 }
 0x37a   :  { %5383 = vmatmul.mubr.msk.f32.gmra.mxu1 %vm1074_vm12, %v6850_v43  ;;  %5405 = vmatmul.mubr.msk.f32.gmra.mxu0 %vm1074_vm12, %v6850_v43 }
 0x37b   :  { %5411 = vmatprep.subr.mxu1 %v4522_v63  ;;  %5433 = vmatprep.subr.mxu0 %v4534_v4 }
 0x37c   :  { %5412 = vmatpush3.msra.mxu1 %v4522_v63  ;;  %5423 = vmatprep.mubr.msk.f32.mxu1 %vm1074_vm12, %v6824_v62 }
 0x37d   :  { %5434 = vmatpush3.msra.mxu0 %v4534_v4  ;;  %5445 = vmatprep.mubr.msk.f32.mxu0 %vm1074_vm12, %v6824_v62 }
 0x37e   :  { %5413 = vmatprep.subr.mxu1 %v4521_v7  ;;  %5435 = vmatprep.subr.mxu0 %v4533_v8 }
 0x37f   :  { %5414 = vmatpush3.msra.mxu1 %v4521_v7  ;;  %5436 = vmatpush3.msra.mxu0 %v4533_v8 }
 0x380   :  { %5415 = vmatprep.subr.mxu1 %v4520_v13  ;;  %5437 = vmatprep.subr.mxu0 %v4532_v16 }
 0x381   :  { %5416 = vmatpush3.msra.mxu1 %v4520_v13  ;;  %5438 = vmatpush3.msra.mxu0 %v4532_v16 }
 0x382   :  { %5417 = vmatprep.subr.mxu1 %v4519_v17  ;;  %5439 = vmatprep.subr.mxu0 %v4531_v26 }
 0x383   :  { %5418 = vmatpush3.msra.mxu1 %v4519_v17  ;;  %5440 = vmatpush3.msra.mxu0 %v4531_v26 }
 0x384   :  { %5419 = vmatprep.subr.mxu1 %v4518_v31  ;;  %5441 = vmatprep.subr.mxu0 %v4530_v51 }
 0x385   :  { %5420 = vmatpush3.msra.mxu1 %v4518_v31  ;;  %5442 = vmatpush3.msra.mxu0 %v4530_v51 }
 0x386   :  { %5421 = vmatprep.subr.mxu1 %v4517_v1  ;;  %5443 = vmatprep.subr.mxu0 %v4529_v57 }
 0x387   :  { %5422 = vmatpush3.msra.mxu1 %v4517_v1  ;;  %5444 = vmatpush3.msra.mxu0 %v4529_v57 }
 0x388   :  { %5424 = vmatmul.mubr.msk.f32.vlgmr.msra.gmra.mxu1 %vm1074_vm12, %v6826_v2  ;;  %5446 = vmatmul.mubr.msk.f32.vlgmr.msra.gmra.mxu0 %vm1074_vm12, %v6826_v2 }
 0x389   :  { %5451 = vmatprep.subr.mxu1 %v4548_v44  ;;  %5426 = vmatprep.mubr.msk.f32.mxu1 %vm1074_vm12, %v6842_v12 }
 0x38a   :  { %5448 = vmatprep.mubr.msk.f32.mxu0 %vm1074_vm12, %v6842_v12  ;;  %5452 = vmatpush3.msra.mxu1 %v4548_v44 }
 0x38b   :  { %5453 = vmatprep.subr.mxu1 %v4547_v47 }
 0x38c   :  { %5454 = vmatpush3.msra.mxu1 %v4547_v47  ;;  %5449 = vmatmul.mubr.msk.f32.gmra.mxu0 %vm1074_vm12, %v6850_v43 }
 0x38d   :  { %5427 = vmatmul.mubr.msk.f32.gmra.mxu1 %vm1074_vm12, %v6850_v43  ;;  %5455 = vmatprep.subr.mxu1 %v4546_v38 }
 0x38e   :  { %5456 = vmatpush3.msra.mxu1 %v4546_v38  ;;  %5467 = vmatprep.mubr.msk.f32.mxu1 %vm1074_vm12, %v6824_v62  ;;  %v4541_v62 = vld [vmem:[%s8160_s7 + $0x200] sm:$0xff] }
 0x38f   :  { %5457 = vmatprep.subr.mxu1 %v4545_v33  ;;  %2037 = vmatprep.mubr.f32.mxu0 %v1925_v15  ;;  %v4568_v15 = vld [vmem:[%s8162_s10 + $0x78] sm:$0xff] }
 0x390   :  { %5458 = vmatpush3.msra.mxu1 %v4545_v33  ;;  %v1929_v33 = vld [vmem:[%s8161_s8 + $0x28] sm:$0xff] }
 0x391   :  { %5459 = vmatprep.subr.mxu1 %v4544_v20 }
 0x392   :  { %5460 = vmatpush3.msra.mxu1 %v4544_v20  ;;  %v1932_v20 = vld [vmem:[%s8161_s8 + $0x40] sm:$0xff] }
 0x393   :  { %5461 = vmatprep.subr.mxu1 %v4543_v56 }
 0x394   :  { %5462 = vmatpush3.msra.mxu1 %v4543_v56  ;;  %v2154_v56 = vld [vmem:[%s8162_s10 + $0x38] sm:$0xff] }
 0x395   :  { %5463 = vmatprep.subr.mxu1 %v4542_v22 }
 0x396   :  { %5464 = vmatpush3.msra.mxu1 %v4542_v22  ;;  %v1935_v22 = vld [vmem:[%s8161_s8 + $0x58] sm:$0xff] }
 0x397   :  { %5465 = vmatprep.subr.mxu1 %v4541_v62 }
 0x398   :  { %5466 = vmatpush3.msra.mxu1 %v4541_v62  ;;  %v1924_v62 = vld [vmem:[%s8161_s8] sm:$0xff] }
 0x399   :  { %5468 = vmatmul.mubr.msk.f32.vlgmr.msra.gmra.mxu1 %vm1074_vm12, %v6826_v2 }
 0x39a   :  { %5470 = vmatprep.mubr.msk.f32.mxu1 %vm1074_vm12, %v6842_v12 }
 0x39d   :  { %5471 = vmatmul.mubr.msk.f32.gmra.mxu1 %vm1074_vm12, %v6850_v43 }
 0x39e   :  { %5481 = vmatprep.mubr.msk.f32.mxu1 %vm1960_vm13, %v1926_v21  ;;  %v1928_v21 = vld [vmem:[%s8161_s8 + $0x20] sm:$0xff] }
 0x40d   :  { %v5315_v23 = vpop.f32.mrf.mxu0  ;;  %v7073_v2 = vpop.f32.mrf.mxu1 }
 0x40f   :  { %v7075_v25 = vpop.f32.mrf.mxu0  ;;  %v7077_v12 = vpop.f32.mrf.mxu1 }
 0x413   :  { %v5318_v43 = vpop.f32.mrf.mxu0  ;;  %v7079_v28 = vpop.f32.mrf.mxu1 }
 0x415   :  { %v1257_v32 = vpop.f32.mrf.mxu0  ;;  %v7081_v34 = vpop.f32.mrf.mxu1 }
 0x420   :  { %v5359_v10 = vpop.f32.mrf.mxu0  ;;  %v5337_v35 = vpop.f32.mrf.mxu1 }
 0x422   :  { %v1435_v39 = vpop.f32.mrf.mxu0  ;;  %v1341_v40 = vpop.f32.mrf.mxu1 }
 0x426   :  { %v5362_v41 = vpop.f32.mrf.mxu0  ;;  %v5340_v42 = vpop.f32.mrf.mxu1 }
 0x428   :  { %v1445_v49 = vpop.f32.mrf.mxu0  ;;  %v1351_v50 = vpop.f32.mrf.mxu1 }
 0x434   :  { %v5403_v52 = vpop.f32.mrf.mxu0  ;;  %v5381_v53 = vpop.f32.mrf.mxu1 }
 0x436   :  { %v1623_v55 = vpop.f32.mrf.mxu0  ;;  %v7083_v58 = vpop.f32.mrf.mxu1 }
 0x43a   :  { %v5406_v61 = vpop.f32.mrf.mxu0  ;;  %v5384_v63 = vpop.f32.mrf.mxu1 }
 0x43c   :  { %v1633_v4 = vpop.f32.mrf.mxu0  ;;  %v1539_v7 = vpop.f32.mrf.mxu1 }
 0x448   :  { %v5447_v8 = vpop.f32.mrf.mxu0  ;;  %v5425_v13 = vpop.f32.mrf.mxu1 }
 0x44a   :  { %v1811_v16 = vpop.f32.mrf.mxu0  ;;  %v1717_v26 = vpop.f32.mrf.mxu1 }
 0x44c   :  { %v5450_v17 = vpop.f32.mrf.mxu0 }
 0x44d   :  { %4951 = vmatprep.subr.mxu0 %v5450_v17  ;;  %v5428_v51 = vpop.f32.mrf.mxu1 }
 0x44e   :  { %v1821_v31 = vpop.f32.mrf.mxu0  ;;  %4952 = vmatpush3.msra.mxu0 %v5362_v41  ;;  %v4564_v41 = vld [vmem:[%s8162_s10 + $0x58] sm:$0xff] }
 0x44f   :  { %4953 = vmatprep.subr.mxu0 %v1821_v31  ;;  %v1727_v1 = vpop.f32.mrf.mxu1 }
 0x450   :  { %4954 = vmatpush3.msra.mxu0 %v1445_v49  ;;  %v4563_v49 = vld [vmem:[%s8162_s10 + $0x50] sm:$0xff] }
 0x451   :  { %4955 = vmatprep.subr.mxu0 %v5447_v8  ;;  %v1943_v8 = vpop.permute.xlu1 %1942 }
 0x452   :  { %4956 = vmatpush3.msra.mxu0 %v5359_v10  ;;  %v4566_v10 = vld [vmem:[%s8162_s10 + $0x68] sm:$0xff] }
 0x453   :  { %4957 = vmatprep.subr.mxu0 %v1811_v16 }
 0x454   :  { %4958 = vmatpush3.msra.mxu0 %v1435_v39  ;;  %v4565_v39 = vld [vmem:[%s8162_s10 + $0x60] sm:$0xff] }
 0x455   :  { %4959 = vmatprep.subr.mxu0 %v5428_v51  ;;  %v1948_v51 = vpop.permute.xlu0 %1947 }
 0x456   :  { %4960 = vmatpush3.msra.mxu0 %v5340_v42  ;;  %v2149_v42 = vld [vmem:[%s8162_s10 + $0x10] sm:$0xff] }
 0x457   :  { %4961 = vmatprep.subr.mxu0 %v1727_v1 }
 0x458   :  { %4962 = vmatpush3.msra.mxu0 %v1351_v50  ;;  %v2148_v50 = vld [vmem:[%s8162_s10 + $0x8] sm:$0xff] }
 0x459   :  { %v5469_v57 = vpop.f32.mrf.mxu1  ;;  %4963 = vmatprep.subr.mxu0 %v5425_v13 }
 0x45a   :  { %4964 = vmatpush3.msra.mxu0 %v5337_v35  ;;  %v2151_v35 = vld [vmem:[%s8162_s10 + $0x20] sm:$0xff] }
 0x45b   :  { %v1905_v44 = vpop.f32.mrf.mxu1  ;;  %4965 = vmatprep.subr.mxu0 %v1717_v26 }
 0x45c   :  { %4966 = vmatpush3.msra.mxu0 %v1341_v40  ;;  %v2150_v40 = vld [vmem:[%s8162_s10 + $0x18] sm:$0xff] }
 0x45d   :  { %v5472_v47 = vpop.f32.mrf.mxu1  ;;  %4967 = vmatprep.subr.mxu0 %v5406_v61  ;;  %v4592_v61 = vld [vmem:[%s8162_s10 + $0xf8] sm:$0xff] }
 0x45e   :  { %5473 = vmatprep.subr.mxu1 %v5472_v47  ;;  %4968 = vmatpush3.msra.mxu0 %v5318_v43  ;;  %v1933_v43 = vld [vmem:[%s8161_s8 + $0x48] sm:$0xff] }
 0x45f   :  { %v1915_v38 = vpop.f32.mrf.mxu1  ;;  %5474 = vmatpush3.msra.mxu1 %v5472_v47  ;;  %4969 = vmatprep.subr.mxu0 %v1633_v4 }
 0x460   :  { %5475 = vmatprep.subr.mxu1 %v1915_v38  ;;  %4970 = vmatpush3.msra.mxu0 %v1257_v32  ;;  %v4567_v32 = vld [vmem:[%s8162_s10 + $0x70] sm:$0xff] }
 0x461   :  { %5476 = vmatpush3.msra.mxu1 %v1915_v38  ;;  %4971 = vmatprep.subr.mxu0 %v5403_v52  ;;  %v4562_v52 = vld [vmem:[%s8162_s10 + $0x48] sm:$0xff] }
 0x462   :  { %5477 = vmatprep.subr.mxu1 %v5469_v57  ;;  %4972 = vmatpush3.msra.mxu0 %v5315_v23  ;;  %v1927_v23 = vld [vmem:[%s8161_s8 + $0x18] sm:$0xff] }
 0x463   :  { %5478 = vmatpush3.msra.mxu1 %v5469_v57  ;;  %4973 = vmatprep.subr.mxu0 %v1623_v55  ;;  %v4561_v55 = vld [vmem:[%s8162_s10 + $0x40] sm:$0xff] }
 0x464   :  { %5479 = vmatprep.subr.mxu1 %v1905_v44  ;;  %4974 = vmatpush3.msra.mxu0 %v7075_v25  ;;  %v1930_v25 = vld [vmem:[%s8161_s8 + $0x30] sm:$0xff] }
 0x465   :  { %5480 = vmatpush3.msra.mxu1 %v1905_v44  ;;  %4975 = vmatprep.subr.mxu0 %v5384_v63 }
 0x466   :  { %4976 = vmatpush3.msra.mxu0 %v7079_v28  ;;  %5482 = vmatmul.mubr.msk.f32.vlgmr.msra.gmra.mxu1 %vm1960_vm13, %v1929_v33  ;;  %v2153_v28 = vld [vmem:[%s8162_s10 + $0x30] sm:$0xff] }
 0x467   :  { %4977 = vmatprep.subr.mxu0 %v1539_v7  ;;  %5484 = vmatprep.mubr.msk.f32.mxu1 %vm1960_vm13, %v1932_v20 }
 0x468   :  { %4978 = vmatpush3.msra.mxu0 %v7081_v34  ;;  %5487 = vmatprep.subr.mxu1 %v2154_v56  ;;  %v2152_v34 = vld [vmem:[%s8162_s10 + $0x28] sm:$0xff] }
 0x469   :  { %4979 = vmatprep.subr.mxu0 %v5381_v53  ;;  %5488 = vmatpush3.msra.mxu1 %v2154_v56  ;;  %v2147_v53 = vld [vmem:[%s8162_s10] sm:$0xff]  ;;  %v1953_v56 = vpop.permute.xlu1 %1952 }
 0x46a   :  { %4980 = vmatpush3.msra.mxu0 %v7073_v2  ;;  %5485 = vmatmul.mubr.msk.f32.gmra.mxu1 %vm1960_vm13, %v1935_v22  ;;  %v1931_v2 = vld [vmem:[%s8161_s8 + $0x38] sm:$0xff] }
 0x46b   :  { %4981 = vmatprep.subr.mxu0 %v7083_v58  ;;  %5489 = vmatprep.subr.mxu1 %v2153_v28  ;;  %v4580_v58 = vld [vmem:[%s8162_s10 + $0xb8] sm:$0xff] }
 0x46c   :  { %4982 = vmatpush3.msra.mxu0 %v7077_v12  ;;  %v1934_v12 = vld [vmem:[%s8161_s8 + $0x50] sm:$0xff]  ;;  %5490 = vmatpush3.msra.mxu1 %v2153_v28 }
 0x46d   :  { %2038 = vmatmul.mubr.f32.vlgmr.msra.gmra.mxu0 %v1924_v62  ;;  %5509 = vmatprep.subr.mxu0 %v4568_v15 }
 0x46e   :  { %2042 = vmatprep.mubr.f32.mxu0 %v1928_v21  ;;  %5510 = vmatpush3.msra.mxu0 %v4568_v15 }
 0x46f   :  { %5511 = vmatprep.subr.mxu0 %v4567_v32  ;;  %5491 = vmatprep.subr.mxu1 %v2152_v34 }
 0x470   :  { %5512 = vmatpush3.msra.mxu0 %v4567_v32  ;;  %5492 = vmatpush3.msra.mxu1 %v2152_v34  ;;  %v1958_v34 = vpop.permute.xlu0 %1957 }
 0x471   :  { %2043 = vmatmul.mubr.f32.gmra.mxu0 %v1927_v23  ;;  %5513 = vmatprep.subr.mxu0 %v4566_v10 }
 0x472   :  { %2047 = vmatprep.mubr.f32.mxu0 %v1931_v2  ;;  %5514 = vmatpush3.msra.mxu0 %v4566_v10  ;;  %v4578_v10 = vld [vmem:[%s8162_s10 + $0xa8] sm:$0xff] }
 0x473   :  { %5493 = vmatprep.subr.mxu1 %v2151_v35  ;;  %5515 = vmatprep.subr.mxu0 %v4565_v39 }
 0x474   :  { %5494 = vmatpush3.msra.mxu1 %v2151_v35  ;;  %5516 = vmatpush3.msra.mxu0 %v4565_v39  ;;  %v4590_v35 = vld [vmem:[%s8162_s10 + $0xe8] sm:$0xff] }
 0x475   :  { %2048 = vmatmul.mubr.f32.gmra.mxu0 %v1930_v25  ;;  %5495 = vmatprep.subr.mxu1 %v2150_v40 }
 0x476   :  { %2052 = vmatprep.mubr.f32.mxu0 %v1934_v12  ;;  %5517 = vmatprep.subr.mxu0 %v4564_v41  ;;  %v4579_v12 = vld [vmem:[%s8162_s10 + $0xb0] sm:$0xff] }
 0x477   :  { %5496 = vmatpush3.msra.mxu1 %v2150_v40  ;;  %5518 = vmatpush3.msra.mxu0 %v4564_v41 }
 0x478   :  { %5497 = vmatprep.subr.mxu1 %v2149_v42  ;;  %5519 = vmatprep.subr.mxu0 %v4563_v49 }
 0x479   :  { %2053 = vmatmul.mubr.f32.gmra.mxu0 %v1933_v43  ;;  %5498 = vmatpush3.msra.mxu1 %v2149_v42  ;;  %v4591_v43 = vld [vmem:[%s8162_s10 + $0xf0] sm:$0xff]  ;;  %v4577_v42 = vld [vmem:[%s8162_s10 + $0xa0] sm:$0xff] }
 0x47a   :  { %5520 = vmatpush3.msra.mxu0 %v4563_v49  ;;  %5499 = vmatprep.subr.mxu1 %v2148_v50  ;;  %v4589_v49 = vld [vmem:[%s8162_s10 + $0xe0] sm:$0xff] }
 0x47b   :  { %5521 = vmatprep.subr.mxu0 %v4562_v52  ;;  %5500 = vmatpush3.msra.mxu1 %v2148_v50 }
 0x47c   :  { %5522 = vmatpush3.msra.mxu0 %v4562_v52  ;;  %5501 = vmatprep.subr.mxu1 %v2147_v53  ;;  %v4576_v52 = vld [vmem:[%s8162_s10 + $0x98] sm:$0xff] }
 0x47d   :  { %5523 = vmatprep.subr.mxu0 %v4561_v55  ;;  %5502 = vmatpush3.msra.mxu1 %v2147_v53  ;;  %v4588_v53 = vld [vmem:[%s8162_s10 + $0xd8] sm:$0xff] }
 0x47e   :  { %5524 = vmatpush3.msra.mxu0 %v4561_v55  ;;  %5531 = vmatprep.subr.mxu1 %v4580_v58  ;;  %v4575_v55 = vld [vmem:[%s8162_s10 + $0x90] sm:$0xff] }
 0x47f   :  { %5553 = vmatprep.subr.mxu0 %v4592_v61 }
 0x526   :  { %v5483_v4 = vpop.f32.mrf.mxu1 }
 0x528   :  { %v2124_v17 = vpop.f32.mrf.mxu1 }
 0x52a   :  { %v5486_v47 = vpop.f32.mrf.mxu1 }
 0x52c   :  { %v2134_v21 = vpop.f32.mrf.mxu1 }
 0x52d   :  { %v4983_v63 = vpop.f32.mrf.mxu0 }
 0x52f   :  { %v4984_v7 = vpop.f32.mrf.mxu0 }
 0x530   :  { %v4985_v13 = vadd.f32 %v4984_v7, %v4983_v63  ;;  %v4586_v63 = vld [vmem:[%s8162_s10 + $0xc8] sm:$0xff]  ;;  %v4585_v7 = vld [vmem:[%s8162_s10 + $0xc0] sm:$0xff] }
 0x531   :  { %v4986_v16 = vpop.f32.mrf.mxu0 }
 0x532   :  { %v2040_v26 = vadd.f32 %v4985_v13, %v1943_v8  ;;  %v2534_v8 = vld [vmem:[%s8163_s11] sm:$0xff] }
 0x533   :  { %v4987_v31 = vpop.f32.mrf.mxu0 }
 0x534   :  { %v4988_v1 = vadd.f32 %v4987_v31, %v4986_v16  ;;  %v2125_v57 = vadd.f32 %v2124_v17, %v2040_v26 }
 0x535   :  { %v4989_v44 = vpop.f32.mrf.mxu0 }
 0x536   :  { %v2045_v38 = vadd.f32 %v4988_v1, %v1948_v51  ;;  %v2143_v33 = vmax.f32 %v2125_v57, 0.0 }
 0x537   :  { %v4990_v20 = vpop.f32.mrf.mxu0 }
 0x538   :  { %v2130_v22 = vadd.f32 %v5483_v4, %v2045_v38  ;;  %v4991_v62 = vadd.f32 %v4990_v20, %v4989_v44  ;;  %5503 = vmatprep.mubr.msk.f32.mxu1 %vm1074_vm12, %v2143_v33  ;;  %5525 = vmatprep.mubr.msk.f32.mxu0 %vm1074_vm12, %v2143_v33  ;;  %v4573_v4 = vld [vmem:[%s8162_s10 + $0x80] sm:$0xff] }
 0x539   :  { %v4992_v15 = vpop.f32.mrf.mxu0 }
 0x53a   :  { %v7180_v23 = vmax.f32 %v2130_v22, 0.0  ;;  %v2050_v2 = vadd.f32 %v4991_v62, %v1953_v56 }
 0x53b   :  { %v4993_v25 = vpop.f32.mrf.mxu0 }
 0x53c   :  { %v4994_v28 = vadd.f32 %v4993_v25, %v4992_v15  ;;  %v2135_v32 = vadd.f32 %v2134_v21, %v2050_v2  ;;  %5504 = vmatmul.mubr.msk.f32.vlgmr.msra.gmra.mxu1 %vm1074_vm12, %v7180_v23  ;;  %5526 = vmatmul.mubr.msk.f32.vlgmr.msra.gmra.mxu0 %vm1074_vm12, %v7180_v23  ;;  %v2535_v15 = vld [vmem:[%s8163_s11 + $0x8] sm:$0xff]  ;;  %v2536_v21 = vld [vmem:[%s8163_s11 + $0x10] sm:$0xff]  ;;  %v2537_v2 = vld [vmem:[%s8163_s11 + $0x18] sm:$0xff] }
 0x53d   :  { %5532 = vmatpush3.msra.mxu1 %v4580_v58  ;;  %5554 = vmatpush3.msra.mxu0 %v4592_v61  ;;  %v4587_v58 = vld [vmem:[%s8162_s10 + $0xd0] sm:$0xff]  ;;  %v4574_v61 = vld [vmem:[%s8162_s10 + $0x88] sm:$0xff] }
 0x53e   :  { %v2055_v39 = vadd.f32 %v4994_v28, %v1958_v34  ;;  %v2145_v40 = vmax.f32 %v2135_v32, 0.0  ;;  %5533 = vmatprep.subr.mxu1 %v4579_v12  ;;  %5555 = vmatprep.subr.mxu0 %v4591_v43  ;;  %v5858_v25 = vld [vmem:[%s8160_s7 + $0x70] sm:$0xff]  ;;  %v5861_v28 = vld [vmem:[%s8160_s7 + $0x58] sm:$0xff]  ;;  %v5863_v34 = vld [vmem:[%s8160_s7 + $0x48] sm:$0xff] }
 0x53f   :  { %5534 = vmatpush3.msra.mxu1 %v4579_v12  ;;  %5556 = vmatpush3.msra.mxu0 %v4591_v43  ;;  %v5859_v12 = vld [vmem:[%s8160_s7 + $0x68] sm:$0xff]  ;;  %v5860_v43 = vld [vmem:[%s8160_s7 + $0x60] sm:$0xff]  ;;  %v5862_v32 = vld [vmem:[%s8160_s7 + $0x50] sm:$0xff] }
 0x540   :  { %v2140_v41 = vadd.f32 %v5486_v47, %v2055_v39  ;;  %5535 = vmatprep.subr.mxu1 %v4578_v10  ;;  %5557 = vmatprep.subr.mxu0 %v4590_v35  ;;  %v2652_v39 = vld [vmem:[%s8164_s13 + $0x8] sm:$0xff] }
 0x541   :  { %5506 = vmatprep.mubr.msk.f32.mxu1 %vm1074_vm12, %v2145_v40  ;;  %5528 = vmatprep.mubr.msk.f32.mxu0 %vm1074_vm12, %v2145_v40 }
 0x542   :  { %v2146_v50 = vmax.f32 %v2140_v41, 0.0  ;;  %5536 = vmatpush3.msra.mxu1 %v4578_v10  ;;  %5558 = vmatpush3.msra.mxu0 %v4590_v35  ;;  %v5864_v10 = vld [vmem:[%s8160_s7 + $0x40] sm:$0xff]  ;;  %v7281_v35 = vld [vmem:[%s8160_s7 + $0xf8] sm:$0xff] }
 0x543   :  { %5537 = vmatprep.subr.mxu1 %v4577_v42  ;;  %5559 = vmatprep.subr.mxu0 %v4589_v49  ;;  %v5866_v41 = vld [vmem:[%s8160_s7 + $0x38] sm:$0xff] }
 0x544   :  { %5538 = vmatpush3.msra.mxu1 %v4577_v42  ;;  %5560 = vmatpush3.msra.mxu0 %v4589_v49  ;;  %v2550_v42 = vpop.permute.xlu0 %2549  ;;  %v2545_v49 = vpop.permute.xlu1 %2544 }
 0x545   :  { %5539 = vmatprep.subr.mxu1 %v4576_v52  ;;  %5561 = vmatprep.subr.mxu0 %v4588_v53 }
 0x546   :  { %5507 = vmatmul.mubr.msk.f32.gmra.mxu1 %vm1074_vm12, %v2146_v50  ;;  %5529 = vmatmul.mubr.msk.f32.gmra.mxu0 %vm1074_vm12, %v2146_v50 }
 0x547   :  { %5540 = vmatpush3.msra.mxu1 %v4576_v52  ;;  %5562 = vmatpush3.msra.mxu0 %v4588_v53 }
 0x548   :  { %5541 = vmatprep.subr.mxu1 %v4575_v55  ;;  %5547 = vmatprep.mubr.msk.f32.mxu1 %vm1074_vm12, %v2143_v33 }
 0x549   :  { %5563 = vmatprep.subr.mxu0 %v4587_v58  ;;  %5569 = vmatprep.mubr.msk.f32.mxu0 %vm1074_vm12, %v2143_v33 }
 0x54a   :  { %5542 = vmatpush3.msra.mxu1 %v4575_v55  ;;  %5564 = vmatpush3.msra.mxu0 %v4587_v58 }
 0x54b   :  { %5543 = vmatprep.subr.mxu1 %v4574_v61  ;;  %5565 = vmatprep.subr.mxu0 %v4586_v63 }
 0x54c   :  { %5544 = vmatpush3.msra.mxu1 %v4574_v61  ;;  %5566 = vmatpush3.msra.mxu0 %v4586_v63  ;;  %v2560_v61 = vpop.permute.xlu0 %2559 }
 0x54d   :  { %5545 = vmatprep.subr.mxu1 %v4573_v4  ;;  %5567 = vmatprep.subr.mxu0 %v4585_v7 }
 0x54e   :  { %5546 = vmatpush3.msra.mxu1 %v4573_v4  ;;  %5568 = vmatpush3.msra.mxu0 %v4585_v7  ;;  %v2555_v4 = vpop.permute.xlu1 %2554 }
 0x54f   :  { %5548 = vmatmul.mubr.msk.f32.vlgmr.msra.gmra.mxu1 %vm1074_vm12, %v7180_v23  ;;  %5570 = vmatmul.mubr.msk.f32.vlgmr.msra.gmra.mxu0 %vm1074_vm12, %v7180_v23  ;;  %v5857_v23 = vld [vmem:[%s8160_s7 + $0x78] sm:$0xff] }
 0x550   :  { %5550 = vmatprep.mubr.msk.f32.mxu1 %vm1074_vm12, %v2145_v40  ;;  %5572 = vmatprep.mubr.msk.f32.mxu0 %vm1074_vm12, %v2145_v40  ;;  %v2651_v40 = vld [vmem:[%s8164_s13] sm:$0xff] }
 0x551   :  { %5613 = vmatprep.subr.mxu0 %v2652_v39 }
 0x552   :  { %5614 = vmatpush3.msra.mxu0 %v2652_v39  ;;  %v5883_v39 = vld [vmem:[%s8160_s7 + $0x90] sm:$0xff] }
 0x553   :  { %5551 = vmatmul.mubr.msk.f32.gmra.mxu1 %vm1074_vm12, %v2146_v50  ;;  %5573 = vmatmul.mubr.msk.f32.gmra.mxu0 %vm1074_vm12, %v2146_v50 }
 0x554   :  { %5607 = vmatprep.mubr.f32.mxu1 %v2534_v8  ;;  %5615 = vmatprep.subr.mxu0 %v2651_v40 }
 0x555   :  { %5616 = vmatpush3.msra.mxu0 %v2651_v40  ;;  %v5884_v40 = vld [vmem:[%s8160_s7 + $0xd0] sm:$0xff] }
 0x556   :  { %5623 = vmatprep.subr.mxu0 %v5866_v41 }
 0x5fc   :  { %v5527_v13 = vpop.f32.mrf.mxu0  ;;  %v5505_v16 = vpop.f32.mrf.mxu1 }
 0x5fe   :  { %v2327_v17 = vpop.f32.mrf.mxu0  ;;  %v2233_v26 = vpop.f32.mrf.mxu1 }
 0x606   :  { %v5530_v31 = vpop.f32.mrf.mxu0  ;;  %v5508_v51 = vpop.f32.mrf.mxu1 }
 0x608   :  { %v2337_v1 = vpop.f32.mrf.mxu0  ;;  %v2243_v57 = vpop.f32.mrf.mxu1 }
 0x60f   :  { %v5571_v44 = vpop.f32.mrf.mxu0  ;;  %v5549_v47 = vpop.f32.mrf.mxu1 }
 0x611   :  { %v2515_v38 = vpop.f32.mrf.mxu0  ;;  %v2421_v20 = vpop.f32.mrf.mxu1 }
 0x613   :  { %v5574_v33 = vpop.f32.mrf.mxu0  ;;  %v5552_v22 = vpop.f32.mrf.mxu1 }
 0x614   :  { %5575 = vmatprep.subr.mxu1 %v5574_v33 }
 0x615   :  { %v2525_v56 = vpop.f32.mrf.mxu0  ;;  %5576 = vmatpush3.msra.mxu1 %v5574_v33  ;;  %v2431_v62 = vpop.f32.mrf.mxu1  ;;  %v5874_v33 = vld [vmem:[%s8160_s7 + $0xb8] sm:$0xff] }
 0x616   :  { %5577 = vmatprep.subr.mxu1 %v2525_v56 }
 0x617   :  { %5578 = vmatpush3.msra.mxu1 %v2525_v56 }
 0x618   :  { %5579 = vmatprep.subr.mxu1 %v5571_v44 }
 0x619   :  { %5580 = vmatpush3.msra.mxu1 %v5571_v44  ;;  %v5871_v44 = vld [vmem:[%s8160_s7 + $0x10] sm:$0xff] }
 0x61a   :  { %5581 = vmatprep.subr.mxu1 %v2515_v38 }
 0x61b   :  { %5582 = vmatpush3.msra.mxu1 %v2515_v38  ;;  %v5873_v38 = vld [vmem:[%s8160_s7] sm:$0xff] }
 0x61c   :  { %5583 = vmatprep.subr.mxu1 %v5552_v22 }
 0x61d   :  { %5584 = vmatpush3.msra.mxu1 %v5552_v22 }
 0x61e   :  { %5585 = vmatprep.subr.mxu1 %v2431_v62 }
 0x61f   :  { %5586 = vmatpush3.msra.mxu1 %v2431_v62 }
 0x620   :  { %5587 = vmatprep.subr.mxu1 %v5549_v47 }
 0x621   :  { %5588 = vmatpush3.msra.mxu1 %v5549_v47  ;;  %v5872_v47 = vld [vmem:[%s8160_s7 + $0x8] sm:$0xff] }
 0x622   :  { %5589 = vmatprep.subr.mxu1 %v2421_v20 }
 0x623   :  { %5590 = vmatpush3.msra.mxu1 %v2421_v20 }
 0x624   :  { %5591 = vmatprep.subr.mxu1 %v5530_v31 }
 0x625   :  { %5592 = vmatpush3.msra.mxu1 %v5530_v31  ;;  %v5867_v31 = vld [vmem:[%s8160_s7 + $0x30] sm:$0xff] }
 0x626   :  { %5593 = vmatprep.subr.mxu1 %v2337_v1 }
 0x627   :  { %5594 = vmatpush3.msra.mxu1 %v2337_v1  ;;  %v5869_v1 = vld [vmem:[%s8160_s7 + $0x20] sm:$0xff] }
 0x628   :  { %5595 = vmatprep.subr.mxu1 %v5527_v13 }
 0x629   :  { %5596 = vmatpush3.msra.mxu1 %v5527_v13 }
 0x62a   :  { %5597 = vmatprep.subr.mxu1 %v2327_v17 }
 0x62b   :  { %5598 = vmatpush3.msra.mxu1 %v2327_v17 }
 0x62c   :  { %5599 = vmatprep.subr.mxu1 %v5508_v51 }
 0x62d   :  { %5600 = vmatpush3.msra.mxu1 %v5508_v51  ;;  %v5868_v51 = vld [vmem:[%s8160_s7 + $0x28] sm:$0xff] }
 0x62e   :  { %5601 = vmatprep.subr.mxu1 %v2243_v57 }
 0x62f   :  { %5602 = vmatpush3.msra.mxu1 %v2243_v57  ;;  %v5870_v57 = vld [vmem:[%s8160_s7 + $0x18] sm:$0xff] }
 0x630   :  { %5603 = vmatprep.subr.mxu1 %v5505_v16 }
 0x631   :  { %5604 = vmatpush3.msra.mxu1 %v5505_v16 }
 0x632   :  { %5605 = vmatprep.subr.mxu1 %v2233_v26 }
 0x633   :  { %5606 = vmatpush3.msra.mxu1 %v2233_v26 }
 0x634   :  { %5608 = vmatmul.mubr.f32.vlgmr.msra.gmra.mxu1 %v2535_v15  ;;  %5645 = vmatprep.subr.mxu1 %v5857_v23 }
 0x635   :  { %5610 = vmatprep.mubr.f32.mxu1 %v2536_v21  ;;  %5646 = vmatpush3.msra.mxu1 %v5857_v23 }
 0x636   :  { %5647 = vmatprep.subr.mxu1 %v5858_v25 }
 0x637   :  { %5648 = vmatpush3.msra.mxu1 %v5858_v25  ;;  %v5876_v25 = vld [vmem:[%s8160_s7 + $0xf0] sm:$0xff] }
 0x638   :  { %5611 = vmatmul.mubr.f32.gmra.mxu1 %v2537_v2  ;;  %5649 = vmatprep.subr.mxu1 %v5859_v12  ;;  %v5875_v2 = vld [vmem:[%s8160_s7 + $0xb0] sm:$0xff] }
 0x639   :  { %5650 = vmatpush3.msra.mxu1 %v5859_v12 }
 0x63a   :  { %5651 = vmatprep.subr.mxu1 %v5860_v43 }
 0x63b   :  { %5652 = vmatpush3.msra.mxu1 %v5860_v43  ;;  %v5877_v43 = vld [vmem:[%s8160_s7 + $0xa8] sm:$0xff] }
 0x63c   :  { %5653 = vmatprep.subr.mxu1 %v5861_v28 }
 0x63d   :  { %5654 = vmatpush3.msra.mxu1 %v5861_v28  ;;  %v5878_v28 = vld [vmem:[%s8160_s7 + $0xe8] sm:$0xff] }
 0x63e   :  { %5655 = vmatprep.subr.mxu1 %v5862_v32 }
 0x63f   :  { %5656 = vmatpush3.msra.mxu1 %v5862_v32  ;;  %v5879_v32 = vld [vmem:[%s8160_s7 + $0xa0] sm:$0xff] }
 0x640   :  { %5657 = vmatprep.subr.mxu1 %v5863_v34 }
 0x641   :  { %5658 = vmatpush3.msra.mxu1 %v5863_v34  ;;  %v5880_v34 = vld [vmem:[%s8160_s7 + $0xe0] sm:$0xff] }
 0x642   :  { %5659 = vmatprep.subr.mxu1 %v5864_v10 }
 0x643   :  { %5660 = vmatpush3.msra.mxu1 %v5864_v10  ;;  %v5881_v10 = vld [vmem:[%s8160_s7 + $0x98] sm:$0xff] }
 0x644   :  { %5689 = vmatprep.subr.mxu1 %v7281_v35 }
 0x6f4   :  { %v5609_v50 = vpop.f32.mrf.mxu1 }
 0x6f5   :  { %v2634_v52 = vadd.f32 %v5609_v50, %v2550_v42  ;;  %v5886_v42 = vld [vmem:[%s8160_s7 + $0xc8] sm:$0xff]  ;;  %v5888_v50 = vld [vmem:[%s8160_s7 + $0xc0] sm:$0xff] }
 0x6f6   :  { %v2628_v53 = vpop.f32.mrf.mxu1 }
 0x6f7   :  { %v2629_v55 = vadd.f32 %v2628_v53, %v2545_v49  ;;  %v2648_v7 = vmax.f32 %v2634_v52, 0.0  ;;  %v5887_v49 = vld [vmem:[%s8160_s7 + $0x80] sm:$0xff]  ;;  %v5889_v52 = vld [vmem:[%s8160_s7 + $0x138] sm:$0xff] }
 0x6f8   :  { %v5612_v58 = vpop.f32.mrf.mxu1  ;;  %v5890_v53 = vld [vmem:[%s8160_s7 + $0x178] sm:$0xff] }
 0x6f9   :  { %v2647_v63 = vmax.f32 %v2629_v55, 0.0  ;;  %v2644_v8 = vadd.f32 %v5612_v58, %v2560_v61  ;;  %v5891_v55 = vld [vmem:[%s8160_s7 + $0x130] sm:$0xff]  ;;  %v5893_v61 = vld [vmem:[%s8160_s7 + $0x128] sm:$0xff] }
 0x6fa   :  { %v2638_v13 = vpop.f32.mrf.mxu1  ;;  %v5892_v58 = vld [vmem:[%s8160_s7 + $0x170] sm:$0xff] }
 0x6fb   :  { %v2639_v16 = vadd.f32 %v2638_v13, %v2555_v4  ;;  %5617 = vmatprep.mubr.msk.f32.mxu0 %vm2653_vm14, %v2647_v63  ;;  %v2650_v26 = vmax.f32 %v2644_v8, 0.0  ;;  %v5894_v63 = vld [vmem:[%s8160_s7 + $0x168] sm:$0xff]  ;;  %v5895_v4 = vld [vmem:[%s8160_s7 + $0x120] sm:$0xff]  ;;  %v5897_v8 = vld [vmem:[%s8160_s7 + $0x118] sm:$0xff] }
 0x6fc   :  { %5618 = vmatmul.mubr.msk.f32.vlgmr.msra.gmra.mxu0 %vm2653_vm14, %v2648_v7  ;;  %v5896_v7 = vld [vmem:[%s8160_s7 + $0x160] sm:$0xff]  ;;  %v5898_v13 = vld [vmem:[%s8160_s7 + $0x158] sm:$0xff] }
 0x6fd   :  { %v2649_v17 = vmax.f32 %v2639_v16, 0.0  ;;  %5624 = vmatpush3.msra.mxu0 %v5866_v41  ;;  %v5885_v41 = vld [vmem:[%s8160_s7 + $0x88] sm:$0xff]  ;;  %v5899_v16 = vld [vmem:[%s8160_s7 + $0x110] sm:$0xff] }
 0x6fe   :  { %5625 = vmatprep.subr.mxu0 %v5867_v31 }
 0x6ff   :  { %5620 = vmatprep.mubr.msk.f32.mxu0 %vm2653_vm14, %v2649_v17  ;;  %5626 = vmatpush3.msra.mxu0 %v5867_v31  ;;  %v5900_v17 = vld [vmem:[%s8160_s7 + $0x150] sm:$0xff]  ;;  %v5902_v31 = vld [vmem:[%s8160_s7 + $0x148] sm:$0xff] }
 0x700   :  { %5621 = vmatmul.mubr.msk.f32.gmra.mxu0 %vm2653_vm14, %v2650_v26  ;;  %5627 = vmatprep.subr.mxu0 %v5868_v51  ;;  %v5901_v26 = vld [vmem:[%s8160_s7 + $0x108] sm:$0xff] }
 0x701   :  { %5628 = vmatpush3.msra.mxu0 %v5868_v51  ;;  %v5903_v51 = vld [vmem:[%s8160_s7 + $0x100] sm:$0xff] }
 0x702   :  { %5629 = vmatprep.subr.mxu0 %v5869_v1 }
 0x703   :  { %5630 = vmatpush3.msra.mxu0 %v5869_v1  ;;  %v5904_v1 = vld [vmem:[%s8160_s7 + $0x140] sm:$0xff] }
 0x704   :  { %5631 = vmatprep.subr.mxu0 %v5870_v57 }
 0x705   :  { %5632 = vmatpush3.msra.mxu0 %v5870_v57  ;;  %v5905_v57 = vld [vmem:[%s8160_s7 + $0x1b8] sm:$0xff] }
 0x706   :  { %5633 = vmatprep.subr.mxu0 %v5871_v44 }
 0x707   :  { %5634 = vmatpush3.msra.mxu0 %v5871_v44  ;;  %v5906_v44 = vld [vmem:[%s8160_s7 + $0x1f8] sm:$0xff] }
 0x708   :  { %5635 = vmatprep.subr.mxu0 %v5872_v47 }
 0x709   :  { %5636 = vmatpush3.msra.mxu0 %v5872_v47  ;;  %v5907_v47 = vld [vmem:[%s8160_s7 + $0x1b0] sm:$0xff] }
 0x70a   :  { %5637 = vmatprep.subr.mxu0 %v5873_v38 }
 0x70b   :  { %5638 = vmatpush3.msra.mxu0 %v5873_v38  ;;  %v5908_v38 = vld [vmem:[%s8160_s7 + $0x1f0] sm:$0xff] }
 0x70c   :  { %5667 = vmatprep.subr.mxu0 %v5874_v33 }
 0x7bc   :  { %v5619_v20 = vpop.f32.mrf.mxu0 }
 0x7bd   :  { %v7323_v62 = vmax.f32 %v5619_v20, 0.0  ;;  %v5910_v20 = vld [vmem:[%s8160_s7 + $0x1e8] sm:$0xff] }
 0x7be   :  { %v2732_v56 = vpop.f32.mrf.mxu0 }
 0x7bf   :  { %v7321_v22 = vmax.f32 %v2732_v56, 0.0  ;;  %v5911_v56 = vld [vmem:[%s8160_s7 + $0x1a0] sm:$0xff] }
 0x7c0   :  { %v5622_v15 = vpop.f32.mrf.mxu0 }
 0x7c1   :  { %5639 = vmatprep.mubr.msk.f32.mxu0 %vm1074_vm12, %v7321_v22  ;;  %5661 = vmatprep.mubr.msk.f32.mxu1 %vm1074_vm12, %v7321_v22  ;;  %v7342_v12 = vmax.f32 %v5622_v15, 0.0  ;;  %v5912_v15 = vld [vmem:[%s8160_s7 + $0x1e0] sm:$0xff] }
 0x7c2   :  { %v2742_v21 = vpop.f32.mrf.mxu0  ;;  %5640 = vmatmul.mubr.msk.f32.vlgmr.msra.gmra.mxu0 %vm1074_vm12, %v7323_v62  ;;  %5662 = vmatmul.mubr.msk.f32.vlgmr.msra.gmra.mxu1 %vm1074_vm12, %v7323_v62 }
 0x7c3   :  { %v7333_v23 = vmax.f32 %v2742_v21, 0.0  ;;  %5668 = vmatpush3.msra.mxu0 %v5874_v33  ;;  %5690 = vmatpush3.msra.mxu1 %v7281_v35  ;;  %v5882_v35 = vld [vmem:[%s8160_s7 + $0xd8] sm:$0xff]  ;;  %v5909_v33 = vld [vmem:[%s8160_s7 + $0x1a8] sm:$0xff] }
 0x7c4   :  { %5669 = vmatprep.subr.mxu0 %v5875_v2  ;;  %5691 = vmatprep.subr.mxu1 %v5876_v25  ;;  %v5913_v21 = vld [vmem:[%s8160_s7 + $0x198] sm:$0xff] }
 0x7c5   :  { %5670 = vmatpush3.msra.mxu0 %v5875_v2  ;;  %5692 = vmatpush3.msra.mxu1 %v5876_v25  ;;  %v5914_v2 = vld [vmem:[%s8160_s7 + $0x1d8] sm:$0xff]  ;;  %v5915_v25 = vld [vmem:[%s8160_s7 + $0x190] sm:$0xff] }
 0x7c6   :  { %5642 = vmatprep.mubr.msk.f32.mxu0 %vm1074_vm12, %v7333_v23  ;;  %5664 = vmatprep.mubr.msk.f32.mxu1 %vm1074_vm12, %v7333_v23 }
 0x7c7   :  { %5671 = vmatprep.subr.mxu0 %v5877_v43  ;;  %5693 = vmatprep.subr.mxu1 %v5878_v28 }
 0x7c8   :  { %5643 = vmatmul.mubr.msk.f32.gmra.mxu0 %vm1074_vm12, %v7342_v12  ;;  %5665 = vmatmul.mubr.msk.f32.gmra.mxu1 %vm1074_vm12, %v7342_v12 }
 0x7c9   :  { %5672 = vmatpush3.msra.mxu0 %v5877_v43  ;;  %5694 = vmatpush3.msra.mxu1 %v5878_v28  ;;  %v5916_v43 = vld [vmem:[%s8160_s7 + $0x1d0] sm:$0xff]  ;;  %v5917_v28 = vld [vmem:[%s8160_s7 + $0x188] sm:$0xff] }
 0x7ca   :  { %5673 = vmatprep.subr.mxu0 %v5879_v32  ;;  %5683 = vmatprep.mubr.msk.f32.mxu0 %vm1074_vm12, %v7321_v22 }
 0x7cb   :  { %5695 = vmatprep.subr.mxu1 %v5880_v34  ;;  %5705 = vmatprep.mubr.msk.f32.mxu1 %vm1074_vm12, %v7321_v22 }
 0x7cc   :  { %5674 = vmatpush3.msra.mxu0 %v5879_v32  ;;  %5696 = vmatpush3.msra.mxu1 %v5880_v34  ;;  %v5918_v32 = vld [vmem:[%s8160_s7 + $0x1c8] sm:$0xff]  ;;  %v5919_v34 = vld [vmem:[%s8160_s7 + $0x180] sm:$0xff] }
 0x7cd   :  { %5675 = vmatprep.subr.mxu0 %v5881_v10  ;;  %5697 = vmatprep.subr.mxu1 %v5882_v35 }
 0x7ce   :  { %5676 = vmatpush3.msra.mxu0 %v5881_v10  ;;  %5698 = vmatpush3.msra.mxu1 %v5882_v35  ;;  %v5920_v10 = vld [vmem:[%s8160_s7 + $0x1c0] sm:$0xff]  ;;  %v5921_v35 = vld [vmem:[%s8160_s7 + $0x238] sm:$0xff] }
 0x7cf   :  { %5677 = vmatprep.subr.mxu0 %v5883_v39  ;;  %5699 = vmatprep.subr.mxu1 %v5884_v40 }
 0x7d0   :  { %5678 = vmatpush3.msra.mxu0 %v5883_v39  ;;  %5700 = vmatpush3.msra.mxu1 %v5884_v40  ;;  %v5922_v39 = vld [vmem:[%s8160_s7 + $0x230] sm:$0xff]  ;;  %v5923_v40 = vld [vmem:[%s8160_s7 + $0x228] sm:$0xff] }
 0x7d1   :  { %5679 = vmatprep.subr.mxu0 %v5885_v41  ;;  %5701 = vmatprep.subr.mxu1 %v5886_v42 }
 0x7d2   :  { %5680 = vmatpush3.msra.mxu0 %v5885_v41  ;;  %5702 = vmatpush3.msra.mxu1 %v5886_v42  ;;  %v5924_v41 = vld [vmem:[%s8160_s7 + $0x220] sm:$0xff]  ;;  %v5925_v42 = vld [vmem:[%s8160_s7 + $0x218] sm:$0xff] }
 0x7d3   :  { %5681 = vmatprep.subr.mxu0 %v5887_v49  ;;  %5703 = vmatprep.subr.mxu1 %v5888_v50 }
 0x7d4   :  { %5682 = vmatpush3.msra.mxu0 %v5887_v49  ;;  %5704 = vmatpush3.msra.mxu1 %v5888_v50  ;;  %v5926_v49 = vld [vmem:[%s8160_s7 + $0x210] sm:$0xff]  ;;  %v5928_v50 = vld [vmem:[%s8160_s7 + $0x200] sm:$0xff] }
 0x7d5   :  { %5684 = vmatmul.mubr.msk.f32.vlgmr.msra.gmra.mxu0 %vm1074_vm12, %v7323_v62  ;;  %5706 = vmatmul.mubr.msk.f32.vlgmr.msra.gmra.mxu1 %vm1074_vm12, %v7323_v62 }
 0x7d6   :  { %5711 = vmatprep.subr.mxu0 %v5889_v52  ;;  %5733 = vmatprep.subr.mxu1 %v5890_v53 }
 0x7d7   :  { %5686 = vmatprep.mubr.msk.f32.mxu0 %vm1074_vm12, %v7333_v23  ;;  %5708 = vmatprep.mubr.msk.f32.mxu1 %vm1074_vm12, %v7333_v23 }
 0x7d8   :  { %5712 = vmatpush3.msra.mxu0 %v5889_v52  ;;  %5734 = vmatpush3.msra.mxu1 %v5890_v53  ;;  %v3533_v52 = vld [vmem:[%s8165_s14 + $0x8] sm:$0xff]  ;;  %v3534_v53 = vld [vmem:[%s8165_s14 + $0x10] sm:$0xff] }
 0x7d9   :  { %5713 = vmatprep.subr.mxu0 %v5891_v55  ;;  %5735 = vmatprep.subr.mxu1 %v5892_v58 }
 0x7da   :  { %5714 = vmatpush3.msra.mxu0 %v5891_v55  ;;  %5736 = vmatpush3.msra.mxu1 %v5892_v58 }
 0x7db   :  { %5687 = vmatmul.mubr.msk.f32.gmra.mxu0 %vm1074_vm12, %v7342_v12  ;;  %5709 = vmatmul.mubr.msk.f32.gmra.mxu1 %vm1074_vm12, %v7342_v12 }
 0x7dc   :  { %5715 = vmatprep.subr.mxu0 %v5893_v61  ;;  %5737 = vmatprep.subr.mxu1 %v5894_v63 }
 0x7dd   :  { %5716 = vmatpush3.msra.mxu0 %v5893_v61  ;;  %5727 = vmatprep.mubr.msk.f32.mxu0 %vm1074_vm12, %v7321_v22 }
 0x7de   :  { %5738 = vmatpush3.msra.mxu1 %v5894_v63  ;;  %5749 = vmatprep.mubr.msk.f32.mxu1 %vm1074_vm12, %v7321_v22 }
 0x7df   :  { %5717 = vmatprep.subr.mxu0 %v5895_v4  ;;  %5739 = vmatprep.subr.mxu1 %v5896_v7 }
 0x7e0   :  { %5718 = vmatpush3.msra.mxu0 %v5895_v4  ;;  %5740 = vmatpush3.msra.mxu1 %v5896_v7 }
 0x7e1   :  { %5719 = vmatprep.subr.mxu0 %v5897_v8  ;;  %5741 = vmatprep.subr.mxu1 %v5898_v13 }
 0x7e2   :  { %5720 = vmatpush3.msra.mxu0 %v5897_v8  ;;  %5742 = vmatpush3.msra.mxu1 %v5898_v13 }
 0x7e3   :  { %5721 = vmatprep.subr.mxu0 %v5899_v16  ;;  %5743 = vmatprep.subr.mxu1 %v5900_v17 }
 0x7e4   :  { %5722 = vmatpush3.msra.mxu0 %v5899_v16  ;;  %5744 = vmatpush3.msra.mxu1 %v5900_v17 }
 0x7e5   :  { %5723 = vmatprep.subr.mxu0 %v5901_v26  ;;  %5745 = vmatprep.subr.mxu1 %v5902_v31 }
 0x7e6   :  { %5724 = vmatpush3.msra.mxu0 %v5901_v26  ;;  %5746 = vmatpush3.msra.mxu1 %v5902_v31 }
 0x7e7   :  { %5725 = vmatprep.subr.mxu0 %v5903_v51  ;;  %5747 = vmatprep.subr.mxu1 %v5904_v1 }
 0x7e8   :  { %5726 = vmatpush3.msra.mxu0 %v5903_v51  ;;  %5748 = vmatpush3.msra.mxu1 %v5904_v1 }
 0x7e9   :  { %5728 = vmatmul.mubr.msk.f32.vlgmr.msra.gmra.mxu0 %vm1074_vm12, %v7323_v62  ;;  %5750 = vmatmul.mubr.msk.f32.vlgmr.msra.gmra.mxu1 %vm1074_vm12, %v7323_v62 }
 0x7ea   :  { %5755 = vmatprep.subr.mxu0 %v5905_v57  ;;  %5777 = vmatprep.subr.mxu1 %v5906_v44 }
 0x7eb   :  { %5730 = vmatprep.mubr.msk.f32.mxu0 %vm1074_vm12, %v7333_v23  ;;  %5752 = vmatprep.mubr.msk.f32.mxu1 %vm1074_vm12, %v7333_v23 }
 0x7ec   :  { %5756 = vmatpush3.msra.mxu0 %v5905_v57  ;;  %5778 = vmatpush3.msra.mxu1 %v5906_v44 }
 0x7ed   :  { %5757 = vmatprep.subr.mxu0 %v5907_v47  ;;  %5779 = vmatprep.subr.mxu1 %v5908_v38 }
 0x7ee   :  { %5758 = vmatpush3.msra.mxu0 %v5907_v47  ;;  %5780 = vmatpush3.msra.mxu1 %v5908_v38 }
 0x7ef   :  { %5731 = vmatmul.mubr.msk.f32.gmra.mxu0 %vm1074_vm12, %v7342_v12  ;;  %5753 = vmatmul.mubr.msk.f32.gmra.mxu1 %vm1074_vm12, %v7342_v12 }
 0x7f0   :  { %5759 = vmatprep.subr.mxu0 %v5909_v33  ;;  %5781 = vmatprep.subr.mxu1 %v5910_v20 }
 0x7f1   :  { %5760 = vmatpush3.msra.mxu0 %v5909_v33  ;;  %5771 = vmatprep.mubr.msk.f32.mxu0 %vm1074_vm12, %v7321_v22 }
 0x7f2   :  { %5782 = vmatpush3.msra.mxu1 %v5910_v20  ;;  %5793 = vmatprep.mubr.msk.f32.mxu1 %vm1074_vm12, %v7321_v22 }
 0x7f3   :  { %5761 = vmatprep.subr.mxu0 %v5911_v56  ;;  %5783 = vmatprep.subr.mxu1 %v5912_v15 }
 0x7f4   :  { %5762 = vmatpush3.msra.mxu0 %v5911_v56  ;;  %5784 = vmatpush3.msra.mxu1 %v5912_v15 }
 0x7f5   :  { %5763 = vmatprep.subr.mxu0 %v5913_v21  ;;  %5785 = vmatprep.subr.mxu1 %v5914_v2 }
 0x7f6   :  { %5764 = vmatpush3.msra.mxu0 %v5913_v21  ;;  %5786 = vmatpush3.msra.mxu1 %v5914_v2 }
 0x7f7   :  { %5765 = vmatprep.subr.mxu0 %v5915_v25  ;;  %5787 = vmatprep.subr.mxu1 %v5916_v43 }
 0x7f8   :  { %5766 = vmatpush3.msra.mxu0 %v5915_v25  ;;  %5788 = vmatpush3.msra.mxu1 %v5916_v43 }
 0x7f9   :  { %5767 = vmatprep.subr.mxu0 %v5917_v28  ;;  %5789 = vmatprep.subr.mxu1 %v5918_v32 }
 0x7fa   :  { %5768 = vmatpush3.msra.mxu0 %v5917_v28  ;;  %5790 = vmatpush3.msra.mxu1 %v5918_v32 }
 0x7fb   :  { %5769 = vmatprep.subr.mxu0 %v5919_v34  ;;  %5791 = vmatprep.subr.mxu1 %v5920_v10 }
 0x7fc   :  { %5770 = vmatpush3.msra.mxu0 %v5919_v34  ;;  %5792 = vmatpush3.msra.mxu1 %v5920_v10 }
 0x7fd   :  { %5772 = vmatmul.mubr.msk.f32.vlgmr.msra.gmra.mxu0 %vm1074_vm12, %v7323_v62  ;;  %5794 = vmatmul.mubr.msk.f32.vlgmr.msra.gmra.mxu1 %vm1074_vm12, %v7323_v62 }
 0x7fe   :  { %5799 = vmatprep.subr.mxu0 %v5921_v35  ;;  %5774 = vmatprep.mubr.msk.f32.mxu0 %vm1074_vm12, %v7333_v23 }
 0x7ff   :  { %5796 = vmatprep.mubr.msk.f32.mxu1 %vm1074_vm12, %v7333_v23  ;;  %5800 = vmatpush3.msra.mxu0 %v5921_v35 }
 0x800   :  { %5801 = vmatprep.subr.mxu0 %v5922_v39 }
 0x801   :  { %5802 = vmatpush3.msra.mxu0 %v5922_v39  ;;  %5797 = vmatmul.mubr.msk.f32.gmra.mxu1 %vm1074_vm12, %v7342_v12 }
 0x802   :  { %5775 = vmatmul.mubr.msk.f32.gmra.mxu0 %vm1074_vm12, %v7342_v12  ;;  %5803 = vmatprep.subr.mxu0 %v5923_v40 }
 0x803   :  { %5804 = vmatpush3.msra.mxu0 %v5923_v40  ;;  %5815 = vmatprep.mubr.msk.f32.mxu0 %vm1074_vm12, %v7321_v22  ;;  %v5927_v22 = vld [vmem:[%s8160_s7 + $0x208] sm:$0xff] }
 0x804   :  { %5805 = vmatprep.subr.mxu0 %v5924_v41  ;;  %3644 = vmatprep.mubr.f32.mxu1 %v3533_v52  ;;  %v3767_v52 = vld [vmem:[%s8166_s16 + $0x68] sm:$0xff] }
 0x805   :  { %5806 = vmatpush3.msra.mxu0 %v5924_v41  ;;  %v3537_v41 = vld [vmem:[%s8165_s14 + $0x28] sm:$0xff] }
 0x806   :  { %5807 = vmatprep.subr.mxu0 %v5925_v42 }
 0x807   :  { %5808 = vmatpush3.msra.mxu0 %v5925_v42  ;;  %v3540_v42 = vld [vmem:[%s8165_s14 + $0x40] sm:$0xff] }
 0x808   :  { %5809 = vmatprep.subr.mxu0 %v5926_v49 }
 0x809   :  { %5810 = vmatpush3.msra.mxu0 %v5926_v49  ;;  %v3769_v49 = vld [vmem:[%s8166_s16 + $0x78] sm:$0xff] }
 0x80a   :  { %5811 = vmatprep.subr.mxu0 %v5927_v22 }
 0x80b   :  { %5812 = vmatpush3.msra.mxu0 %v5927_v22  ;;  %v3768_v22 = vld [vmem:[%s8166_s16 + $0x70] sm:$0xff] }
 0x80c   :  { %5813 = vmatprep.subr.mxu0 %v5928_v50 }
 0x80d   :  { %5814 = vmatpush3.msra.mxu0 %v5928_v50  ;;  %v3543_v50 = vld [vmem:[%s8165_s14 + $0x58] sm:$0xff] }
 0x80e   :  { %5816 = vmatmul.mubr.msk.f32.vlgmr.msra.gmra.mxu0 %vm1074_vm12, %v7323_v62 }
 0x80f   :  { %5818 = vmatprep.mubr.msk.f32.mxu0 %vm1074_vm12, %v7333_v23 }
 0x812   :  { %5819 = vmatmul.mubr.msk.f32.gmra.mxu0 %vm1074_vm12, %v7342_v12 }
 0x813   :  { %5829 = vmatprep.mubr.msk.f32.mxu0 %vm1960_vm13, %v3534_v53  ;;  %v3766_v53 = vld [vmem:[%s8166_s16 + $0x60] sm:$0xff] }
 0x882   :  { %v5663_v55 = vpop.f32.mrf.mxu1  ;;  %v7571_v58 = vpop.f32.mrf.mxu0 }
 0x884   :  { %v7573_v62 = vpop.f32.mrf.mxu1  ;;  %v7575_v23 = vpop.f32.mrf.mxu0 }
 0x888   :  { %v5666_v61 = vpop.f32.mrf.mxu1  ;;  %v7577_v12 = vpop.f32.mrf.mxu0 }
 0x88a   :  { %v2928_v63 = vpop.f32.mrf.mxu1  ;;  %v7579_v4 = vpop.f32.mrf.mxu0 }
 0x895   :  { %v5707_v7 = vpop.f32.mrf.mxu1  ;;  %v5685_v8 = vpop.f32.mrf.mxu0 }
 0x897   :  { %v3088_v13 = vpop.f32.mrf.mxu1  ;;  %v3003_v16 = vpop.f32.mrf.mxu0 }
 0x89b   :  { %v5710_v17 = vpop.f32.mrf.mxu1  ;;  %v5688_v26 = vpop.f32.mrf.mxu0 }
 0x89d   :  { %v3098_v31 = vpop.f32.mrf.mxu1  ;;  %v3013_v51 = vpop.f32.mrf.mxu0 }
 0x8a9   :  { %v5751_v1 = vpop.f32.mrf.mxu1  ;;  %v7581_v57 = vpop.f32.mrf.mxu0 }
 0x8ab   :  { %v3258_v44 = vpop.f32.mrf.mxu1  ;;  %v7583_v47 = vpop.f32.mrf.mxu0 }
 0x8af   :  { %v5754_v38 = vpop.f32.mrf.mxu1  ;;  %v5732_v33 = vpop.f32.mrf.mxu0 }
 0x8b1   :  { %v3268_v20 = vpop.f32.mrf.mxu1  ;;  %v3183_v56 = vpop.f32.mrf.mxu0 }
 0x8bd   :  { %v5795_v15 = vpop.f32.mrf.mxu1  ;;  %v5773_v21 = vpop.f32.mrf.mxu0 }
 0x8bf   :  { %v3428_v2 = vpop.f32.mrf.mxu1  ;;  %v3343_v43 = vpop.f32.mrf.mxu0 }
 0x8c1   :  { %v5798_v25 = vpop.f32.mrf.mxu1 }
 0x8c2   :  { %5185 = vmatprep.subr.mxu1 %v5798_v25  ;;  %v5776_v32 = vpop.f32.mrf.mxu0 }
 0x8c3   :  { %v3438_v28 = vpop.f32.mrf.mxu1  ;;  %5186 = vmatpush3.msra.mxu1 %v5710_v17  ;;  %v3760_v17 = vld [vmem:[%s8166_s16 + $0x30] sm:$0xff] }
 0x8c4   :  { %5187 = vmatprep.subr.mxu1 %v3438_v28  ;;  %v3353_v34 = vpop.f32.mrf.mxu0 }
 0x8c5   :  { %5188 = vmatpush3.msra.mxu1 %v3098_v31  ;;  %v3758_v31 = vld [vmem:[%s8166_s16 + $0x20] sm:$0xff] }
 0x8c6   :  { %5189 = vmatprep.subr.mxu1 %v5795_v15 }
 0x8c7   :  { %5190 = vmatpush3.msra.mxu1 %v5707_v7  ;;  %v3764_v7 = vld [vmem:[%s8166_s16 + $0x50] sm:$0xff] }
 0x8c8   :  { %5191 = vmatprep.subr.mxu1 %v3428_v2 }
 0x8c9   :  { %5192 = vmatpush3.msra.mxu1 %v3088_v13  ;;  %v3762_v13 = vld [vmem:[%s8166_s16 + $0x40] sm:$0xff] }
 0x8ca   :  { %5193 = vmatprep.subr.mxu1 %v5776_v32 }
 0x8cb   :  { %5194 = vmatpush3.msra.mxu1 %v5688_v26  ;;  %v3759_v26 = vld [vmem:[%s8166_s16 + $0x28] sm:$0xff] }
 0x8cc   :  { %5195 = vmatprep.subr.mxu1 %v3353_v34 }
 0x8cd   :  { %5196 = vmatpush3.msra.mxu1 %v3013_v51  ;;  %v3757_v51 = vld [vmem:[%s8166_s16 + $0x18] sm:$0xff] }
 0x8ce   :  { %v5817_v10 = vpop.f32.mrf.mxu0  ;;  %5197 = vmatprep.subr.mxu1 %v5773_v21 }
 0x8cf   :  { %5198 = vmatpush3.msra.mxu1 %v5685_v8  ;;  %v3763_v8 = vld [vmem:[%s8166_s16 + $0x48] sm:$0xff] }
 0x8d0   :  { %v3513_v35 = vpop.f32.mrf.mxu0  ;;  %5199 = vmatprep.subr.mxu1 %v3343_v43  ;;  %v3556_v43 = vpop.permute.xlu0 %3555 }
 0x8d1   :  { %5200 = vmatpush3.msra.mxu1 %v3003_v16  ;;  %v3761_v16 = vld [vmem:[%s8166_s16 + $0x38] sm:$0xff] }
 0x8d2   :  { %v5820_v39 = vpop.f32.mrf.mxu0  ;;  %5201 = vmatprep.subr.mxu1 %v5754_v38 }
 0x8d3   :  { %5821 = vmatprep.subr.mxu0 %v5820_v39  ;;  %5202 = vmatpush3.msra.mxu1 %v5666_v61  ;;  %v3536_v61 = vld [vmem:[%s8165_s14 + $0x20] sm:$0xff] }
 0x8d4   :  { %v3523_v40 = vpop.f32.mrf.mxu0  ;;  %5822 = vmatpush3.msra.mxu0 %v5820_v39  ;;  %5203 = vmatprep.subr.mxu1 %v3268_v20 }
 0x8d5   :  { %5823 = vmatprep.subr.mxu0 %v3523_v40  ;;  %5204 = vmatpush3.msra.mxu1 %v2928_v63  ;;  %v3542_v63 = vld [vmem:[%s8165_s14 + $0x50] sm:$0xff] }
 0x8d6   :  { %5824 = vmatpush3.msra.mxu0 %v3523_v40  ;;  %5205 = vmatprep.subr.mxu1 %v5751_v1  ;;  %v3756_v1 = vld [vmem:[%s8166_s16 + $0x10] sm:$0xff] }
 0x8d7   :  { %5825 = vmatprep.subr.mxu0 %v5817_v10  ;;  %5206 = vmatpush3.msra.mxu1 %v5663_v55  ;;  %v3532_v55 = vld [vmem:[%s8165_s14] sm:$0xff] }
 0x8d8   :  { %5826 = vmatpush3.msra.mxu0 %v5817_v10  ;;  %5207 = vmatprep.subr.mxu1 %v3258_v44  ;;  %v3754_v44 = vld [vmem:[%s8166_s16] sm:$0xff] }
 0x8d9   :  { %5827 = vmatprep.subr.mxu0 %v3513_v35  ;;  %5208 = vmatpush3.msra.mxu1 %v7573_v62  ;;  %v3765_v62 = vld [vmem:[%s8166_s16 + $0x58] sm:$0xff] }
 0x8da   :  { %5828 = vmatpush3.msra.mxu0 %v3513_v35  ;;  %5209 = vmatprep.subr.mxu1 %v5732_v33 }
 0x8db   :  { %5210 = vmatpush3.msra.mxu1 %v7577_v12  ;;  %5830 = vmatmul.mubr.msk.f32.vlgmr.msra.gmra.mxu0 %vm1960_vm13, %v3537_v41  ;;  %v3539_v12 = vld [vmem:[%s8165_s14 + $0x38] sm:$0xff] }
 0x8dc   :  { %5211 = vmatprep.subr.mxu1 %v3183_v56  ;;  %5832 = vmatprep.mubr.msk.f32.mxu0 %vm1960_vm13, %v3540_v42  ;;  %v3551_v56 = vpop.permute.xlu1 %3550 }
 0x8dd   :  { %5212 = vmatpush3.msra.mxu1 %v7579_v4  ;;  %3798 = vmatprep.subr.mxu0 %v3769_v49  ;;  %v3541_v4 = vld [vmem:[%s8165_s14 + $0x48] sm:$0xff] }
 0x8de   :  { %5213 = vmatprep.subr.mxu1 %v7581_v57  ;;  %3799 = vmatpush1.msra.mxu0 %v3768_v22  ;;  %v3755_v57 = vld [vmem:[%s8166_s16 + $0x8] sm:$0xff]  ;;  %s8205_s16 = smov 16  }
 0x8df   :  { %5214 = vmatpush3.msra.mxu1 %v7571_v58  ;;  %5833 = vmatmul.mubr.msk.f32.gmra.mxu0 %vm1960_vm13, %v3543_v50  ;;  %v3535_v58 = vld [vmem:[%s8165_s14 + $0x18] sm:$0xff] }
 0x8e0   :  { %5215 = vmatprep.subr.mxu1 %v7583_v47  ;;  %3800 = vmatprep.subr.mxu0 %v3767_v52  ;;  %v3561_v41 = vpop.permute.xlu1 %3560 }
 0x8e1   :  { %5216 = vmatpush3.msra.mxu1 %v7575_v23  ;;  %3801 = vmatpush1.msra.mxu0 %v3766_v53  ;;  %v3538_v23 = vld [vmem:[%s8165_s14 + $0x30] sm:$0xff] }
 0x8e2   :  { %3645 = vmatmul.mubr.f32.vlgmr.msra.gmra.mxu1 %v3532_v55  ;;  %3802 = vmatprep.subr.mxu0 %v3765_v62 }
 0x8e3   :  { %3649 = vmatprep.mubr.f32.mxu1 %v3536_v61  ;;  %3846 = vmatprep.mubr.f32.mxu0 %v5936_v9 }
 0x8e4   :  { %3803 = vmatpush1.msra.mxu0 %v3764_v7 }
 0x8e5   :  { %3804 = vmatprep.subr.mxu0 %v3763_v8 }
 0x8e6   :  { %3650 = vmatmul.mubr.f32.gmra.mxu1 %v3535_v58  ;;  %3805 = vmatpush1.msra.mxu0 %v3762_v13  ;;  %v3566_v58 = vpop.permute.xlu0 %3565 }
 0x8e7   :  { %3654 = vmatprep.mubr.f32.mxu1 %v3539_v12  ;;  %3806 = vmatprep.subr.mxu0 %v3761_v16 }
 0x8e8   :  { %3807 = vmatpush1.msra.mxu0 %v3760_v17 }
 0x8e9   :  { %3808 = vmatprep.subr.mxu0 %v3759_v26 }
 0x8ea   :  { %3655 = vmatmul.mubr.f32.gmra.mxu1 %v3538_v23  ;;  %3809 = vmatpush1.msra.mxu0 %v3758_v31 }
 0x8eb   :  { %3659 = vmatprep.mubr.f32.mxu1 %v3542_v63  ;;  %3810 = vmatprep.subr.mxu0 %v3757_v51 }
 0x8ec   :  { %3811 = vmatpush1.msra.mxu0 %v3756_v1 }
 0x8ed   :  { %3812 = vmatprep.subr.mxu0 %v3755_v57 }
 0x8ee   :  { %3660 = vmatmul.mubr.f32.gmra.mxu1 %v3541_v4  ;;  %3813 = vmatpush1.msra.mxu0 %v3754_v44 }
 0x8ef   :  { %4308 = vmatprep.mubr.f32.mxu1 %v5936_v9 }
 0x99b   :  { %v5831_v33 = vpop.f32.mrf.mxu0 }
 0x99d   :  { %v3731_v2 = vpop.f32.mrf.mxu0 }
 0x99f   :  { %v5834_v10 = vpop.f32.mrf.mxu0 }
 0x9a1   :  { %v3741_v50 = vpop.f32.mrf.mxu0 }
 0x9a2   :  { %v5217_v47 = vpop.f32.mrf.mxu1 }
 0x9a4   :  { %v5218_v38 = vpop.f32.mrf.mxu1 }
 0x9a5   :  { %v5219_v20 = vadd.f32 %v5218_v38, %v5217_v47 }
 0x9a6   :  { %v5220_v15 = vpop.f32.mrf.mxu1 }
 0x9a7   :  { %v3647_v21 = vadd.f32 %v5219_v20, %v3551_v56  ;;  %v7813_v56 = vld [vmem:[%s8167_s17] sm:$0x3f] }
 0x9a8   :  { %v5221_v25 = vpop.f32.mrf.mxu1  ;;  %8214 = vst [vmem:[#allocation9_spill] sm:$0xff] %v7813_v56 }
 0x9a9   :  { %v3732_v28 = vadd.f32 %v3731_v2, %v3647_v21  ;;  %v5222_v32 = vadd.f32 %v5221_v25, %v5220_v15  ;;  %v7819_v15 = vrot.slane %v7813_v56, %v6049_v6 }
 0x9aa   :  { %v5223_v34 = vpop.f32.mrf.mxu1 }
 0x9ab   :  { %v3750_v35 = vmax.f32 %v3732_v28, 0.0  ;;  %v3652_v39 = vadd.f32 %v5222_v32, %v3556_v43  ;;  %8216 = vst [vmem:[#allocation10_spill] sm:$0xff] %v7819_v15  ;;  %v4168_v2 = vcombine.high %v7819_v15, %v7819_v15 }
 0x9ac   :  { %v5224_v40 = vpop.f32.mrf.mxu1 }
 0x9ad   :  { %v3737_v42 = vadd.f32 %v5831_v33, %v3652_v39  ;;  %v5225_v49 = vadd.f32 %v5224_v40, %v5223_v34  ;;  %4641 = vmatmul.mubr.msk.f32.vlgmr.msra.gmra.mxu0 %vm1074_vm12, %v3750_v35 }
 0x9ae   :  { %v5226_v22 = vpop.f32.mrf.mxu1  ;;  %3852 = vmatprep.mubr.f32.mxu0 %v5936_v9 }
 0x9af   :  { %v3751_v52 = vmax.f32 %v3737_v42, 0.0  ;;  %v3657_v53 = vadd.f32 %v5225_v49, %v3561_v41  ;;  %v4146_v49 = vld [vmem:[%s8168_s18] sm:$0x3] }
 0x9b0   :  { %v5227_v55 = vpop.f32.mrf.mxu1 }
 0x9b1   :  { %v5228_v62 = vadd.f32 %v5227_v55, %v5226_v22  ;;  %v3742_v61 = vadd.f32 %v3741_v50, %v3657_v53  ;;  %4642 = vmatmul.mubr.msk.f32.gmra.mxu0 %vm1074_vm12, %v3751_v52 }
 0x9b2   :  { %3858 = vmatprep.mubr.f32.mxu0 %v5936_v9 }
 0x9b3   :  { %v3662_v12 = vadd.f32 %v5228_v62, %v3566_v58  ;;  %v3752_v23 = vmax.f32 %v3742_v61, 0.0 }
 0x9b5   :  { %v3747_v63 = vadd.f32 %v5834_v10, %v3662_v12  ;;  %4643 = vmatmul.mubr.msk.f32.gmra.mxu0 %vm1074_vm12, %v3752_v23 }
 0x9b6   :  { %3864 = vmatprep.mubr.f32.mxu0 %v5936_v9 }
 0x9b7   :  { %v3753_v4 = vmax.f32 %v3747_v63, 0.0 }
 0x9b9   :  { %4644 = vmatmul.mubr.msk.f32.gmra.mxu0 %vm1074_vm12, %v3753_v4 }
 0x9ba   :  { %4237 = vmatprep.mubr.f32.mxu0 %v4168_v2 }
 0xa6d   :  { %v3848_v7 = vpop.f32.mrf.mxu0 }
 0xa6e   :  { %v7682_v8 = vmax.f32 %v3848_v7, 0.0 }
 0xa6f   :  { %v3850_v13 = vpop.f32.mrf.mxu0 }
 0xa70   :  { %8203 = vst [vmem:[#allocation3_spill] sm:$0xff] %v7682_v8  ;;  %v7684_v16 = vmax.f32 %v3850_v13, 0.0  ;;  %3975 = vrot.lane.b32.xlu1 %v7682_v8, %s5938_s4 }
 0xa71   :  { %v3854_v9 = vpop.f32.mrf.mxu0 }
 0xa72   :  { %8204 = vst [vmem:[#allocation4_spill] sm:$0xff] %v7684_v16  ;;  %3983 = vrot.lane.b32.xlu0 %v7684_v16, %s5938_s4  ;;  %v7704_v26 = vmax.f32 %v3854_v9, 0.0 }
 0xa73   :  { %v3856_v17 = vpop.f32.mrf.mxu0 }
 0xa74   :  { %3943 = vrot.lane.b32.xlu1 %v7682_v8, %s5934_s23  ;;  %8208 = vst [vmem:[#allocation5_spill] sm:$0xff] %v7704_v26  ;;  %v7708_v31 = vmax.f32 %v3856_v17, 0.0 }
 0xa75   :  { %v3860_v51 = vpop.f32.mrf.mxu0 }
 0xa76   :  { %3951 = vrot.lane.b32.xlu0 %v7684_v16, %s5934_s23  ;;  %8209 = vst [vmem:[#allocation6_spill] sm:$0xff] %v7708_v31  ;;  %v7728_v57 = vmax.f32 %v3860_v51, 0.0 }
 0xa77   :  { %v3862_v1 = vpop.f32.mrf.mxu0 }
 0xa78   :  { %3911 = vrot.lane.b32.xlu1 %v7682_v8, %s8205_s16  ;;  %8210 = vst [vmem:[#allocation7_spill] sm:$0xff] %v7728_v57  ;;  %v7732_v44 = vmax.f32 %v3862_v1, 0.0 }
 0xa79   :  { %v3866_v47 = vpop.f32.mrf.mxu0 }
 0xa7a   :  { %3919 = vrot.lane.b32.xlu0 %v7684_v16, %s8205_s16  ;;  %8211 = vst [vmem:[#allocation8_spill] sm:$0xff] %v7732_v44  ;;  %v7752_v33 = vmax.f32 %v3866_v47, 0.0 }
 0xa7b   :  { %v3868_v38 = vpop.f32.mrf.mxu0 }
 0xa7c   :  { %3879 = vrot.lane.b32.xlu1 %v7682_v8, %s8206_s25  ;;  %v7756_v20 = vmax.f32 %v3868_v38, 0.0 }
 0xa7e   :  { %3887 = vrot.lane.b32.xlu0 %v7684_v16, %s8206_s25 }
 0xa80   :  { %4081 = vrot.lane.b32.xlu1 %v7682_v8, %s8207_s28 }
 0xa82   :  { %4089 = vrot.lane.b32.xlu0 %v7684_v16, %s8207_s28 }
 0xa84   :  { %3977 = vrot.lane.b32.xlu1 %v7704_v26, %s5938_s4 }
 0xa86   :  { %3985 = vrot.lane.b32.xlu0 %v7708_v31, %s5938_s4 }
 0xa88   :  { %3945 = vrot.lane.b32.xlu1 %v7704_v26, %s5934_s23 }
 0xa8a   :  { %3953 = vrot.lane.b32.xlu0 %v7708_v31, %s5934_s23 }
 0xa8c   :  { %3913 = vrot.lane.b32.xlu1 %v7704_v26, %s8205_s16 }
 0xa8e   :  { %3921 = vrot.lane.b32.xlu0 %v7708_v31, %s8205_s16 }
 0xa90   :  { %3881 = vrot.lane.b32.xlu1 %v7704_v26, %s8206_s25 }
 0xa92   :  { %3889 = vrot.lane.b32.xlu0 %v7708_v31, %s8206_s25 }
 0xa94   :  { %4083 = vrot.lane.b32.xlu1 %v7704_v26, %s8207_s28 }
 0xa96   :  { %4091 = vrot.lane.b32.xlu0 %v7708_v31, %s8207_s28 }
 0xa98   :  { %3979 = vrot.lane.b32.xlu1 %v7728_v57, %s5938_s4 }
 0xa9a   :  { %3987 = vrot.lane.b32.xlu0 %v7732_v44, %s5938_s4 }
 0xa9c   :  { %3947 = vrot.lane.b32.xlu1 %v7728_v57, %s5934_s23 }
 0xa9e   :  { %3955 = vrot.lane.b32.xlu0 %v7732_v44, %s5934_s23 }
 0xaa0   :  { %3915 = vrot.lane.b32.xlu1 %v7728_v57, %s8205_s16 }
 0xaa2   :  { %3923 = vrot.lane.b32.xlu0 %v7732_v44, %s8205_s16 }
 0xaa4   :  { %3883 = vrot.lane.b32.xlu1 %v7728_v57, %s8206_s25 }
 0xaa6   :  { %3891 = vrot.lane.b32.xlu0 %v7732_v44, %s8206_s25 }
 0xaa8   :  { %4085 = vrot.lane.b32.xlu1 %v7728_v57, %s8207_s28 }
 0xaaa   :  { %4093 = vrot.lane.b32.xlu0 %v7732_v44, %s8207_s28 }
 0xaac   :  { %3981 = vrot.lane.b32.xlu1 %v7752_v33, %s5938_s4 }
 0xaae   :  { %3989 = vrot.lane.b32.xlu0 %v7756_v20, %s5938_s4 }
 0xab0   :  { %4053 = vrot.lane.b32.xlu1 %v7728_v57, %s8212_s27 }
 0xab2   :  { %4061 = vrot.lane.b32.xlu0 %v7732_v44, %s8212_s27 }
 0xab4   :  { %3949 = vrot.lane.b32.xlu1 %v7752_v33, %s5934_s23 }
 0xab6   :  { %3957 = vrot.lane.b32.xlu0 %v7756_v20, %s5934_s23  ;;  %s8213_s23 = smov 127  }
 0xab8   :  { %3917 = vrot.lane.b32.xlu1 %v7752_v33, %s8205_s16 }
 0xaba   :  { %4059 = vrot.lane.b32.xlu0 %v7708_v31, %s8212_s27 }
 0xabc   :  { %3885 = vrot.lane.b32.xlu1 %v7752_v33, %s8206_s25 }
 0xabe   :  { %3925 = vrot.lane.b32.xlu0 %v7756_v20, %s8205_s16 }
 0xac0   :  { %4087 = vrot.lane.b32.xlu1 %v7752_v33, %s8207_s28 }
 0xac2   :  { %4057 = vrot.lane.b32.xlu0 %v7684_v16, %s8212_s27 }
 0xac4   :  { %4055 = vrot.lane.b32.xlu1 %v7752_v33, %s8212_s27 }
 0xac6   :  { %3893 = vrot.lane.b32.xlu0 %v7756_v20, %s8206_s25 }
 0xac8   :  { %4051 = vrot.lane.b32.xlu1 %v7704_v26, %s8212_s27 }
 0xaca   :  { %4029 = vrot.lane.b32.xlu0 %v7732_v44, %s8213_s23 }
 0xacc   :  { %4049 = vrot.lane.b32.xlu1 %v7682_v8, %s8212_s27 }
 0xace   :  { %4095 = vrot.lane.b32.xlu0 %v7756_v20, %s8207_s28 }
 0xad0   :  { %4023 = vrot.lane.b32.xlu1 %v7752_v33, %s8213_s23 }
 0xad2   :  { %4027 = vrot.lane.b32.xlu0 %v7708_v31, %s8213_s23 }
 0xad4   :  { %4021 = vrot.lane.b32.xlu1 %v7728_v57, %s8213_s23 }
 0xad6   :  { %4063 = vrot.lane.b32.xlu0 %v7756_v20, %s8212_s27 }
 0xad8   :  { %4019 = vrot.lane.b32.xlu1 %v7704_v26, %s8213_s23 }
 0xada   :  { %4025 = vrot.lane.b32.xlu0 %v7684_v16, %s8213_s23 }
 0xadc   :  { %4017 = vrot.lane.b32.xlu1 %v7682_v8, %s8213_s23 }
 0xade   :  { %4031 = vrot.lane.b32.xlu0 %v7756_v20, %s8213_s23 }
 0xae0   :  { %4119 = vrot.lane.b32.xlu1 %v7752_v33, %s8215_s12 }
 0xae2   :  { %v3976_v21 = vpop.permute.xlu1 %3975  ;;  %4125 = vrot.lane.b32.xlu0 %v7732_v44, %s8215_s12 }
 0xae4   :  { %4117 = vrot.lane.b32.xlu1 %v7728_v57, %s8215_s12  ;;  %v3984_v25 = vpop.permute.xlu0 %3983 }
 0xae5   :  { %v7829_v43 = vsel %vm145_vm10, %v3976_v21, %v3984_v25  ;;  %v7833_v28 = vsel %vm145_vm10, %v3984_v25, %v3976_v21 }
 0xae6   :  { %v3944_v32 = vpop.permute.xlu1 %3943  ;;  %4127 = vrot.lane.b32.xlu0 %v7756_v20, %s8215_s12 }
 0xae8   :  { %4115 = vrot.lane.b32.xlu1 %v7704_v26, %s8215_s12  ;;  %v3952_v34 = vpop.permute.xlu0 %3951 }
 0xae9   :  { %v7841_v10 = vsel %vm123_vm4, %v3944_v32, %v3952_v34  ;;  %v7845_v35 = vsel %vm123_vm4, %v3952_v34, %v3944_v32 }
 0xaea   :  { %v3912_v39 = vpop.permute.xlu1 %3911  ;;  %4123 = vrot.lane.b32.xlu0 %v7708_v31, %s8215_s12 }
 0xaec   :  { %4113 = vrot.lane.b32.xlu1 %v7682_v8, %s8215_s12  ;;  %v3920_v40 = vpop.permute.xlu0 %3919 }
 0xaed   :  { %v7853_v41 = vsel %vm101_vm3, %v3912_v39, %v3920_v40  ;;  %v7857_v42 = vsel %vm101_vm3, %v3920_v40, %v3912_v39 }
 0xaee   :  { %v3880_v22 = vpop.permute.xlu1 %3879  ;;  %4121 = vrot.lane.b32.xlu0 %v7684_v16, %s8215_s12 }
 0xaf0   :  { %4149 = vperm.xlu1 %5847, %v4146_v49   ;;  %v3888_v50 = vpop.permute.xlu0 %3887 }
 0xaf1   :  { %v7866_v52 = vsel %vm80_vm8, %v3880_v22, %v3888_v50  ;;  %v7870_v53 = vsel %vm80_vm8, %v3888_v50, %v3880_v22 }
 0xaf2   :  { %v4082_v55 = vpop.permute.xlu1 %4081 }
 0xaf4   :  { %v4090_v62 = vpop.permute.xlu0 %4089 }
 0xaf5   :  { %v7874_v61 = vsel %vm232_vm2, %v4082_v55, %v4090_v62  ;;  %v7878_v58 = vsel %vm232_vm2, %v4090_v62, %v4082_v55 }
 0xaf6   :  { %v3978_v12 = vpop.permute.xlu1 %3977 }
 0xaf8   :  { %v3986_v23 = vpop.permute.xlu0 %3985 }
 0xaf9   :  { %v3992_v56 = vsel %vm145_vm10, %v3978_v12, %v3986_v23  ;;  %v3996_v57 = vsel %vm145_vm10, %v3986_v23, %v3978_v12 }
 0xafa   :  { %v3946_v63 = vpop.permute.xlu1 %3945 }
 0xafc   :  { %v3954_v4 = vpop.permute.xlu0 %3953 }
 0xafe   :  { %v7880_v7 = vpop.permute.xlu1 %3913 }
 0xb00   :  { %v7882_v13 = vpop.permute.xlu0 %3921 }
 0xb02   :  { %v7884_v9 = vpop.permute.xlu1 %3881 }
 0xb04   :  { %v7886_v17 = vpop.permute.xlu0 %3889 }
 0xb06   :  { %v7888_v51 = vpop.permute.xlu1 %4083 }
 0xb08   :  { %v7890_v1 = vpop.permute.xlu0 %4091 }
 0xb0a   :  { %v3980_v47 = vpop.permute.xlu1 %3979 }
 0xb0c   :  { %v3988_v38 = vpop.permute.xlu0 %3987 }
 0xb0d   :  { %v3993_v55 = vsel %vm145_vm10, %v3980_v47, %v3988_v38  ;;  %v3997_v6 = vsel %vm145_vm10, %v3988_v38, %v3980_v47  ;;  %v4001_v38 = vmul.f32 %v3996_v57, %v6334_v11 }
 0xb0e   :  { %v3948_v21 = vpop.permute.xlu1 %3947  ;;  %v4004_v44 = vmul.f32 %v3993_v55, %v6354_v30 }
 0xb10   :  { %v3956_v2 = vpop.permute.xlu0 %3955 }
 0xb11   :  { %v3961_v23 = vsel %vm123_vm4, %v3948_v21, %v3956_v2  ;;  %v3965_v57 = vsel %vm123_vm4, %v3956_v2, %v3948_v21 }
 0xb12   :  { %v3916_v25 = vpop.permute.xlu1 %3915  ;;  %v3971_v21 = vmul.f32 %v3965_v57, %v6291_v36 }
 0xb14   :  { %v3924_v32 = vpop.permute.xlu0 %3923 }
 0xb16   :  { %v7892_v34 = vpop.permute.xlu1 %3883 }
 0xb18   :  { %v7894_v39 = vpop.permute.xlu0 %3891 }
 0xb1a   :  { %v7896_v40 = vpop.permute.xlu1 %4085 }
 0xb1c   :  { %v7898_v49 = vpop.permute.xlu0 %4093 }
 0xb1e   :  { %v3982_v22 = vpop.permute.xlu1 %3981 }
 0xb20   :  { %v3990_v50 = vpop.permute.xlu0 %3989 }
 0xb21   :  { %v3994_v62 = vsel %vm145_vm10, %v3982_v22, %v3990_v50  ;;  %v3998_v15 = vsel %vm145_vm10, %v3990_v50, %v3982_v22  ;;  %v4003_v22 = vmul.f32 %v3997_v6, %v6334_v11  ;;  %v4000_v50 = vmul.f32 %v7829_v43, %v6354_v30 }
 0xb22   :  { %v4005_v8 = vmul.f32 %v3998_v15, %v6334_v11  ;;  %v4006_v16 = vmul.f32 %v3994_v62, %v6354_v30  ;;  %v7910_v26 = vpop.permute.xlu1 %4053  ;;  %v4002_v15 = vmul.f32 %v3992_v56, %v6354_v30  ;;  %v3964_v43 = vsel %vm123_vm4, %v3954_v4, %v3946_v63 }
 0xb24   :  { %4173 = vmatprep.subr.mxu0 %v4006_v16  ;;  %v7917_v31 = vpop.permute.xlu0 %4061  ;;  %v3999_v16 = vmul.f32 %v7833_v28, %v6334_v11  ;;  %v3960_v11 = vsel %vm123_vm4, %v3946_v63, %v3954_v4  ;;  %v3972_v28 = vmul.f32 %v3961_v23, %v6294_v37  ;;  %v3967_v4 = vmul.f32 %v7845_v35, %v6291_v36 }
 0xb25   :  { %4174 = vmatpush1.msra.mxu0 %v4005_v8  ;;  %v3970_v2 = vmul.f32 %v3960_v11, %v6294_v37  ;;  %v3932_v35 = vsel %vm101_vm3, %v7882_v13, %v7880_v7 }
 0xb26   :  { %v3950_v47 = vpop.permute.xlu1 %3949  ;;  %4175 = vmatprep.subr.mxu0 %v4004_v44  ;;  %v3937_v57 = vmul.f32 %v3932_v35, %v6260_v19 }
 0xb27   :  { %4176 = vmatpush1.msra.mxu0 %v4003_v22  ;;  %v3969_v22 = vmul.f32 %v3964_v43, %v6291_v36  ;;  %v3896_v43 = vsel %vm80_vm8, %v7884_v9, %v7886_v17 }
 0xb28   :  { %4177 = vmatprep.subr.mxu0 %v4002_v15  ;;  %v3958_v12 = vpop.permute.xlu0 %3957  ;;  %v3968_v15 = vmul.f32 %v7841_v10, %v6294_v37 }
 0xb29   :  { %v3962_v6 = vsel %vm123_vm4, %v3950_v47, %v3958_v12  ;;  %v3966_v8 = vsel %vm123_vm4, %v3958_v12, %v3950_v47  ;;  %4178 = vmatpush1.msra.mxu0 %v4001_v38  ;;  %v3929_v47 = vsel %vm101_vm3, %v3916_v25, %v3924_v32  ;;  %v3933_v12 = vsel %vm101_vm3, %v3924_v32, %v3916_v25 }
 0xb2a   :  { %v3973_v30 = vmul.f32 %v3966_v8, %v6291_v36  ;;  %v3974_v44 = vmul.f32 %v3962_v6, %v6294_v37  ;;  %v3918_v56 = vpop.permute.xlu1 %3917  ;;  %4179 = vmatprep.subr.mxu0 %v4000_v50  ;;  %v3928_v36 = vsel %vm101_vm3, %v7880_v7, %v7882_v13  ;;  %v3940_v23 = vmul.f32 %v3929_v47, %v6273_v27 }
 0xb2b   :  { %4180 = vmatpush1.msra.mxu0 %v3999_v16  ;;  %v3939_v32 = vmul.f32 %v3933_v12, %v6260_v19  ;;  %v3938_v6 = vmul.f32 %v3928_v36, %v6273_v27  ;;  %v3935_v13 = vmul.f32 %v7857_v42, %v6260_v19  ;;  %v4106_v36 = vmul.f32 %v7878_v58, %v6266_v24 }
 0xb2c   :  { %4181 = vmatprep.subr.mxu0 %v3974_v44  ;;  %v7941_v55 = vpop.permute.xlu0 %4059  ;;  %v3897_v44 = vsel %vm80_vm8, %v7892_v34, %v7894_v39 }
 0xb2d   :  { %4182 = vmatpush1.msra.mxu0 %v3973_v30  ;;  %v3936_v30 = vmul.f32 %v7853_v41, %v6273_v27 }
 0xb2e   :  { %v3886_v62 = vpop.permute.xlu1 %3885  ;;  %4183 = vmatprep.subr.mxu0 %v3972_v28  ;;  %v3900_v28 = vsel %vm80_vm8, %v7886_v17, %v7884_v9  ;;  %v3903_v17 = vmul.f32 %v7870_v53, %v6311_v48 }
 0xb2f   :  { %4184 = vmatpush1.msra.mxu0 %v3971_v21  ;;  %v3908_v21 = vmul.f32 %v3897_v44, %v6318_v54 }
 0xb30   :  { %4185 = vmatprep.subr.mxu0 %v3970_v2  ;;  %v3926_v63 = vpop.permute.xlu0 %3925  ;;  %v3906_v2 = vmul.f32 %v3896_v43, %v6318_v54 }
 0xb31   :  { %v3930_v38 = vsel %vm101_vm3, %v3918_v56, %v3926_v63  ;;  %v3934_v50 = vsel %vm101_vm3, %v3926_v63, %v3918_v56  ;;  %4186 = vmatpush1.msra.mxu0 %v3969_v22  ;;  %v3905_v22 = vmul.f32 %v3900_v28, %v6311_v48  ;;  %v4103_v63 = vsel %vm232_vm2, %v7898_v49, %v7896_v40 }
 0xb32   :  { %v3941_v37 = vmul.f32 %v3934_v50, %v6260_v19  ;;  %v3942_v10 = vmul.f32 %v3930_v38, %v6273_v27  ;;  %v4088_v16 = vpop.permute.xlu1 %4087  ;;  %4187 = vmatprep.subr.mxu0 %v3968_v15  ;;  %v3901_v27 = vsel %vm80_vm8, %v7894_v39, %v7892_v34  ;;  %v3904_v15 = vmul.f32 %v7866_v52, %v6318_v54 }
 0xb33   :  { %4188 = vmatpush1.msra.mxu0 %v3967_v4  ;;  %v3907_v39 = vmul.f32 %v3901_v27, %v6311_v48  ;;  %v4102_v38 = vsel %vm232_vm2, %v7890_v1, %v7888_v51  ;;  %v4098_v50 = vsel %vm232_vm2, %v7888_v51, %v7890_v1  ;;  %v4110_v12 = vmul.f32 %v4103_v63, %v6266_v24 }
 0xb34   :  { %4189 = vmatprep.subr.mxu0 %v3942_v10  ;;  %v7969_v25 = vpop.permute.xlu0 %4057  ;;  %v4105_v51 = vmul.f32 %v7874_v61, %v6277_v29  ;;  %v4071_v1 = vsel %vm210_vm1, %v7917_v31, %v7910_v26 }
 0xb35   :  { %4190 = vmatpush1.msra.mxu0 %v3941_v37  ;;  %v4108_v37 = vmul.f32 %v4102_v38, %v6266_v24 }
 0xb36   :  { %v7973_v8 = vpop.permute.xlu1 %4055  ;;  %4191 = vmatprep.subr.mxu0 %v3940_v23 }
 0xb37   :  { %4192 = vmatpush1.msra.mxu0 %v3939_v32 }
 0xb38   :  { %4193 = vmatprep.subr.mxu0 %v3938_v6  ;;  %v3894_v7 = vpop.permute.xlu0 %3893 }
 0xb39   :  { %v3898_v56 = vsel %vm80_vm8, %v3886_v62, %v3894_v7  ;;  %v3902_v11 = vsel %vm80_vm8, %v3894_v7, %v3886_v62  ;;  %4194 = vmatpush1.msra.mxu0 %v3937_v57  ;;  %v4078_v57 = vmul.f32 %v4071_v1, %v6256_v5 }
 0xb3a   :  { %v3909_v41 = vmul.f32 %v3902_v11, %v6311_v48  ;;  %v3910_v19 = vmul.f32 %v3898_v56, %v6318_v54  ;;  %v4052_v42 = vpop.permute.xlu1 %4051  ;;  %4195 = vmatprep.subr.mxu0 %v3936_v30  ;;  %v4099_v54 = vsel %vm232_vm2, %v7896_v40, %v7898_v49 }
 0xb3b   :  { %4196 = vmatpush1.msra.mxu0 %v3935_v13  ;;  %v4109_v49 = vmul.f32 %v4099_v54, %v6277_v29  ;;  %v4070_v6 = vsel %vm210_vm1, %v7941_v55, %v4052_v42 }
 0xb3c   :  { %4197 = vmatprep.subr.mxu0 %v3910_v19  ;;  %v8003_v34 = vpop.permute.xlu0 %4029  ;;  %v4076_v7 = vmul.f32 %v4070_v6, %v6256_v5 }
 0xb3d   :  { %4198 = vmatpush1.msra.mxu0 %v3909_v41 }
 0xb3e   :  { %v4050_v62 = vpop.permute.xlu1 %4049  ;;  %4199 = vmatprep.subr.mxu0 %v3908_v21 }
 0xb3f   :  { %4200 = vmatpush1.msra.mxu0 %v3907_v39  ;;  %v4065_v13 = vsel %vm210_vm1, %v4050_v62, %v7969_v25 }
 0xb40   :  { %4201 = vmatprep.subr.mxu0 %v3906_v2  ;;  %v4096_v9 = vpop.permute.xlu0 %4095  ;;  %v4073_v27 = vmul.f32 %v4065_v13, %v6253_v18 }
 0xb41   :  { %v4100_v4 = vsel %vm232_vm2, %v4088_v16, %v4096_v9  ;;  %v4104_v47 = vsel %vm232_vm2, %v4096_v9, %v4088_v16  ;;  %4202 = vmatpush1.msra.mxu0 %v3905_v22  ;;  %v4107_v16 = vmul.f32 %v4098_v50, %v6277_v29 }
 0xb42   :  { %v4111_v52 = vmul.f32 %v4100_v4, %v6277_v29  ;;  %v4112_v48 = vmul.f32 %v4104_v47, %v6266_v24  ;;  %v4024_v53 = vpop.permute.xlu1 %4023  ;;  %4203 = vmatprep.subr.mxu0 %v3904_v15  ;;  %v4067_v24 = vsel %vm210_vm1, %v7910_v26, %v7917_v31  ;;  %v4069_v31 = vsel %vm210_vm1, %v7969_v25, %v4050_v62 }
 0xb43   :  { %4204 = vmatpush1.msra.mxu0 %v3903_v17  ;;  %v4077_v26 = vmul.f32 %v4067_v24, %v6253_v18  ;;  %v8220_v24 = vld [vmem:[#allocation9_spill] sm:$0xff] }
 0xb44   :  { %4205 = vmatprep.subr.mxu0 %v4112_v48  ;;  %v4028_v40 = vpop.permute.xlu0 %4027 }
 0xb45   :  { %4206 = vmatpush2.msra.mxu0 %v4111_v52 }
 0xb46   :  { %v4022_v10 = vpop.permute.xlu1 %4021  ;;  %4207 = vmatprep.subr.mxu0 %v4110_v12  ;;  %v4015_v12 = vmul.f32 %v7752_v33, %v6215_v59 }
 0xb47   :  { %4208 = vmatpush2.msra.mxu0 %v4109_v49  ;;  %v4039_v41 = vsel %vm188_vm0, %v8003_v34, %v4022_v10 }
 0xb48   :  { %4209 = vmatprep.subr.mxu0 %v4108_v37  ;;  %v4064_v35 = vpop.permute.xlu0 %4063  ;;  %v4046_v21 = vmul.f32 %v4039_v41, %v6237_v0 }
 0xb49   :  { %v4068_v23 = vsel %vm210_vm1, %v7973_v8, %v4064_v35  ;;  %v4072_v32 = vsel %vm210_vm1, %v4064_v35, %v7973_v8  ;;  %4210 = vmatpush2.msra.mxu0 %v4107_v16  ;;  %v4066_v8 = vsel %vm210_vm1, %v4052_v42, %v7941_v55  ;;  %v4074_v55 = vmul.f32 %v4069_v31, %v6256_v5  ;;  %v8218_v16 = vld [vmem:[#allocation8_spill] sm:$0xff]  ;;  %v8219_v35 = vld [vmem:[#allocation7_spill] sm:$0xff] }
 0xb4a   :  { %v4079_v29 = vmul.f32 %v4068_v23, %v6253_v18  ;;  %v4080_v61 = vmul.f32 %v4072_v32, %v6256_v5  ;;  %v4020_v58 = vpop.permute.xlu1 %4019  ;;  %4211 = vmatprep.subr.mxu0 %v4106_v36  ;;  %v4075_v56 = vmul.f32 %v4066_v8, %v6253_v18  ;;  %v4035_v42 = vsel %vm188_vm0, %v4022_v10, %v8003_v34  ;;  %v8222_v8 = vld [vmem:[#allocation4_spill] sm:$0xff] }
 0xb4b   :  { %4212 = vmatpush2.msra.mxu0 %v4105_v51  ;;  %v4038_v28 = vsel %vm188_vm0, %v4028_v40, %v4020_v58  ;;  %v4034_v39 = vsel %vm188_vm0, %v4020_v58, %v4028_v40  ;;  %v4045_v62 = vmul.f32 %v4035_v42, %v6242_v14  ;;  %v8217_v40 = vld [vmem:[#allocation6_spill] sm:$0xff]  ;;  %v4014_v36 = vmul.f32 %v8218_v16, %v6218_v60 }
 0xb4c   :  { %4213 = vmatprep.subr.mxu0 %v4080_v61  ;;  %v4026_v30 = vpop.permute.xlu0 %4025  ;;  %v4044_v22 = vmul.f32 %v4038_v28, %v6237_v0  ;;  %v4043_v17 = vmul.f32 %v4034_v39, %v6242_v14  ;;  %v4012_v49 = vmul.f32 %v8217_v40, %v6218_v60  ;;  %v4013_v51 = vmul.f32 %v8219_v35, %v6215_v59  ;;  %v8221_v61 = vld [vmem:[#allocation5_spill] sm:$0xff] }
 0xb4d   :  { %4214 = vmatpush2.msra.mxu0 %v4079_v29  ;;  %v4153_v29 = vcombine.high %v8220_v24, %v8220_v24  ;;  %v4011_v58 = vmul.f32 %v8221_v61, %v6215_v59 }
 0xb4e   :  { %v4018_v44 = vpop.permute.xlu1 %4017  ;;  %4215 = vmatprep.subr.mxu0 %v4078_v57 }
 0xb4f   :  { %4216 = vmatpush2.msra.mxu0 %v4077_v26  ;;  %v4037_v34 = vsel %vm188_vm0, %v4026_v30, %v4018_v44  ;;  %v4033_v15 = vsel %vm188_vm0, %v4018_v44, %v4026_v30  ;;  %v4010_v30 = vmul.f32 %v8222_v8, %v6218_v60 }
 0xb50   :  { %4217 = vmatprep.subr.mxu0 %v4076_v7  ;;  %v4032_v11 = vpop.permute.xlu0 %4031  ;;  %v4042_v63 = vmul.f32 %v4037_v34, %v6237_v0  ;;  %v4041_v47 = vmul.f32 %v4033_v15, %v6242_v14  ;;  %v8223_v7 = vld [vmem:[#allocation3_spill] sm:$0xff] }
 0xb51   :  { %v4036_v19 = vsel %vm188_vm0, %v4024_v53, %v4032_v11  ;;  %v4040_v25 = vsel %vm188_vm0, %v4032_v11, %v4024_v53  ;;  %4218 = vmatpush2.msra.mxu0 %v4075_v56  ;;  %v4009_v13 = vmul.f32 %v8223_v7, %v6215_v59 }
 0xb52   :  { %v4047_v5 = vmul.f32 %v4036_v19, %v6242_v14  ;;  %v4048_v43 = vmul.f32 %v4040_v25, %v6237_v0  ;;  %v4120_v18 = vpop.permute.xlu1 %4119  ;;  %4219 = vmatprep.subr.mxu0 %v4074_v55  ;;  %v4016_v14 = vmul.f32 %v7756_v20, %v6218_v60  ;;  %v8224_v55 = vld [vmem:[#allocation2_spill] sm:$0xff] }
 0xb53   :  { %4220 = vmatpush2.msra.mxu0 %v4073_v27  ;;  %v4167_v11 = vrot.slane %v4153_v29, %v8224_v55  ;;  %v8225_v60 = vld [vmem:[#allocation10_spill] sm:$0xff] }
 0xb54   :  { %4221 = vmatprep.subr.mxu0 %v4048_v43  ;;  %v4126_v2 = vpop.permute.xlu0 %4125 }
 0xb55   :  { %4222 = vmatpush2.msra.mxu0 %v4047_v5 }
 0xb56   :  { %v4118_v9 = vpop.permute.xlu1 %4117  ;;  %4223 = vmatprep.subr.mxu0 %v4046_v21 }
 0xb57   :  { %4224 = vmatpush2.msra.mxu0 %v4045_v62  ;;  %v4135_v54 = vsel %vm254_vm7, %v4126_v2, %v4118_v9  ;;  %v4131_v53 = vsel %vm254_vm7, %v4118_v9, %v4126_v2 }
 0xb58   :  { %4225 = vmatprep.subr.mxu0 %v4044_v22  ;;  %v4128_v4 = vpop.permute.xlu0 %4127  ;;  %v4142_v37 = vmul.f32 %v4135_v54, %v6306_v46  ;;  %v4141_v20 = vmul.f32 %v4131_v53, %v6303_v45 }
 0xb59   :  { %v4132_v52 = vsel %vm254_vm7, %v4120_v18, %v4128_v4  ;;  %v4136_v48 = vsel %vm254_vm7, %v4128_v4, %v4120_v18  ;;  %4226 = vmatpush2.msra.mxu0 %v4043_v17 }
 0xb5a   :  { %v4143_v38 = vmul.f32 %v4132_v52, %v6303_v45  ;;  %v4144_v0 = vmul.f32 %v4136_v48, %v6306_v46  ;;  %v4116_v50 = vpop.permute.xlu1 %4115  ;;  %4227 = vmatprep.subr.mxu0 %v4042_v63 }
 0xb5b   :  { %4228 = vmatpush2.msra.mxu0 %v4041_v47 }
 0xb5c   :  { %4229 = vmatprep.subr.mxu0 %v4016_v14  ;;  %4268 = vmatprep.subr.mxu1 %v4144_v0  ;;  %v4124_v10 = vpop.permute.xlu0 %4123 }
 0xb5d   :  { %v4130_v1 = vsel %vm254_vm7, %v4116_v50, %v4124_v10  ;;  %v4134_v33 = vsel %vm254_vm7, %v4124_v10, %v4116_v50  ;;  %4230 = vmatpush2.msra.mxu0 %v4015_v12  ;;  %4269 = vmatpush1.msra.mxu1 %v4143_v38 }
 0xb5e   :  { %v4139_v23 = vmul.f32 %v4130_v1, %v6303_v45  ;;  %v4140_v32 = vmul.f32 %v4134_v33, %v6306_v46  ;;  %4231 = vmatprep.subr.mxu0 %v4014_v36  ;;  %4270 = vmatprep.subr.mxu1 %v4142_v37  ;;  %v4114_v6 = vpop.permute.xlu1 %4113 }
 0xb5f   :  { %4232 = vmatpush2.msra.mxu0 %v4013_v51  ;;  %4271 = vmatpush1.msra.mxu1 %v4141_v20 }
 0xb60   :  { %4233 = vmatprep.subr.mxu0 %v4012_v49  ;;  %4272 = vmatprep.subr.mxu1 %v4140_v32  ;;  %v4122_v57 = vpop.permute.xlu0 %4121 }
 0xb61   :  { %v4129_v26 = vsel %vm254_vm7, %v4114_v6, %v4122_v57  ;;  %v4133_v31 = vsel %vm254_vm7, %v4122_v57, %v4114_v6  ;;  %4234 = vmatpush2.msra.mxu0 %v4011_v58  ;;  %4273 = vmatpush1.msra.mxu1 %v4139_v23 }
 0xb62   :  { %v4137_v44 = vmul.f32 %v4129_v26, %v6303_v45  ;;  %v4138_v56 = vmul.f32 %v4133_v31, %v6306_v46  ;;  %4235 = vmatprep.subr.mxu0 %v4010_v30 }
 0xb63   :  { %4236 = vmatpush2.msra.mxu0 %v4009_v13 }
 0xb64   :  { %4238 = vmatmul.mubr.f32.vlgmr.msra.gmra.mxu0 %v8225_v60  ;;  %4274 = vmatprep.subr.mxu1 %v4138_v56 }
 0xb65   :  { %4275 = vmatpush1.msra.mxu1 %v4137_v44 }
 0xb66   :  { %4645 = vmatmul.mubr.msk.f32.vlgmr.msra.gmra.mxu1 %vm1960_vm13, %v4167_v11 }
 0xb6b   :  { %v4150_v3 = vpop.permute.xlu1 %4149 }
 0xc24   :  { %v4239_v27 = vpop.f32.mrf.mxu0 }
 0xc25   :  { %v4240_v41 = vadd.f32 %v4239_v27, %v4150_v3 }
 0xc26   :  { %v4241_v19 = vpop.f32.mrf.mxu0  ;;  %v4310_v25 = vpop.f32.mrf.mxu1 }
 0xc27   :  { %v4242_v59 = vadd.f32 %v4241_v19, %v4150_v3  ;;  %v4311_v42 = vadd.f32 %v4310_v25, %v4240_v41 }
 0xc28   :  { %v4312_v45 = vpop.f32.mrf.mxu1 }
 0xc29   :  { %v4315_v5 = vsub.f32 0.0, %v4311_v42  ;;  %v4313_v46 = vadd.f32 %v4312_v45, %v4242_v59 }
 0xc2b   :  { %v4317_v43 = vmul.f32 1.442695, %v4315_v5  ;;  %v4316_v18 = vsub.f32 0.0, %v4313_v46 }
 0xc2d   :  { %5849 = vpow2.f32 %v4317_v43  ;;  %v4319_v28 = vmul.f32 1.442695, %v4316_v18 }
 0xc2f   :  { %5851 = vpow2.f32 %v4319_v28 }
 0xc3a   :  { %v5850_v21 = vpop.eup %5849 }
 0xc3b   :  { %v4321_v39 = vadd.f32 1.0, %v5850_v21 }
 0xc3c   :  { %v5852_v2 = vpop.eup %5851 }
 0xc3d   :  { %v4322_v62 = vadd.f32 1.0, %v5852_v2  ;;  %5853 = vrcp.f32 %v4321_v39 }
 0xc3f   :  { %5855 = vrcp.f32 %v4322_v62 }
 0xc4a   :  { %v5854_v34 = vpop.eup %5853 }
 0xc4c   :  { %v5856_v22 = vpop.eup %5855 }
 0xc4d   :  { %v4329_v15 = vcombine.low %v5854_v34, %v5856_v22 }
 0xc4f   :  { %4646 = vst.sshfl [vmem:[%s8169_s19] sm:$0x33 pattern:$0x76325410] %v4329_v15 }

</bundles_post_ra>
